<compile_context>
chip_gen: v6e
topology: v6e:2x2x1
jax: 0.10.0
libtpu: 0.0.40
codegen_flags: <defaults>
</compile_context>

<pallas_src>
import functools

import jax
import jax.numpy as jnp
import numpy as np
from jax import lax
from jax.experimental import pallas as pl
from jax.experimental.pallas import tpu as pltpu


def _round_up(x, m):
    return (x + m - 1) // m * m


def lstm_kernel(len_ref, x_ref, wih_ref, whh_ref, b_ref, wout_ref, bout_ref,
                out_ref, h_scr, c_scr, xseq_scr, gx_scr, *, unroll):
    """One (batch-block, time-chunk) grid step of the multi-layer masked LSTM.

    len_ref:  (bB, 1)       int32 true lengths for this batch block
    x_ref:    (tT, bB, E)   time-major embedding chunk (compute dtype)
    wih_ref:  (L, E, 4E)    input->gates weights (pre-transposed, gate-padded)
    whh_ref:  (L, E, 4E)    hidden->gates weights
    b_ref:    (L, 1, 4E)    combined bias (b_ih + b_hh), f32
    wout_ref: (E, 1)        output projection weight, f32
    bout_ref: (1, 1)        output projection bias, f32
    out_ref:  (bB, 1)       result (written on the last time chunk)
    h_scr/c_scr: (L, bB, E) f32 recurrent state, carried across time chunks
    xseq_scr: (tT, bB, E)   inter-layer hidden sequence (next layer's input)
    gx_scr:   (tT, bB, 4E)  f32 precomputed x @ W_ih + b for the current layer
    """
    tT, bB, E = x_ref.shape
    L = wih_ref.shape[0]
    G = 4 * E

    t_chunk = pl.program_id(1)
    n_chunks = pl.num_programs(1)

    @pl.when(t_chunk == 0)
    def _():
        h_scr[...] = jnp.zeros_like(h_scr)
        c_scr[...] = jnp.zeros_like(c_scr)

    # Hoisted once per grid step: remaining valid steps per row relative to
    # this chunk's first timestep.  (bB, 1) int32 sits in sublane-major layout
    # so the per-step mask is a single vector compare (no lane reshuffle);
    # bounded unroll keeps its replication negligible.
    rem = len_ref[...] - t_chunk * tT

    for l in range(L):                                # static unroll, L small
        # All input-projection FLOPs for this chunk in one large MXU matmul,
        # off the serial recurrence critical path (bias folded in here too).
        # Layer 0 reads the streamed x tile directly (no VMEM->VMEM copy);
        # deeper layers read the previous layer's hidden sequence.
        xs = (x_ref[...] if l == 0 else xseq_scr[...]).reshape(tT * bB, E)
        gx = jnp.dot(xs, wih_ref[l], preferred_element_type=jnp.float32)
        gx_scr[...] = (gx + b_ref[l]).reshape(tT, bB, G)

        last_layer = l == L - 1
        in_dtype = xs.dtype

        def step(t, carry, l=l, last_layer=last_layer, in_dtype=in_dtype):
            h_prev, c_prev = carry                    # f32 loop carries
            gates = gx_scr[t] + jnp.dot(h_prev.astype(in_dtype), whh_ref[l],
                                        preferred_element_type=jnp.float32)
            i = jax.nn.sigmoid(gates[:, 0 * E:1 * E])
            f = jax.nn.sigmoid(gates[:, 1 * E:2 * E])
            g = jnp.tanh(gates[:, 2 * E:3 * E])
            o = jax.nn.sigmoid(gates[:, 3 * E:4 * E])
            c_new = f * c_prev + i * g
            h_new = o * jnp.tanh(c_new)
            # Packed-sequence semantics: freeze state on padded timesteps.
            valid = t < rem                           # (bB, 1) bool
            h_new = jnp.where(valid, h_new, h_prev)
            c_new = jnp.where(valid, c_new, c_prev)
            if not last_layer:
                xseq_scr[t] = h_new.astype(in_dtype)  # next layer's input
            return h_new, c_new

        # h/c live in the fori_loop carry (no per-step scratch load/store);
        # the scratch is only read/written once per (layer, chunk).
        h_fin, c_fin = lax.fori_loop(0, tT, step, (h_scr[l], c_scr[l]),
                                     unroll=unroll)
        h_scr[l] = h_fin
        c_scr[l] = c_fin

    @pl.when(t_chunk == n_chunks - 1)
    def _():
        out_ref[...] = (jnp.dot(h_scr[L - 1], wout_ref[...],
                                preferred_element_type=jnp.float32)
                        + bout_ref[...])


def _pad_gate_cols(w, e, e_pad):
    """(rows, 4*e) -> (rows, 4*e_pad): each i/f/g/o block placed at k*e_pad."""
    if e == e_pad:
        return w
    rows = w.shape[0]
    out = jnp.zeros((rows, 4 * e_pad), w.dtype)
    for k in range(4):
        out = out.at[:, k * e_pad:k * e_pad + e].set(w[:, k * e:(k + 1) * e])
    return out


def _invariant_spec(shape):
    """BlockSpec for a grid-invariant weight tensor (constant index_map).

    Single-buffered: default double-buffering would only duplicate the weight
    VMEM footprint, which is exactly what limits tile size (and fit) on v7x.
    """
    ndims = len(shape)
    index_map = lambda bb, tt, _n=ndims: (0,) * _n
    if hasattr(pl, "Buffered"):
        return pl.BlockSpec(shape, index_map, pipeline_mode=pl.Buffered(1))
    return pl.BlockSpec(shape, index_map)


def init_params(key, vocab_size, embedding_dim, num_layers, pad_id):
    E = embedding_dim
    L = num_layers
    keys = jax.random.split(key, 4 + 4 * L)
    k = 1.0 / np.sqrt(E)

    emb = jax.random.normal(keys[0], (vocab_size + 2, E), jnp.float32)
    emb = emb.at[pad_id].set(0.0)                 # padding_idx row is zero

    wih, whh, bias = [], [], []
    for l in range(L):
        wih_l = jax.random.uniform(keys[1 + 4 * l], (4 * E, E), jnp.float32, -k, k)
        whh_l = jax.random.uniform(keys[2 + 4 * l], (4 * E, E), jnp.float32, -k, k)
        b_ih = jax.random.uniform(keys[3 + 4 * l], (4 * E,), jnp.float32, -k, k)
        b_hh = jax.random.uniform(keys[4 + 4 * l], (4 * E,), jnp.float32, -k, k)
        wih.append(wih_l.T)                       # (E, 4E)
        whh.append(whh_l.T)                       # (E, 4E)
        bias.append((b_ih + b_hh)[None, :])       # (1, 4E)
    wih = jnp.stack(wih)      # (L, E, 4E)
    whh = jnp.stack(whh)      # (L, E, 4E)
    bias = jnp.stack(bias)    # (L, 1, 4E)

    wout = jax.random.uniform(keys[-3], (1, E), jnp.float32, -k, k).T  # (E, 1)
    bout = jax.random.uniform(keys[-2], (1, 1), jnp.float32, -k, k)    # (1, 1)
    return dict(emb=emb, wih=wih, whh=whh, b=bias, wout=wout, bout=bout)


@functools.partial(jax.jit,
                   static_argnames=("time_block", "batch_block", "compute_dtype"))
def lstm_forward(ids, lengths, params, *, time_block=32, batch_block=128,
                 compute_dtype=jnp.bfloat16):
    """ids: (B, T) int32 already padded with pad_id; lengths: (B,) int32."""
    emb = params["emb"]
    wih, whh, b = params["wih"], params["whh"], params["b"]
    wout, bout = params["wout"], params["bout"]

    B, T = ids.shape
    L, E, _ = wih.shape
    assert batch_block % 8 == 0, "batch_block must be sublane-aligned"
    assert time_block % 8 == 0, "time_block must be a multiple of 8"

    # vreg-aligned kernel layout. Zero-padding E is exact: padded gate columns
    # get zero pre-activations, so padded hidden/cell columns stay exactly 0.
    E_pad = _round_up(E, 128)
    G = 4 * E_pad

    # Tile sizes: as large as the (padded) problem allows, up to the defaults,
    # so the serial h@W_hh matmul has M = bB >= 128 rows and the bulk x@W_ih
    # matmul has M = tT*bB in the thousands.
    bB = min(batch_block, _round_up(B, 8))
    # v7x megacore: keep >=2 batch blocks so the "parallel" axis feeds both
    # TensorCores (no effect on single-TC v5e/v6e, nor on tiny batches).
    if bB > 8 and _round_up(B, bB) // bB < 2:
        bB = max(8, _round_up((B + 1) // 2, 8))
    tT = min(time_block, _round_up(T, 8))
    B_pad = _round_up(B, bB)
    T_pad = _round_up(T, tT)
    nB = B_pad // bB
    nT = T_pad // tT

    # bf16 matmul operands (f32 accumulation, f32 h/c/gates) for the
    # bf16-native MXUs; halves weight VMEM and x HBM traffic.
    emb_p = jnp.pad(emb, ((0, 0), (0, E_pad - E))).astype(compute_dtype)
    wih_p = jnp.stack([jnp.pad(_pad_gate_cols(wih[l], E, E_pad),
                               ((0, E_pad - E), (0, 0))) for l in range(L)])
    whh_p = jnp.stack([jnp.pad(_pad_gate_cols(whh[l], E, E_pad),
                               ((0, E_pad - E), (0, 0))) for l in range(L)])
    wih_p = wih_p.astype(compute_dtype)
    whh_p = whh_p.astype(compute_dtype)
    b_p = jnp.stack([_pad_gate_cols(b[l], E, E_pad) for l in range(L)])
    wout_p = jnp.pad(wout, ((0, E_pad - E), (0, 0)))

    ids_p = jnp.pad(ids, ((0, B_pad - B), (0, T_pad - T)))   # masked anyway
    len_p = jnp.pad(lengths.astype(jnp.int32), (0, B_pad - B)).reshape(B_pad, 1)

    # Embedding gather + time-major transpose in the compute dtype (plain-JAX
    # glue; bf16 halves the HBM round-trip of the streamed x).
    # TODO(synk): gather embedding rows in-kernel (scalar-prefetched ids +
    # manual DMA gather) to avoid materializing x in HBM at all.
    x = jnp.transpose(emb_p[ids_p], (1, 0, 2))    # (T_pad, B_pad, E_pad)

    # Generation-aware VMEM budget: ~90% of physical capacity (~115 MiB on
    # v5e/v6e, ~57 MiB on v7x) so tile size is not artificially capped while
    # leaving Mosaic ~10% headroom for internal scratch.
    try:
        vmem_cap = pltpu.get_tpu_info().vmem_capacity_bytes
    except Exception:  # conservative fallback = v7x per-core capacity
        vmem_cap = 64 << 20
    vmem_limit = int(vmem_cap * 0.9)

    unroll = min(tT, 8)   # bounded unroll: limits code size / vreg live ranges

    kernel = functools.partial(lstm_kernel, unroll=unroll)

    out = pl.pallas_call(
        kernel,
        out_shape=jax.ShapeDtypeStruct((B_pad, 1), jnp.float32),
        grid=(nB, nT),
        in_specs=[
            pl.BlockSpec((bB, 1), lambda bb, tt: (bb, 0)),              # lengths
            pl.BlockSpec((tT, bB, E_pad), lambda bb, tt: (tt, bb, 0)),  # x chunk
            _invariant_spec((L, E_pad, G)),                             # W_ih
            _invariant_spec((L, E_pad, G)),                             # W_hh
            _invariant_spec((L, 1, G)),                                 # bias
            _invariant_spec((E_pad, 1)),                                # W_out
            _invariant_spec((1, 1)),                                    # b_out
        ],
        out_specs=pl.BlockSpec((bB, 1), lambda bb, tt: (bb, 0)),
        scratch_shapes=[
            pltpu.VMEM((L, bB, E_pad), jnp.float32),      # h state (f32)
            pltpu.VMEM((L, bB, E_pad), jnp.float32),      # c state (f32)
            pltpu.VMEM((tT, bB, E_pad), compute_dtype),   # inter-layer hidden seq
            pltpu.VMEM((tT, bB, G), jnp.float32),         # precomputed x-gates
        ],
        compiler_params=pltpu.CompilerParams(
            dimension_semantics=("parallel", "arbitrary"),
            vmem_limit_bytes=vmem_limit),
    )(len_p, x, wih_p, whh_p, b_p, wout_p, bout)
    return out[:B, 0]                              # (B,)  == .squeeze(1)


def reference_forward(ids, lengths, params, compute_dtype=jnp.float32):
    """Pure-JAX reference reproducing the PyTorch packed-LSTM semantics.

    `compute_dtype` mirrors the kernel's matmul-operand dtype (x / weights /
    h cast before each dot; f32 accumulation; f32 h, c and gates).
    """
    emb = params["emb"]
    wih, whh, b = params["wih"], params["whh"], params["b"]
    wout, bout = params["wout"], params["bout"]
    B, T = ids.shape
    L, E, _ = wih.shape
    cd = compute_dtype

    x = emb[ids].astype(cd)                        # (B, T, E)
    h = jnp.zeros((L, B, E), jnp.float32)
    c = jnp.zeros((L, B, E), jnp.float32)
    for t in range(T):
        valid = (t < lengths)[:, None]             # (B, 1) bool
        inp = x[:, t, :]
        for l in range(L):
            gates = (jnp.dot(inp, wih[l].astype(cd),
                             preferred_element_type=jnp.float32)
                     + jnp.dot(h[l].astype(cd), whh[l].astype(cd),
                               preferred_element_type=jnp.float32)
                     + b[l])
            i = jax.nn.sigmoid(gates[:, 0 * E:1 * E])
            f = jax.nn.sigmoid(gates[:, 1 * E:2 * E])
            g = jnp.tanh(gates[:, 2 * E:3 * E])
            o = jax.nn.sigmoid(gates[:, 3 * E:4 * E])
            c_new = f * c[l] + i * g
            h_new = o * jnp.tanh(c_new)
            c = c.at[l].set(jnp.where(valid, c_new, c[l]))
            h = h.at[l].set(jnp.where(valid, h_new, h[l]))
            inp = h[l].astype(cd)
    return (h[-1] @ wout + bout)[:, 0]


if __name__ == "__main__":
    # Small config consistent with the module's __init__
    vocab_size, embedding_dim, num_layers, pad_id = 20, 32, 2, 0
    B, T = 4, 8

    key = jax.random.PRNGKey(0)
    pkey, ikey = jax.random.split(key)
    params = init_params(pkey, vocab_size, embedding_dim, num_layers, pad_id)

    # Pre-padded id sequences (stands in for nn.utils.rnn.pad_sequence)
    lengths = jnp.array([8, 5, 3, 6], dtype=jnp.int32)
    ids = jax.random.randint(ikey, (B, T), 1, vocab_size + 2, dtype=jnp.int32)
    pad_mask = jnp.arange(T)[None, :] < lengths[:, None]
    ids = jnp.where(pad_mask, ids, pad_id)

    # Exact-precision path: bit-tight check against the pure-JAX reference.
    out_f32 = lstm_forward(ids, lengths, params, compute_dtype=jnp.float32)
    out_f32 = jax.block_until_ready(out_f32)
    ref_f32 = reference_forward(ids, lengths, params, jnp.float32)
    np.testing.assert_allclose(np.asarray(out_f32), np.asarray(ref_f32),
                               rtol=1e-5, atol=1e-5)

    # Default (performance) path: bf16 matmul operands, f32 accumulation,
    # compared against a reference that uses the same operand dtype.
    out = lstm_forward(ids, lengths, params)
    out = jax.block_until_ready(out)
    ref_bf16 = reference_forward(ids, lengths, params, jnp.bfloat16)
    np.testing.assert_allclose(np.asarray(out), np.asarray(ref_bf16),
                               rtol=2e-3, atol=2e-3)
    print("KERNEL_OK")
</pallas_src>

<mosaic_0001>
module attributes {stable_mosaic.version = 11 : i64} {
  func.func @lstm_kernel(%arg0: i32, %arg1: i32, %arg2: memref<8x1xi32, #tpu.memory_space<vmem>>, %arg3: memref<8x8x128xf32, #tpu.memory_space<vmem>>, %arg4: memref<2x128x512xf32, #tpu.memory_space<vmem>>, %arg5: memref<2x128x512xf32, #tpu.memory_space<vmem>>, %arg6: memref<2x1x512xf32, #tpu.memory_space<vmem>>, %arg7: memref<128x1xf32, #tpu.memory_space<vmem>>, %arg8: memref<1x1xf32, #tpu.memory_space<vmem>>, %arg9: memref<8x1xf32, #tpu.memory_space<vmem>>, %arg10: memref<2x8x128xf32, #tpu.memory_space<vmem>>, %arg11: memref<2x8x128xf32, #tpu.memory_space<vmem>>, %arg12: memref<8x8x128xf32, #tpu.memory_space<vmem>>, %arg13: memref<8x8x512xf32, #tpu.memory_space<vmem>>) attributes {dimension_semantics = [#tpu.dimension_semantics<parallel>, #tpu.dimension_semantics<arbitrary>], iteration_bounds = array<i64: 1, 1>, scalar_prefetch = 0 : i64, scratch_operands = 4 : i64, tpu.core_type = #tpu.core_type<tc>, window_params = [{transform_indices = @transform_0, window_bounds = array<i64: 8, 1>}, {transform_indices = @transform_1, window_bounds = array<i64: 8, 8, 128>}, {pipeline_mode = #tpu.pipeline_mode<synchronous>, transform_indices = @transform_2, window_bounds = array<i64: 2, 128, 512>}, {pipeline_mode = #tpu.pipeline_mode<synchronous>, transform_indices = @transform_3, window_bounds = array<i64: 2, 128, 512>}, {pipeline_mode = #tpu.pipeline_mode<synchronous>, transform_indices = @transform_4, window_bounds = array<i64: 2, 1, 512>}, {pipeline_mode = #tpu.pipeline_mode<synchronous>, transform_indices = @transform_5, window_bounds = array<i64: 128, 1>}, {pipeline_mode = #tpu.pipeline_mode<synchronous>, transform_indices = @transform_6, window_bounds = array<i64: 1, 1>}, {transform_indices = @transform_7, window_bounds = array<i64: 8, 1>}]} {
    %c0_i32 = arith.constant 0 : i32
    %0 = arith.cmpi eq, %arg1, %c0_i32 : i32
    %1 = arith.extui %0 : i1 to i32
    %c0_i32_0 = arith.constant 0 : i32
    %2 = arith.cmpi ne, %1, %c0_i32_0 : i32
    scf.if %2 {
      %cst_223 = arith.constant 0.000000e+00 : f32
      %724 = vector.broadcast %cst_223 : f32 to vector<2x8x128xf32>
      %c0_224 = arith.constant 0 : index
      %c0_225 = arith.constant 0 : index
      %c0_226 = arith.constant 0 : index
      %725 = vector.load %arg10[%c0_224, %c0_225, %c0_226] : memref<2x8x128xf32, #tpu.memory_space<vmem>>, vector<2x8x128xf32>
      tpu.vector_store %arg10[%c0_224, %c0_225, %c0_226], %724 {strides = array<i32>} : memref<2x8x128xf32, #tpu.memory_space<vmem>>, vector<2x8x128xf32>,
      %cst_227 = arith.constant 0.000000e+00 : f32
      %726 = vector.broadcast %cst_227 : f32 to vector<2x8x128xf32>
      %c0_228 = arith.constant 0 : index
      %c0_229 = arith.constant 0 : index
      %c0_230 = arith.constant 0 : index
      %727 = vector.load %arg11[%c0_228, %c0_229, %c0_230] : memref<2x8x128xf32, #tpu.memory_space<vmem>>, vector<2x8x128xf32>
      tpu.vector_store %arg11[%c0_228, %c0_229, %c0_230], %726 {strides = array<i32>} : memref<2x8x128xf32, #tpu.memory_space<vmem>>, vector<2x8x128xf32>,
    } else {
    }
    %c0 = arith.constant 0 : index
    %c0_1 = arith.constant 0 : index
    %3 = vector.load %arg2[%c0, %c0_1] : memref<8x1xi32, #tpu.memory_space<vmem>>, vector<8x1xi32>
    %c8_i32 = arith.constant 8 : i32
    %4 = arith.muli %arg1, %c8_i32 : i32
    %5 = vector.broadcast %4 : i32 to vector<8x1xi32>
    %6 = arith.subi %3, %5 : vector<8x1xi32>
    %c0_2 = arith.constant 0 : index
    %c0_3 = arith.constant 0 : index
    %c0_4 = arith.constant 0 : index
    %7 = vector.load %arg3[%c0_2, %c0_3, %c0_4] : memref<8x8x128xf32, #tpu.memory_space<vmem>>, vector<8x8x128xf32>
    %8 = vector.shape_cast %7 : vector<8x8x128xf32> to vector<64x128xf32>
    %c0_5 = arith.constant 0 : index
    %c0_6 = arith.constant 0 : index
    %c0_7 = arith.constant 0 : index
    %9 = vector.load %arg4[%c0_5, %c0_6, %c0_7] : memref<2x128x512xf32, #tpu.memory_space<vmem>>, vector<1x128x512xf32>
    %10 = vector.shape_cast %9 : vector<1x128x512xf32> to vector<128x512xf32>
    %cst = arith.constant dense<0.000000e+00> : vector<64x512xf32>
    %11 = tpu.matmul %8, %10, %cst {dimension_numbers = #tpu.dot_dimension_numbers<[1], [0], [0], [1], [0, 0, 1, 1], [], []>} : vector<64x128xf32>, vector<128x512xf32>, vector<64x512xf32> -> vector<64x512xf32>
    %c0_8 = arith.constant 0 : index
    %c0_9 = arith.constant 0 : index
    %c0_10 = arith.constant 0 : index
    %12 = vector.load %arg6[%c0_8, %c0_9, %c0_10] : memref<2x1x512xf32, #tpu.memory_space<vmem>>, vector<1x1x512xf32>
    %13 = vector.shape_cast %12 : vector<1x1x512xf32> to vector<1x512xf32>
    %14 = vector.broadcast %13 : vector<1x512xf32> to vector<64x512xf32>
    %15 = arith.addf %11, %14 : vector<64x512xf32>
    %16 = vector.shape_cast %15 : vector<64x512xf32> to vector<8x8x512xf32>
    %c0_11 = arith.constant 0 : index
    %c0_12 = arith.constant 0 : index
    %c0_13 = arith.constant 0 : index
    %17 = vector.load %arg13[%c0_11, %c0_12, %c0_13] : memref<8x8x512xf32, #tpu.memory_space<vmem>>, vector<8x8x512xf32>
    tpu.vector_store %arg13[%c0_11, %c0_12, %c0_13], %16 {strides = array<i32>} : memref<8x8x512xf32, #tpu.memory_space<vmem>>, vector<8x8x512xf32>,
    %c0_14 = arith.constant 0 : index
    %c0_15 = arith.constant 0 : index
    %c0_16 = arith.constant 0 : index
    %18 = vector.load %arg10[%c0_14, %c0_15, %c0_16] : memref<2x8x128xf32, #tpu.memory_space<vmem>>, vector<1x8x128xf32>
    %19 = vector.shape_cast %18 : vector<1x8x128xf32> to vector<8x128xf32>
    %c0_17 = arith.constant 0 : index
    %c0_18 = arith.constant 0 : index
    %c0_19 = arith.constant 0 : index
    %20 = vector.load %arg11[%c0_17, %c0_18, %c0_19] : memref<2x8x128xf32, #tpu.memory_space<vmem>>, vector<1x8x128xf32>
    %21 = vector.shape_cast %20 : vector<1x8x128xf32> to vector<8x128xf32>
    %c0_i32_20 = arith.constant 0 : i32
    %22 = arith.index_cast %c0_i32_20 : i32 to index
    %c0_21 = arith.constant 0 : index
    %c0_22 = arith.constant 0 : index
    %23 = vector.load %arg13[%22, %c0_21, %c0_22] : memref<8x8x512xf32, #tpu.memory_space<vmem>>, vector<1x8x512xf32>
    %24 = vector.shape_cast %23 : vector<1x8x512xf32> to vector<8x512xf32>
    %c0_23 = arith.constant 0 : index
    %c0_24 = arith.constant 0 : index
    %c0_25 = arith.constant 0 : index
    %25 = vector.load %arg5[%c0_23, %c0_24, %c0_25] : memref<2x128x512xf32, #tpu.memory_space<vmem>>, vector<1x128x512xf32>
    %26 = vector.shape_cast %25 : vector<1x128x512xf32> to vector<128x512xf32>
    %cst_26 = arith.constant dense<0.000000e+00> : vector<8x512xf32>
    %27 = tpu.matmul %19, %26, %cst_26 {dimension_numbers = #tpu.dot_dimension_numbers<[1], [0], [0], [1], [0, 0, 1, 1], [], []>} : vector<8x128xf32>, vector<128x512xf32>, vector<8x512xf32> -> vector<8x512xf32>
    %28 = arith.addf %24, %27 : vector<8x512xf32>
    %29 = vector.extract_strided_slice %28 {offsets = [0, 0], sizes = [8, 128], strides = [1, 1]} : vector<8x512xf32> to vector<8x128xf32>
    %30 = arith.negf %29 : vector<8x128xf32>
    %31 = math.exp %30 : vector<8x128xf32>
    %cst_27 = arith.constant 1.000000e+00 : f32
    %32 = vector.broadcast %cst_27 : f32 to vector<8x128xf32>
    %33 = arith.addf %32, %31 : vector<8x128xf32>
    %34 = arith.divf %32, %33 : vector<8x128xf32>
    %35 = vector.extract_strided_slice %28 {offsets = [0, 128], sizes = [8, 128], strides = [1, 1]} : vector<8x512xf32> to vector<8x128xf32>
    %36 = arith.negf %35 : vector<8x128xf32>
    %37 = math.exp %36 : vector<8x128xf32>
    %cst_28 = arith.constant 1.000000e+00 : f32
    %38 = vector.broadcast %cst_28 : f32 to vector<8x128xf32>
    %39 = arith.addf %38, %37 : vector<8x128xf32>
    %40 = arith.divf %38, %39 : vector<8x128xf32>
    %41 = vector.extract_strided_slice %28 {offsets = [0, 256], sizes = [8, 128], strides = [1, 1]} : vector<8x512xf32> to vector<8x128xf32>
    %42 = math.tanh %41 : vector<8x128xf32>
    %43 = vector.extract_strided_slice %28 {offsets = [0, 384], sizes = [8, 128], strides = [1, 1]} : vector<8x512xf32> to vector<8x128xf32>
    %44 = arith.negf %43 : vector<8x128xf32>
    %45 = math.exp %44 : vector<8x128xf32>
    %cst_29 = arith.constant 1.000000e+00 : f32
    %46 = vector.broadcast %cst_29 : f32 to vector<8x128xf32>
    %47 = arith.addf %46, %45 : vector<8x128xf32>
    %48 = arith.divf %46, %47 : vector<8x128xf32>
    %49 = arith.mulf %40, %21 : vector<8x128xf32>
    %50 = arith.mulf %34, %42 : vector<8x128xf32>
    %51 = arith.addf %49, %50 : vector<8x128xf32>
    %52 = math.tanh %51 : vector<8x128xf32>
    %53 = arith.mulf %48, %52 : vector<8x128xf32>
    %54 = vector.broadcast %c0_i32_20 : i32 to vector<8x1xi32>
    %55 = arith.cmpi slt, %54, %6 : vector<8x1xi32>
    %56 = vector.shape_cast %55 : vector<8x1xi1> to vector<8x1xi1>
    %57 = vector.broadcast %56 : vector<8x1xi1> to vector<8x128xi1>
    %58 = arith.select %57, %53, %19 : vector<8x128xi1>, vector<8x128xf32>
    %59 = vector.shape_cast %55 : vector<8x1xi1> to vector<8x1xi1>
    %60 = vector.broadcast %59 : vector<8x1xi1> to vector<8x128xi1>
    %61 = arith.select %60, %51, %21 : vector<8x128xi1>, vector<8x128xf32>
    %62 = arith.index_cast %c0_i32_20 : i32 to index
    %c0_30 = arith.constant 0 : index
    %c0_31 = arith.constant 0 : index
    %63 = vector.load %arg12[%62, %c0_30, %c0_31] : memref<8x8x128xf32, #tpu.memory_space<vmem>>, vector<1x8x128xf32>
    %64 = vector.shape_cast %63 : vector<1x8x128xf32> to vector<8x128xf32>
    %65 = vector.shape_cast %58 : vector<8x128xf32> to vector<1x8x128xf32>
    tpu.vector_store %arg12[%62, %c0_30, %c0_31], %65 {strides = array<i32>} : memref<8x8x128xf32, #tpu.memory_space<vmem>>, vector<1x8x128xf32>,
    %c1_i32 = arith.constant 1 : i32
    %66 = arith.index_cast %c1_i32 : i32 to index
    %c0_32 = arith.constant 0 : index
    %c0_33 = arith.constant 0 : index
    %67 = vector.load %arg13[%66, %c0_32, %c0_33] : memref<8x8x512xf32, #tpu.memory_space<vmem>>, vector<1x8x512xf32>
    %68 = vector.shape_cast %67 : vector<1x8x512xf32> to vector<8x512xf32>
    %c0_34 = arith.constant 0 : index
    %c0_35 = arith.constant 0 : index
    %c0_36 = arith.constant 0 : index
    %69 = vector.load %arg5[%c0_34, %c0_35, %c0_36] : memref<2x128x512xf32, #tpu.memory_space<vmem>>, vector<1x128x512xf32>
    %70 = vector.shape_cast %69 : vector<1x128x512xf32> to vector<128x512xf32>
    %cst_37 = arith.constant dense<0.000000e+00> : vector<8x512xf32>
    %71 = tpu.matmul %58, %70, %cst_37 {dimension_numbers = #tpu.dot_dimension_numbers<[1], [0], [0], [1], [0, 0, 1, 1], [], []>} : vector<8x128xf32>, vector<128x512xf32>, vector<8x512xf32> -> vector<8x512xf32>
    %72 = arith.addf %68, %71 : vector<8x512xf32>
    %73 = vector.extract_strided_slice %72 {offsets = [0, 0], sizes = [8, 128], strides = [1, 1]} : vector<8x512xf32> to vector<8x128xf32>
    %74 = arith.negf %73 : vector<8x128xf32>
    %75 = math.exp %74 : vector<8x128xf32>
    %cst_38 = arith.constant 1.000000e+00 : f32
    %76 = vector.broadcast %cst_38 : f32 to vector<8x128xf32>
    %77 = arith.addf %76, %75 : vector<8x128xf32>
    %78 = arith.divf %76, %77 : vector<8x128xf32>
    %79 = vector.extract_strided_slice %72 {offsets = [0, 128], sizes = [8, 128], strides = [1, 1]} : vector<8x512xf32> to vector<8x128xf32>
    %80 = arith.negf %79 : vector<8x128xf32>
    %81 = math.exp %80 : vector<8x128xf32>
    %cst_39 = arith.constant 1.000000e+00 : f32
    %82 = vector.broadcast %cst_39 : f32 to vector<8x128xf32>
    %83 = arith.addf %82, %81 : vector<8x128xf32>
    %84 = arith.divf %82, %83 : vector<8x128xf32>
    %85 = vector.extract_strided_slice %72 {offsets = [0, 256], sizes = [8, 128], strides = [1, 1]} : vector<8x512xf32> to vector<8x128xf32>
    %86 = math.tanh %85 : vector<8x128xf32>
    %87 = vector.extract_strided_slice %72 {offsets = [0, 384], sizes = [8, 128], strides = [1, 1]} : vector<8x512xf32> to vector<8x128xf32>
    %88 = arith.negf %87 : vector<8x128xf32>
    %89 = math.exp %88 : vector<8x128xf32>
    %cst_40 = arith.constant 1.000000e+00 : f32
    %90 = vector.broadcast %cst_40 : f32 to vector<8x128xf32>
    %91 = arith.addf %90, %89 : vector<8x128xf32>
    %92 = arith.divf %90, %91 : vector<8x128xf32>
    %93 = arith.mulf %84, %61 : vector<8x128xf32>
    %94 = arith.mulf %78, %86 : vector<8x128xf32>
    %95 = arith.addf %93, %94 : vector<8x128xf32>
    %96 = math.tanh %95 : vector<8x128xf32>
    %97 = arith.mulf %92, %96 : vector<8x128xf32>
    %98 = vector.broadcast %c1_i32 : i32 to vector<8x1xi32>
    %99 = arith.cmpi slt, %98, %6 : vector<8x1xi32>
    %100 = vector.shape_cast %99 : vector<8x1xi1> to vector<8x1xi1>
    %101 = vector.broadcast %100 : vector<8x1xi1> to vector<8x128xi1>
    %102 = arith.select %101, %97, %58 : vector<8x128xi1>, vector<8x128xf32>
    %103 = vector.shape_cast %99 : vector<8x1xi1> to vector<8x1xi1>
    %104 = vector.broadcast %103 : vector<8x1xi1> to vector<8x128xi1>
    %105 = arith.select %104, %95, %61 : vector<8x128xi1>, vector<8x128xf32>
    %106 = arith.index_cast %c1_i32 : i32 to index
    %c0_41 = arith.constant 0 : index
    %c0_42 = arith.constant 0 : index
    %107 = vector.load %arg12[%106, %c0_41, %c0_42] : memref<8x8x128xf32, #tpu.memory_space<vmem>>, vector<1x8x128xf32>
    %108 = vector.shape_cast %107 : vector<1x8x128xf32> to vector<8x128xf32>
    %109 = vector.shape_cast %102 : vector<8x128xf32> to vector<1x8x128xf32>
    tpu.vector_store %arg12[%106, %c0_41, %c0_42], %109 {strides = array<i32>} : memref<8x8x128xf32, #tpu.memory_space<vmem>>, vector<1x8x128xf32>,
    %c2_i32 = arith.constant 2 : i32
    %110 = arith.index_cast %c2_i32 : i32 to index
    %c0_43 = arith.constant 0 : index
    %c0_44 = arith.constant 0 : index
    %111 = vector.load %arg13[%110, %c0_43, %c0_44] : memref<8x8x512xf32, #tpu.memory_space<vmem>>, vector<1x8x512xf32>
    %112 = vector.shape_cast %111 : vector<1x8x512xf32> to vector<8x512xf32>
    %c0_45 = arith.constant 0 : index
    %c0_46 = arith.constant 0 : index
    %c0_47 = arith.constant 0 : index
    %113 = vector.load %arg5[%c0_45, %c0_46, %c0_47] : memref<2x128x512xf32, #tpu.memory_space<vmem>>, vector<1x128x512xf32>
    %114 = vector.shape_cast %113 : vector<1x128x512xf32> to vector<128x512xf32>
    %cst_48 = arith.constant dense<0.000000e+00> : vector<8x512xf32>
    %115 = tpu.matmul %102, %114, %cst_48 {dimension_numbers = #tpu.dot_dimension_numbers<[1], [0], [0], [1], [0, 0, 1, 1], [], []>} : vector<8x128xf32>, vector<128x512xf32>, vector<8x512xf32> -> vector<8x512xf32>
    %116 = arith.addf %112, %115 : vector<8x512xf32>
    %117 = vector.extract_strided_slice %116 {offsets = [0, 0], sizes = [8, 128], strides = [1, 1]} : vector<8x512xf32> to vector<8x128xf32>
    %118 = arith.negf %117 : vector<8x128xf32>
    %119 = math.exp %118 : vector<8x128xf32>
    %cst_49 = arith.constant 1.000000e+00 : f32
    %120 = vector.broadcast %cst_49 : f32 to vector<8x128xf32>
    %121 = arith.addf %120, %119 : vector<8x128xf32>
    %122 = arith.divf %120, %121 : vector<8x128xf32>
    %123 = vector.extract_strided_slice %116 {offsets = [0, 128], sizes = [8, 128], strides = [1, 1]} : vector<8x512xf32> to vector<8x128xf32>
    %124 = arith.negf %123 : vector<8x128xf32>
    %125 = math.exp %124 : vector<8x128xf32>
    %cst_50 = arith.constant 1.000000e+00 : f32
    %126 = vector.broadcast %cst_50 : f32 to vector<8x128xf32>
    %127 = arith.addf %126, %125 : vector<8x128xf32>
    %128 = arith.divf %126, %127 : vector<8x128xf32>
    %129 = vector.extract_strided_slice %116 {offsets = [0, 256], sizes = [8, 128], strides = [1, 1]} : vector<8x512xf32> to vector<8x128xf32>
    %130 = math.tanh %129 : vector<8x128xf32>
    %131 = vector.extract_strided_slice %116 {offsets = [0, 384], sizes = [8, 128], strides = [1, 1]} : vector<8x512xf32> to vector<8x128xf32>
    %132 = arith.negf %131 : vector<8x128xf32>
    %133 = math.exp %132 : vector<8x128xf32>
    %cst_51 = arith.constant 1.000000e+00 : f32
    %134 = vector.broadcast %cst_51 : f32 to vector<8x128xf32>
    %135 = arith.addf %134, %133 : vector<8x128xf32>
    %136 = arith.divf %134, %135 : vector<8x128xf32>
    %137 = arith.mulf %128, %105 : vector<8x128xf32>
    %138 = arith.mulf %122, %130 : vector<8x128xf32>
    %139 = arith.addf %137, %138 : vector<8x128xf32>
    %140 = math.tanh %139 : vector<8x128xf32>
    %141 = arith.mulf %136, %140 : vector<8x128xf32>
    %142 = vector.broadcast %c2_i32 : i32 to vector<8x1xi32>
    %143 = arith.cmpi slt, %142, %6 : vector<8x1xi32>
    %144 = vector.shape_cast %143 : vector<8x1xi1> to vector<8x1xi1>
    %145 = vector.broadcast %144 : vector<8x1xi1> to vector<8x128xi1>
    %146 = arith.select %145, %141, %102 : vector<8x128xi1>, vector<8x128xf32>
    %147 = vector.shape_cast %143 : vector<8x1xi1> to vector<8x1xi1>
    %148 = vector.broadcast %147 : vector<8x1xi1> to vector<8x128xi1>
    %149 = arith.select %148, %139, %105 : vector<8x128xi1>, vector<8x128xf32>
    %150 = arith.index_cast %c2_i32 : i32 to index
    %c0_52 = arith.constant 0 : index
    %c0_53 = arith.constant 0 : index
    %151 = vector.load %arg12[%150, %c0_52, %c0_53] : memref<8x8x128xf32, #tpu.memory_space<vmem>>, vector<1x8x128xf32>
    %152 = vector.shape_cast %151 : vector<1x8x128xf32> to vector<8x128xf32>
    %153 = vector.shape_cast %146 : vector<8x128xf32> to vector<1x8x128xf32>
    tpu.vector_store %arg12[%150, %c0_52, %c0_53], %153 {strides = array<i32>} : memref<8x8x128xf32, #tpu.memory_space<vmem>>, vector<1x8x128xf32>,
    %c3_i32 = arith.constant 3 : i32
    %154 = arith.index_cast %c3_i32 : i32 to index
    %c0_54 = arith.constant 0 : index
    %c0_55 = arith.constant 0 : index
    %155 = vector.load %arg13[%154, %c0_54, %c0_55] : memref<8x8x512xf32, #tpu.memory_space<vmem>>, vector<1x8x512xf32>
    %156 = vector.shape_cast %155 : vector<1x8x512xf32> to vector<8x512xf32>
    %c0_56 = arith.constant 0 : index
    %c0_57 = arith.constant 0 : index
    %c0_58 = arith.constant 0 : index
    %157 = vector.load %arg5[%c0_56, %c0_57, %c0_58] : memref<2x128x512xf32, #tpu.memory_space<vmem>>, vector<1x128x512xf32>
    %158 = vector.shape_cast %157 : vector<1x128x512xf32> to vector<128x512xf32>
    %cst_59 = arith.constant dense<0.000000e+00> : vector<8x512xf32>
    %159 = tpu.matmul %146, %158, %cst_59 {dimension_numbers = #tpu.dot_dimension_numbers<[1], [0], [0], [1], [0, 0, 1, 1], [], []>} : vector<8x128xf32>, vector<128x512xf32>, vector<8x512xf32> -> vector<8x512xf32>
    %160 = arith.addf %156, %159 : vector<8x512xf32>
    %161 = vector.extract_strided_slice %160 {offsets = [0, 0], sizes = [8, 128], strides = [1, 1]} : vector<8x512xf32> to vector<8x128xf32>
    %162 = arith.negf %161 : vector<8x128xf32>
    %163 = math.exp %162 : vector<8x128xf32>
    %cst_60 = arith.constant 1.000000e+00 : f32
    %164 = vector.broadcast %cst_60 : f32 to vector<8x128xf32>
    %165 = arith.addf %164, %163 : vector<8x128xf32>
    %166 = arith.divf %164, %165 : vector<8x128xf32>
    %167 = vector.extract_strided_slice %160 {offsets = [0, 128], sizes = [8, 128], strides = [1, 1]} : vector<8x512xf32> to vector<8x128xf32>
    %168 = arith.negf %167 : vector<8x128xf32>
    %169 = math.exp %168 : vector<8x128xf32>
    %cst_61 = arith.constant 1.000000e+00 : f32
    %170 = vector.broadcast %cst_61 : f32 to vector<8x128xf32>
    %171 = arith.addf %170, %169 : vector<8x128xf32>
    %172 = arith.divf %170, %171 : vector<8x128xf32>
    %173 = vector.extract_strided_slice %160 {offsets = [0, 256], sizes = [8, 128], strides = [1, 1]} : vector<8x512xf32> to vector<8x128xf32>
    %174 = math.tanh %173 : vector<8x128xf32>
    %175 = vector.extract_strided_slice %160 {offsets = [0, 384], sizes = [8, 128], strides = [1, 1]} : vector<8x512xf32> to vector<8x128xf32>
    %176 = arith.negf %175 : vector<8x128xf32>
    %177 = math.exp %176 : vector<8x128xf32>
    %cst_62 = arith.constant 1.000000e+00 : f32
    %178 = vector.broadcast %cst_62 : f32 to vector<8x128xf32>
    %179 = arith.addf %178, %177 : vector<8x128xf32>
    %180 = arith.divf %178, %179 : vector<8x128xf32>
    %181 = arith.mulf %172, %149 : vector<8x128xf32>
    %182 = arith.mulf %166, %174 : vector<8x128xf32>
    %183 = arith.addf %181, %182 : vector<8x128xf32>
    %184 = math.tanh %183 : vector<8x128xf32>
    %185 = arith.mulf %180, %184 : vector<8x128xf32>
    %186 = vector.broadcast %c3_i32 : i32 to vector<8x1xi32>
    %187 = arith.cmpi slt, %186, %6 : vector<8x1xi32>
    %188 = vector.shape_cast %187 : vector<8x1xi1> to vector<8x1xi1>
    %189 = vector.broadcast %188 : vector<8x1xi1> to vector<8x128xi1>
    %190 = arith.select %189, %185, %146 : vector<8x128xi1>, vector<8x128xf32>
    %191 = vector.shape_cast %187 : vector<8x1xi1> to vector<8x1xi1>
    %192 = vector.broadcast %191 : vector<8x1xi1> to vector<8x128xi1>
    %193 = arith.select %192, %183, %149 : vector<8x128xi1>, vector<8x128xf32>
    %194 = arith.index_cast %c3_i32 : i32 to index
    %c0_63 = arith.constant 0 : index
    %c0_64 = arith.constant 0 : index
    %195 = vector.load %arg12[%194, %c0_63, %c0_64] : memref<8x8x128xf32, #tpu.memory_space<vmem>>, vector<1x8x128xf32>
    %196 = vector.shape_cast %195 : vector<1x8x128xf32> to vector<8x128xf32>
    %197 = vector.shape_cast %190 : vector<8x128xf32> to vector<1x8x128xf32>
    tpu.vector_store %arg12[%194, %c0_63, %c0_64], %197 {strides = array<i32>} : memref<8x8x128xf32, #tpu.memory_space<vmem>>, vector<1x8x128xf32>,
    %c4_i32 = arith.constant 4 : i32
    %198 = arith.index_cast %c4_i32 : i32 to index
    %c0_65 = arith.constant 0 : index
    %c0_66 = arith.constant 0 : index
    %199 = vector.load %arg13[%198, %c0_65, %c0_66] : memref<8x8x512xf32, #tpu.memory_space<vmem>>, vector<1x8x512xf32>
    %200 = vector.shape_cast %199 : vector<1x8x512xf32> to vector<8x512xf32>
    %c0_67 = arith.constant 0 : index
    %c0_68 = arith.constant 0 : index
    %c0_69 = arith.constant 0 : index
    %201 = vector.load %arg5[%c0_67, %c0_68, %c0_69] : memref<2x128x512xf32, #tpu.memory_space<vmem>>, vector<1x128x512xf32>
    %202 = vector.shape_cast %201 : vector<1x128x512xf32> to vector<128x512xf32>
    %cst_70 = arith.constant dense<0.000000e+00> : vector<8x512xf32>
    %203 = tpu.matmul %190, %202, %cst_70 {dimension_numbers = #tpu.dot_dimension_numbers<[1], [0], [0], [1], [0, 0, 1, 1], [], []>} : vector<8x128xf32>, vector<128x512xf32>, vector<8x512xf32> -> vector<8x512xf32>
    %204 = arith.addf %200, %203 : vector<8x512xf32>
    %205 = vector.extract_strided_slice %204 {offsets = [0, 0], sizes = [8, 128], strides = [1, 1]} : vector<8x512xf32> to vector<8x128xf32>
    %206 = arith.negf %205 : vector<8x128xf32>
    %207 = math.exp %206 : vector<8x128xf32>
    %cst_71 = arith.constant 1.000000e+00 : f32
    %208 = vector.broadcast %cst_71 : f32 to vector<8x128xf32>
    %209 = arith.addf %208, %207 : vector<8x128xf32>
    %210 = arith.divf %208, %209 : vector<8x128xf32>
    %211 = vector.extract_strided_slice %204 {offsets = [0, 128], sizes = [8, 128], strides = [1, 1]} : vector<8x512xf32> to vector<8x128xf32>
    %212 = arith.negf %211 : vector<8x128xf32>
    %213 = math.exp %212 : vector<8x128xf32>
    %cst_72 = arith.constant 1.000000e+00 : f32
    %214 = vector.broadcast %cst_72 : f32 to vector<8x128xf32>
    %215 = arith.addf %214, %213 : vector<8x128xf32>
    %216 = arith.divf %214, %215 : vector<8x128xf32>
    %217 = vector.extract_strided_slice %204 {offsets = [0, 256], sizes = [8, 128], strides = [1, 1]} : vector<8x512xf32> to vector<8x128xf32>
    %218 = math.tanh %217 : vector<8x128xf32>
    %219 = vector.extract_strided_slice %204 {offsets = [0, 384], sizes = [8, 128], strides = [1, 1]} : vector<8x512xf32> to vector<8x128xf32>
    %220 = arith.negf %219 : vector<8x128xf32>
    %221 = math.exp %220 : vector<8x128xf32>
    %cst_73 = arith.constant 1.000000e+00 : f32
    %222 = vector.broadcast %cst_73 : f32 to vector<8x128xf32>
    %223 = arith.addf %222, %221 : vector<8x128xf32>
    %224 = arith.divf %222, %223 : vector<8x128xf32>
    %225 = arith.mulf %216, %193 : vector<8x128xf32>
    %226 = arith.mulf %210, %218 : vector<8x128xf32>
    %227 = arith.addf %225, %226 : vector<8x128xf32>
    %228 = math.tanh %227 : vector<8x128xf32>
    %229 = arith.mulf %224, %228 : vector<8x128xf32>
    %230 = vector.broadcast %c4_i32 : i32 to vector<8x1xi32>
    %231 = arith.cmpi slt, %230, %6 : vector<8x1xi32>
    %232 = vector.shape_cast %231 : vector<8x1xi1> to vector<8x1xi1>
    %233 = vector.broadcast %232 : vector<8x1xi1> to vector<8x128xi1>
    %234 = arith.select %233, %229, %190 : vector<8x128xi1>, vector<8x128xf32>
    %235 = vector.shape_cast %231 : vector<8x1xi1> to vector<8x1xi1>
    %236 = vector.broadcast %235 : vector<8x1xi1> to vector<8x128xi1>
    %237 = arith.select %236, %227, %193 : vector<8x128xi1>, vector<8x128xf32>
    %238 = arith.index_cast %c4_i32 : i32 to index
    %c0_74 = arith.constant 0 : index
    %c0_75 = arith.constant 0 : index
    %239 = vector.load %arg12[%238, %c0_74, %c0_75] : memref<8x8x128xf32, #tpu.memory_space<vmem>>, vector<1x8x128xf32>
    %240 = vector.shape_cast %239 : vector<1x8x128xf32> to vector<8x128xf32>
    %241 = vector.shape_cast %234 : vector<8x128xf32> to vector<1x8x128xf32>
    tpu.vector_store %arg12[%238, %c0_74, %c0_75], %241 {strides = array<i32>} : memref<8x8x128xf32, #tpu.memory_space<vmem>>, vector<1x8x128xf32>,
    %c5_i32 = arith.constant 5 : i32
    %242 = arith.index_cast %c5_i32 : i32 to index
    %c0_76 = arith.constant 0 : index
    %c0_77 = arith.constant 0 : index
    %243 = vector.load %arg13[%242, %c0_76, %c0_77] : memref<8x8x512xf32, #tpu.memory_space<vmem>>, vector<1x8x512xf32>
    %244 = vector.shape_cast %243 : vector<1x8x512xf32> to vector<8x512xf32>
    %c0_78 = arith.constant 0 : index
    %c0_79 = arith.constant 0 : index
    %c0_80 = arith.constant 0 : index
    %245 = vector.load %arg5[%c0_78, %c0_79, %c0_80] : memref<2x128x512xf32, #tpu.memory_space<vmem>>, vector<1x128x512xf32>
    %246 = vector.shape_cast %245 : vector<1x128x512xf32> to vector<128x512xf32>
    %cst_81 = arith.constant dense<0.000000e+00> : vector<8x512xf32>
    %247 = tpu.matmul %234, %246, %cst_81 {dimension_numbers = #tpu.dot_dimension_numbers<[1], [0], [0], [1], [0, 0, 1, 1], [], []>} : vector<8x128xf32>, vector<128x512xf32>, vector<8x512xf32> -> vector<8x512xf32>
    %248 = arith.addf %244, %247 : vector<8x512xf32>
    %249 = vector.extract_strided_slice %248 {offsets = [0, 0], sizes = [8, 128], strides = [1, 1]} : vector<8x512xf32> to vector<8x128xf32>
    %250 = arith.negf %249 : vector<8x128xf32>
    %251 = math.exp %250 : vector<8x128xf32>
    %cst_82 = arith.constant 1.000000e+00 : f32
    %252 = vector.broadcast %cst_82 : f32 to vector<8x128xf32>
    %253 = arith.addf %252, %251 : vector<8x128xf32>
    %254 = arith.divf %252, %253 : vector<8x128xf32>
    %255 = vector.extract_strided_slice %248 {offsets = [0, 128], sizes = [8, 128], strides = [1, 1]} : vector<8x512xf32> to vector<8x128xf32>
    %256 = arith.negf %255 : vector<8x128xf32>
    %257 = math.exp %256 : vector<8x128xf32>
    %cst_83 = arith.constant 1.000000e+00 : f32
    %258 = vector.broadcast %cst_83 : f32 to vector<8x128xf32>
    %259 = arith.addf %258, %257 : vector<8x128xf32>
    %260 = arith.divf %258, %259 : vector<8x128xf32>
    %261 = vector.extract_strided_slice %248 {offsets = [0, 256], sizes = [8, 128], strides = [1, 1]} : vector<8x512xf32> to vector<8x128xf32>
    %262 = math.tanh %261 : vector<8x128xf32>
    %263 = vector.extract_strided_slice %248 {offsets = [0, 384], sizes = [8, 128], strides = [1, 1]} : vector<8x512xf32> to vector<8x128xf32>
    %264 = arith.negf %263 : vector<8x128xf32>
    %265 = math.exp %264 : vector<8x128xf32>
    %cst_84 = arith.constant 1.000000e+00 : f32
    %266 = vector.broadcast %cst_84 : f32 to vector<8x128xf32>
    %267 = arith.addf %266, %265 : vector<8x128xf32>
    %268 = arith.divf %266, %267 : vector<8x128xf32>
    %269 = arith.mulf %260, %237 : vector<8x128xf32>
    %270 = arith.mulf %254, %262 : vector<8x128xf32>
    %271 = arith.addf %269, %270 : vector<8x128xf32>
    %272 = math.tanh %271 : vector<8x128xf32>
    %273 = arith.mulf %268, %272 : vector<8x128xf32>
    %274 = vector.broadcast %c5_i32 : i32 to vector<8x1xi32>
    %275 = arith.cmpi slt, %274, %6 : vector<8x1xi32>
    %276 = vector.shape_cast %275 : vector<8x1xi1> to vector<8x1xi1>
    %277 = vector.broadcast %276 : vector<8x1xi1> to vector<8x128xi1>
    %278 = arith.select %277, %273, %234 : vector<8x128xi1>, vector<8x128xf32>
    %279 = vector.shape_cast %275 : vector<8x1xi1> to vector<8x1xi1>
    %280 = vector.broadcast %279 : vector<8x1xi1> to vector<8x128xi1>
    %281 = arith.select %280, %271, %237 : vector<8x128xi1>, vector<8x128xf32>
    %282 = arith.index_cast %c5_i32 : i32 to index
    %c0_85 = arith.constant 0 : index
    %c0_86 = arith.constant 0 : index
    %283 = vector.load %arg12[%282, %c0_85, %c0_86] : memref<8x8x128xf32, #tpu.memory_space<vmem>>, vector<1x8x128xf32>
    %284 = vector.shape_cast %283 : vector<1x8x128xf32> to vector<8x128xf32>
    %285 = vector.shape_cast %278 : vector<8x128xf32> to vector<1x8x128xf32>
    tpu.vector_store %arg12[%282, %c0_85, %c0_86], %285 {strides = array<i32>} : memref<8x8x128xf32, #tpu.memory_space<vmem>>, vector<1x8x128xf32>,
    %c6_i32 = arith.constant 6 : i32
    %286 = arith.index_cast %c6_i32 : i32 to index
    %c0_87 = arith.constant 0 : index
    %c0_88 = arith.constant 0 : index
    %287 = vector.load %arg13[%286, %c0_87, %c0_88] : memref<8x8x512xf32, #tpu.memory_space<vmem>>, vector<1x8x512xf32>
    %288 = vector.shape_cast %287 : vector<1x8x512xf32> to vector<8x512xf32>
    %c0_89 = arith.constant 0 : index
    %c0_90 = arith.constant 0 : index
    %c0_91 = arith.constant 0 : index
    %289 = vector.load %arg5[%c0_89, %c0_90, %c0_91] : memref<2x128x512xf32, #tpu.memory_space<vmem>>, vector<1x128x512xf32>
    %290 = vector.shape_cast %289 : vector<1x128x512xf32> to vector<128x512xf32>
    %cst_92 = arith.constant dense<0.000000e+00> : vector<8x512xf32>
    %291 = tpu.matmul %278, %290, %cst_92 {dimension_numbers = #tpu.dot_dimension_numbers<[1], [0], [0], [1], [0, 0, 1, 1], [], []>} : vector<8x128xf32>, vector<128x512xf32>, vector<8x512xf32> -> vector<8x512xf32>
    %292 = arith.addf %288, %291 : vector<8x512xf32>
    %293 = vector.extract_strided_slice %292 {offsets = [0, 0], sizes = [8, 128], strides = [1, 1]} : vector<8x512xf32> to vector<8x128xf32>
    %294 = arith.negf %293 : vector<8x128xf32>
    %295 = math.exp %294 : vector<8x128xf32>
    %cst_93 = arith.constant 1.000000e+00 : f32
    %296 = vector.broadcast %cst_93 : f32 to vector<8x128xf32>
    %297 = arith.addf %296, %295 : vector<8x128xf32>
    %298 = arith.divf %296, %297 : vector<8x128xf32>
    %299 = vector.extract_strided_slice %292 {offsets = [0, 128], sizes = [8, 128], strides = [1, 1]} : vector<8x512xf32> to vector<8x128xf32>
    %300 = arith.negf %299 : vector<8x128xf32>
    %301 = math.exp %300 : vector<8x128xf32>
    %cst_94 = arith.constant 1.000000e+00 : f32
    %302 = vector.broadcast %cst_94 : f32 to vector<8x128xf32>
    %303 = arith.addf %302, %301 : vector<8x128xf32>
    %304 = arith.divf %302, %303 : vector<8x128xf32>
    %305 = vector.extract_strided_slice %292 {offsets = [0, 256], sizes = [8, 128], strides = [1, 1]} : vector<8x512xf32> to vector<8x128xf32>
    %306 = math.tanh %305 : vector<8x128xf32>
    %307 = vector.extract_strided_slice %292 {offsets = [0, 384], sizes = [8, 128], strides = [1, 1]} : vector<8x512xf32> to vector<8x128xf32>
    %308 = arith.negf %307 : vector<8x128xf32>
    %309 = math.exp %308 : vector<8x128xf32>
    %cst_95 = arith.constant 1.000000e+00 : f32
    %310 = vector.broadcast %cst_95 : f32 to vector<8x128xf32>
    %311 = arith.addf %310, %309 : vector<8x128xf32>
    %312 = arith.divf %310, %311 : vector<8x128xf32>
    %313 = arith.mulf %304, %281 : vector<8x128xf32>
    %314 = arith.mulf %298, %306 : vector<8x128xf32>
    %315 = arith.addf %313, %314 : vector<8x128xf32>
    %316 = math.tanh %315 : vector<8x128xf32>
    %317 = arith.mulf %312, %316 : vector<8x128xf32>
    %318 = vector.broadcast %c6_i32 : i32 to vector<8x1xi32>
    %319 = arith.cmpi slt, %318, %6 : vector<8x1xi32>
    %320 = vector.shape_cast %319 : vector<8x1xi1> to vector<8x1xi1>
    %321 = vector.broadcast %320 : vector<8x1xi1> to vector<8x128xi1>
    %322 = arith.select %321, %317, %278 : vector<8x128xi1>, vector<8x128xf32>
    %323 = vector.shape_cast %319 : vector<8x1xi1> to vector<8x1xi1>
    %324 = vector.broadcast %323 : vector<8x1xi1> to vector<8x128xi1>
    %325 = arith.select %324, %315, %281 : vector<8x128xi1>, vector<8x128xf32>
    %326 = arith.index_cast %c6_i32 : i32 to index
    %c0_96 = arith.constant 0 : index
    %c0_97 = arith.constant 0 : index
    %327 = vector.load %arg12[%326, %c0_96, %c0_97] : memref<8x8x128xf32, #tpu.memory_space<vmem>>, vector<1x8x128xf32>
    %328 = vector.shape_cast %327 : vector<1x8x128xf32> to vector<8x128xf32>
    %329 = vector.shape_cast %322 : vector<8x128xf32> to vector<1x8x128xf32>
    tpu.vector_store %arg12[%326, %c0_96, %c0_97], %329 {strides = array<i32>} : memref<8x8x128xf32, #tpu.memory_space<vmem>>, vector<1x8x128xf32>,
    %c7_i32 = arith.constant 7 : i32
    %330 = arith.index_cast %c7_i32 : i32 to index
    %c0_98 = arith.constant 0 : index
    %c0_99 = arith.constant 0 : index
    %331 = vector.load %arg13[%330, %c0_98, %c0_99] : memref<8x8x512xf32, #tpu.memory_space<vmem>>, vector<1x8x512xf32>
    %332 = vector.shape_cast %331 : vector<1x8x512xf32> to vector<8x512xf32>
    %c0_100 = arith.constant 0 : index
    %c0_101 = arith.constant 0 : index
    %c0_102 = arith.constant 0 : index
    %333 = vector.load %arg5[%c0_100, %c0_101, %c0_102] : memref<2x128x512xf32, #tpu.memory_space<vmem>>, vector<1x128x512xf32>
    %334 = vector.shape_cast %333 : vector<1x128x512xf32> to vector<128x512xf32>
    %cst_103 = arith.constant dense<0.000000e+00> : vector<8x512xf32>
    %335 = tpu.matmul %322, %334, %cst_103 {dimension_numbers = #tpu.dot_dimension_numbers<[1], [0], [0], [1], [0, 0, 1, 1], [], []>} : vector<8x128xf32>, vector<128x512xf32>, vector<8x512xf32> -> vector<8x512xf32>
    %336 = arith.addf %332, %335 : vector<8x512xf32>
    %337 = vector.extract_strided_slice %336 {offsets = [0, 0], sizes = [8, 128], strides = [1, 1]} : vector<8x512xf32> to vector<8x128xf32>
    %338 = arith.negf %337 : vector<8x128xf32>
    %339 = math.exp %338 : vector<8x128xf32>
    %cst_104 = arith.constant 1.000000e+00 : f32
    %340 = vector.broadcast %cst_104 : f32 to vector<8x128xf32>
    %341 = arith.addf %340, %339 : vector<8x128xf32>
    %342 = arith.divf %340, %341 : vector<8x128xf32>
    %343 = vector.extract_strided_slice %336 {offsets = [0, 128], sizes = [8, 128], strides = [1, 1]} : vector<8x512xf32> to vector<8x128xf32>
    %344 = arith.negf %343 : vector<8x128xf32>
    %345 = math.exp %344 : vector<8x128xf32>
    %cst_105 = arith.constant 1.000000e+00 : f32
    %346 = vector.broadcast %cst_105 : f32 to vector<8x128xf32>
    %347 = arith.addf %346, %345 : vector<8x128xf32>
    %348 = arith.divf %346, %347 : vector<8x128xf32>
    %349 = vector.extract_strided_slice %336 {offsets = [0, 256], sizes = [8, 128], strides = [1, 1]} : vector<8x512xf32> to vector<8x128xf32>
    %350 = math.tanh %349 : vector<8x128xf32>
    %351 = vector.extract_strided_slice %336 {offsets = [0, 384], sizes = [8, 128], strides = [1, 1]} : vector<8x512xf32> to vector<8x128xf32>
    %352 = arith.negf %351 : vector<8x128xf32>
    %353 = math.exp %352 : vector<8x128xf32>
    %cst_106 = arith.constant 1.000000e+00 : f32
    %354 = vector.broadcast %cst_106 : f32 to vector<8x128xf32>
    %355 = arith.addf %354, %353 : vector<8x128xf32>
    %356 = arith.divf %354, %355 : vector<8x128xf32>
    %357 = arith.mulf %348, %325 : vector<8x128xf32>
    %358 = arith.mulf %342, %350 : vector<8x128xf32>
    %359 = arith.addf %357, %358 : vector<8x128xf32>
    %360 = math.tanh %359 : vector<8x128xf32>
    %361 = arith.mulf %356, %360 : vector<8x128xf32>
    %362 = vector.broadcast %c7_i32 : i32 to vector<8x1xi32>
    %363 = arith.cmpi slt, %362, %6 : vector<8x1xi32>
    %364 = vector.shape_cast %363 : vector<8x1xi1> to vector<8x1xi1>
    %365 = vector.broadcast %364 : vector<8x1xi1> to vector<8x128xi1>
    %366 = arith.select %365, %361, %322 : vector<8x128xi1>, vector<8x128xf32>
    %367 = vector.shape_cast %363 : vector<8x1xi1> to vector<8x1xi1>
    %368 = vector.broadcast %367 : vector<8x1xi1> to vector<8x128xi1>
    %369 = arith.select %368, %359, %325 : vector<8x128xi1>, vector<8x128xf32>
    %370 = arith.index_cast %c7_i32 : i32 to index
    %c0_107 = arith.constant 0 : index
    %c0_108 = arith.constant 0 : index
    %371 = vector.load %arg12[%370, %c0_107, %c0_108] : memref<8x8x128xf32, #tpu.memory_space<vmem>>, vector<1x8x128xf32>
    %372 = vector.shape_cast %371 : vector<1x8x128xf32> to vector<8x128xf32>
    %373 = vector.shape_cast %366 : vector<8x128xf32> to vector<1x8x128xf32>
    tpu.vector_store %arg12[%370, %c0_107, %c0_108], %373 {strides = array<i32>} : memref<8x8x128xf32, #tpu.memory_space<vmem>>, vector<1x8x128xf32>,
    %c8_i32_109 = arith.constant 8 : i32
    %c0_110 = arith.constant 0 : index
    %c0_111 = arith.constant 0 : index
    %c0_112 = arith.constant 0 : index
    %374 = vector.load %arg10[%c0_110, %c0_111, %c0_112] : memref<2x8x128xf32, #tpu.memory_space<vmem>>, vector<1x8x128xf32>
    %375 = vector.shape_cast %374 : vector<1x8x128xf32> to vector<8x128xf32>
    %376 = vector.shape_cast %366 : vector<8x128xf32> to vector<1x8x128xf32>
    tpu.vector_store %arg10[%c0_110, %c0_111, %c0_112], %376 {strides = array<i32>} : memref<2x8x128xf32, #tpu.memory_space<vmem>>, vector<1x8x128xf32>,
    %c0_113 = arith.constant 0 : index
    %c0_114 = arith.constant 0 : index
    %c0_115 = arith.constant 0 : index
    %377 = vector.load %arg11[%c0_113, %c0_114, %c0_115] : memref<2x8x128xf32, #tpu.memory_space<vmem>>, vector<1x8x128xf32>
    %378 = vector.shape_cast %377 : vector<1x8x128xf32> to vector<8x128xf32>
    %379 = vector.shape_cast %369 : vector<8x128xf32> to vector<1x8x128xf32>
    tpu.vector_store %arg11[%c0_113, %c0_114, %c0_115], %379 {strides = array<i32>} : memref<2x8x128xf32, #tpu.memory_space<vmem>>, vector<1x8x128xf32>,
    %c0_116 = arith.constant 0 : index
    %c0_117 = arith.constant 0 : index
    %c0_118 = arith.constant 0 : index
    %380 = vector.load %arg12[%c0_116, %c0_117, %c0_118] : memref<8x8x128xf32, #tpu.memory_space<vmem>>, vector<8x8x128xf32>
    %381 = vector.shape_cast %380 : vector<8x8x128xf32> to vector<64x128xf32>
    %c1 = arith.constant 1 : index
    %c0_119 = arith.constant 0 : index
    %c0_120 = arith.constant 0 : index
    %382 = vector.load %arg4[%c1, %c0_119, %c0_120] : memref<2x128x512xf32, #tpu.memory_space<vmem>>, vector<1x128x512xf32>
    %383 = vector.shape_cast %382 : vector<1x128x512xf32> to vector<128x512xf32>
    %cst_121 = arith.constant dense<0.000000e+00> : vector<64x512xf32>
    %384 = tpu.matmul %381, %383, %cst_121 {dimension_numbers = #tpu.dot_dimension_numbers<[1], [0], [0], [1], [0, 0, 1, 1], [], []>} : vector<64x128xf32>, vector<128x512xf32>, vector<64x512xf32> -> vector<64x512xf32>
    %c1_122 = arith.constant 1 : index
    %c0_123 = arith.constant 0 : index
    %c0_124 = arith.constant 0 : index
    %385 = vector.load %arg6[%c1_122, %c0_123, %c0_124] : memref<2x1x512xf32, #tpu.memory_space<vmem>>, vector<1x1x512xf32>
    %386 = vector.shape_cast %385 : vector<1x1x512xf32> to vector<1x512xf32>
    %387 = vector.broadcast %386 : vector<1x512xf32> to vector<64x512xf32>
    %388 = arith.addf %384, %387 : vector<64x512xf32>
    %389 = vector.shape_cast %388 : vector<64x512xf32> to vector<8x8x512xf32>
    %c0_125 = arith.constant 0 : index
    %c0_126 = arith.constant 0 : index
    %c0_127 = arith.constant 0 : index
    %390 = vector.load %arg13[%c0_125, %c0_126, %c0_127] : memref<8x8x512xf32, #tpu.memory_space<vmem>>, vector<8x8x512xf32>
    tpu.vector_store %arg13[%c0_125, %c0_126, %c0_127], %389 {strides = array<i32>} : memref<8x8x512xf32, #tpu.memory_space<vmem>>, vector<8x8x512xf32>,
    %c1_128 = arith.constant 1 : index
    %c0_129 = arith.constant 0 : index
    %c0_130 = arith.constant 0 : index
    %391 = vector.load %arg10[%c1_128, %c0_129, %c0_130] : memref<2x8x128xf32, #tpu.memory_space<vmem>>, vector<1x8x128xf32>
    %392 = vector.shape_cast %391 : vector<1x8x128xf32> to vector<8x128xf32>
    %c1_131 = arith.constant 1 : index
    %c0_132 = arith.constant 0 : index
    %c0_133 = arith.constant 0 : index
    %393 = vector.load %arg11[%c1_131, %c0_132, %c0_133] : memref<2x8x128xf32, #tpu.memory_space<vmem>>, vector<1x8x128xf32>
    %394 = vector.shape_cast %393 : vector<1x8x128xf32> to vector<8x128xf32>
    %c0_i32_134 = arith.constant 0 : i32
    %395 = arith.index_cast %c0_i32_134 : i32 to index
    %c0_135 = arith.constant 0 : index
    %c0_136 = arith.constant 0 : index
    %396 = vector.load %arg13[%395, %c0_135, %c0_136] : memref<8x8x512xf32, #tpu.memory_space<vmem>>, vector<1x8x512xf32>
    %397 = vector.shape_cast %396 : vector<1x8x512xf32> to vector<8x512xf32>
    %c1_137 = arith.constant 1 : index
    %c0_138 = arith.constant 0 : index
    %c0_139 = arith.constant 0 : index
    %398 = vector.load %arg5[%c1_137, %c0_138, %c0_139] : memref<2x128x512xf32, #tpu.memory_space<vmem>>, vector<1x128x512xf32>
    %399 = vector.shape_cast %398 : vector<1x128x512xf32> to vector<128x512xf32>
    %cst_140 = arith.constant dense<0.000000e+00> : vector<8x512xf32>
    %400 = tpu.matmul %392, %399, %cst_140 {dimension_numbers = #tpu.dot_dimension_numbers<[1], [0], [0], [1], [0, 0, 1, 1], [], []>} : vector<8x128xf32>, vector<128x512xf32>, vector<8x512xf32> -> vector<8x512xf32>
    %401 = arith.addf %397, %400 : vector<8x512xf32>
    %402 = vector.extract_strided_slice %401 {offsets = [0, 0], sizes = [8, 128], strides = [1, 1]} : vector<8x512xf32> to vector<8x128xf32>
    %403 = arith.negf %402 : vector<8x128xf32>
    %404 = math.exp %403 : vector<8x128xf32>
    %cst_141 = arith.constant 1.000000e+00 : f32
    %405 = vector.broadcast %cst_141 : f32 to vector<8x128xf32>
    %406 = arith.addf %405, %404 : vector<8x128xf32>
    %407 = arith.divf %405, %406 : vector<8x128xf32>
    %408 = vector.extract_strided_slice %401 {offsets = [0, 128], sizes = [8, 128], strides = [1, 1]} : vector<8x512xf32> to vector<8x128xf32>
    %409 = arith.negf %408 : vector<8x128xf32>
    %410 = math.exp %409 : vector<8x128xf32>
    %cst_142 = arith.constant 1.000000e+00 : f32
    %411 = vector.broadcast %cst_142 : f32 to vector<8x128xf32>
    %412 = arith.addf %411, %410 : vector<8x128xf32>
    %413 = arith.divf %411, %412 : vector<8x128xf32>
    %414 = vector.extract_strided_slice %401 {offsets = [0, 256], sizes = [8, 128], strides = [1, 1]} : vector<8x512xf32> to vector<8x128xf32>
    %415 = math.tanh %414 : vector<8x128xf32>
    %416 = vector.extract_strided_slice %401 {offsets = [0, 384], sizes = [8, 128], strides = [1, 1]} : vector<8x512xf32> to vector<8x128xf32>
    %417 = arith.negf %416 : vector<8x128xf32>
    %418 = math.exp %417 : vector<8x128xf32>
    %cst_143 = arith.constant 1.000000e+00 : f32
    %419 = vector.broadcast %cst_143 : f32 to vector<8x128xf32>
    %420 = arith.addf %419, %418 : vector<8x128xf32>
    %421 = arith.divf %419, %420 : vector<8x128xf32>
    %422 = arith.mulf %413, %394 : vector<8x128xf32>
    %423 = arith.mulf %407, %415 : vector<8x128xf32>
    %424 = arith.addf %422, %423 : vector<8x128xf32>
    %425 = math.tanh %424 : vector<8x128xf32>
    %426 = arith.mulf %421, %425 : vector<8x128xf32>
    %427 = vector.broadcast %c0_i32_134 : i32 to vector<8x1xi32>
    %428 = arith.cmpi slt, %427, %6 : vector<8x1xi32>
    %429 = vector.shape_cast %428 : vector<8x1xi1> to vector<8x1xi1>
    %430 = vector.broadcast %429 : vector<8x1xi1> to vector<8x128xi1>
    %431 = arith.select %430, %426, %392 : vector<8x128xi1>, vector<8x128xf32>
    %432 = vector.shape_cast %428 : vector<8x1xi1> to vector<8x1xi1>
    %433 = vector.broadcast %432 : vector<8x1xi1> to vector<8x128xi1>
    %434 = arith.select %433, %424, %394 : vector<8x128xi1>, vector<8x128xf32>
    %c1_i32_144 = arith.constant 1 : i32
    %435 = arith.index_cast %c1_i32_144 : i32 to index
    %c0_145 = arith.constant 0 : index
    %c0_146 = arith.constant 0 : index
    %436 = vector.load %arg13[%435, %c0_145, %c0_146] : memref<8x8x512xf32, #tpu.memory_space<vmem>>, vector<1x8x512xf32>
    %437 = vector.shape_cast %436 : vector<1x8x512xf32> to vector<8x512xf32>
    %c1_147 = arith.constant 1 : index
    %c0_148 = arith.constant 0 : index
    %c0_149 = arith.constant 0 : index
    %438 = vector.load %arg5[%c1_147, %c0_148, %c0_149] : memref<2x128x512xf32, #tpu.memory_space<vmem>>, vector<1x128x512xf32>
    %439 = vector.shape_cast %438 : vector<1x128x512xf32> to vector<128x512xf32>
    %cst_150 = arith.constant dense<0.000000e+00> : vector<8x512xf32>
    %440 = tpu.matmul %431, %439, %cst_150 {dimension_numbers = #tpu.dot_dimension_numbers<[1], [0], [0], [1], [0, 0, 1, 1], [], []>} : vector<8x128xf32>, vector<128x512xf32>, vector<8x512xf32> -> vector<8x512xf32>
    %441 = arith.addf %437, %440 : vector<8x512xf32>
    %442 = vector.extract_strided_slice %441 {offsets = [0, 0], sizes = [8, 128], strides = [1, 1]} : vector<8x512xf32> to vector<8x128xf32>
    %443 = arith.negf %442 : vector<8x128xf32>
    %444 = math.exp %443 : vector<8x128xf32>
    %cst_151 = arith.constant 1.000000e+00 : f32
    %445 = vector.broadcast %cst_151 : f32 to vector<8x128xf32>
    %446 = arith.addf %445, %444 : vector<8x128xf32>
    %447 = arith.divf %445, %446 : vector<8x128xf32>
    %448 = vector.extract_strided_slice %441 {offsets = [0, 128], sizes = [8, 128], strides = [1, 1]} : vector<8x512xf32> to vector<8x128xf32>
    %449 = arith.negf %448 : vector<8x128xf32>
    %450 = math.exp %449 : vector<8x128xf32>
    %cst_152 = arith.constant 1.000000e+00 : f32
    %451 = vector.broadcast %cst_152 : f32 to vector<8x128xf32>
    %452 = arith.addf %451, %450 : vector<8x128xf32>
    %453 = arith.divf %451, %452 : vector<8x128xf32>
    %454 = vector.extract_strided_slice %441 {offsets = [0, 256], sizes = [8, 128], strides = [1, 1]} : vector<8x512xf32> to vector<8x128xf32>
    %455 = math.tanh %454 : vector<8x128xf32>
    %456 = vector.extract_strided_slice %441 {offsets = [0, 384], sizes = [8, 128], strides = [1, 1]} : vector<8x512xf32> to vector<8x128xf32>
    %457 = arith.negf %456 : vector<8x128xf32>
    %458 = math.exp %457 : vector<8x128xf32>
    %cst_153 = arith.constant 1.000000e+00 : f32
    %459 = vector.broadcast %cst_153 : f32 to vector<8x128xf32>
    %460 = arith.addf %459, %458 : vector<8x128xf32>
    %461 = arith.divf %459, %460 : vector<8x128xf32>
    %462 = arith.mulf %453, %434 : vector<8x128xf32>
    %463 = arith.mulf %447, %455 : vector<8x128xf32>
    %464 = arith.addf %462, %463 : vector<8x128xf32>
    %465 = math.tanh %464 : vector<8x128xf32>
    %466 = arith.mulf %461, %465 : vector<8x128xf32>
    %467 = vector.broadcast %c1_i32_144 : i32 to vector<8x1xi32>
    %468 = arith.cmpi slt, %467, %6 : vector<8x1xi32>
    %469 = vector.shape_cast %468 : vector<8x1xi1> to vector<8x1xi1>
    %470 = vector.broadcast %469 : vector<8x1xi1> to vector<8x128xi1>
    %471 = arith.select %470, %466, %431 : vector<8x128xi1>, vector<8x128xf32>
    %472 = vector.shape_cast %468 : vector<8x1xi1> to vector<8x1xi1>
    %473 = vector.broadcast %472 : vector<8x1xi1> to vector<8x128xi1>
    %474 = arith.select %473, %464, %434 : vector<8x128xi1>, vector<8x128xf32>
    %c2_i32_154 = arith.constant 2 : i32
    %475 = arith.index_cast %c2_i32_154 : i32 to index
    %c0_155 = arith.constant 0 : index
    %c0_156 = arith.constant 0 : index
    %476 = vector.load %arg13[%475, %c0_155, %c0_156] : memref<8x8x512xf32, #tpu.memory_space<vmem>>, vector<1x8x512xf32>
    %477 = vector.shape_cast %476 : vector<1x8x512xf32> to vector<8x512xf32>
    %c1_157 = arith.constant 1 : index
    %c0_158 = arith.constant 0 : index
    %c0_159 = arith.constant 0 : index
    %478 = vector.load %arg5[%c1_157, %c0_158, %c0_159] : memref<2x128x512xf32, #tpu.memory_space<vmem>>, vector<1x128x512xf32>
    %479 = vector.shape_cast %478 : vector<1x128x512xf32> to vector<128x512xf32>
    %cst_160 = arith.constant dense<0.000000e+00> : vector<8x512xf32>
    %480 = tpu.matmul %471, %479, %cst_160 {dimension_numbers = #tpu.dot_dimension_numbers<[1], [0], [0], [1], [0, 0, 1, 1], [], []>} : vector<8x128xf32>, vector<128x512xf32>, vector<8x512xf32> -> vector<8x512xf32>
    %481 = arith.addf %477, %480 : vector<8x512xf32>
    %482 = vector.extract_strided_slice %481 {offsets = [0, 0], sizes = [8, 128], strides = [1, 1]} : vector<8x512xf32> to vector<8x128xf32>
    %483 = arith.negf %482 : vector<8x128xf32>
    %484 = math.exp %483 : vector<8x128xf32>
    %cst_161 = arith.constant 1.000000e+00 : f32
    %485 = vector.broadcast %cst_161 : f32 to vector<8x128xf32>
    %486 = arith.addf %485, %484 : vector<8x128xf32>
    %487 = arith.divf %485, %486 : vector<8x128xf32>
    %488 = vector.extract_strided_slice %481 {offsets = [0, 128], sizes = [8, 128], strides = [1, 1]} : vector<8x512xf32> to vector<8x128xf32>
    %489 = arith.negf %488 : vector<8x128xf32>
    %490 = math.exp %489 : vector<8x128xf32>
    %cst_162 = arith.constant 1.000000e+00 : f32
    %491 = vector.broadcast %cst_162 : f32 to vector<8x128xf32>
    %492 = arith.addf %491, %490 : vector<8x128xf32>
    %493 = arith.divf %491, %492 : vector<8x128xf32>
    %494 = vector.extract_strided_slice %481 {offsets = [0, 256], sizes = [8, 128], strides = [1, 1]} : vector<8x512xf32> to vector<8x128xf32>
    %495 = math.tanh %494 : vector<8x128xf32>
    %496 = vector.extract_strided_slice %481 {offsets = [0, 384], sizes = [8, 128], strides = [1, 1]} : vector<8x512xf32> to vector<8x128xf32>
    %497 = arith.negf %496 : vector<8x128xf32>
    %498 = math.exp %497 : vector<8x128xf32>
    %cst_163 = arith.constant 1.000000e+00 : f32
    %499 = vector.broadcast %cst_163 : f32 to vector<8x128xf32>
    %500 = arith.addf %499, %498 : vector<8x128xf32>
    %501 = arith.divf %499, %500 : vector<8x128xf32>
    %502 = arith.mulf %493, %474 : vector<8x128xf32>
    %503 = arith.mulf %487, %495 : vector<8x128xf32>
    %504 = arith.addf %502, %503 : vector<8x128xf32>
    %505 = math.tanh %504 : vector<8x128xf32>
    %506 = arith.mulf %501, %505 : vector<8x128xf32>
    %507 = vector.broadcast %c2_i32_154 : i32 to vector<8x1xi32>
    %508 = arith.cmpi slt, %507, %6 : vector<8x1xi32>
    %509 = vector.shape_cast %508 : vector<8x1xi1> to vector<8x1xi1>
    %510 = vector.broadcast %509 : vector<8x1xi1> to vector<8x128xi1>
    %511 = arith.select %510, %506, %471 : vector<8x128xi1>, vector<8x128xf32>
    %512 = vector.shape_cast %508 : vector<8x1xi1> to vector<8x1xi1>
    %513 = vector.broadcast %512 : vector<8x1xi1> to vector<8x128xi1>
    %514 = arith.select %513, %504, %474 : vector<8x128xi1>, vector<8x128xf32>
    %c3_i32_164 = arith.constant 3 : i32
    %515 = arith.index_cast %c3_i32_164 : i32 to index
    %c0_165 = arith.constant 0 : index
    %c0_166 = arith.constant 0 : index
    %516 = vector.load %arg13[%515, %c0_165, %c0_166] : memref<8x8x512xf32, #tpu.memory_space<vmem>>, vector<1x8x512xf32>
    %517 = vector.shape_cast %516 : vector<1x8x512xf32> to vector<8x512xf32>
    %c1_167 = arith.constant 1 : index
    %c0_168 = arith.constant 0 : index
    %c0_169 = arith.constant 0 : index
    %518 = vector.load %arg5[%c1_167, %c0_168, %c0_169] : memref<2x128x512xf32, #tpu.memory_space<vmem>>, vector<1x128x512xf32>
    %519 = vector.shape_cast %518 : vector<1x128x512xf32> to vector<128x512xf32>
    %cst_170 = arith.constant dense<0.000000e+00> : vector<8x512xf32>
    %520 = tpu.matmul %511, %519, %cst_170 {dimension_numbers = #tpu.dot_dimension_numbers<[1], [0], [0], [1], [0, 0, 1, 1], [], []>} : vector<8x128xf32>, vector<128x512xf32>, vector<8x512xf32> -> vector<8x512xf32>
    %521 = arith.addf %517, %520 : vector<8x512xf32>
    %522 = vector.extract_strided_slice %521 {offsets = [0, 0], sizes = [8, 128], strides = [1, 1]} : vector<8x512xf32> to vector<8x128xf32>
    %523 = arith.negf %522 : vector<8x128xf32>
    %524 = math.exp %523 : vector<8x128xf32>
    %cst_171 = arith.constant 1.000000e+00 : f32
    %525 = vector.broadcast %cst_171 : f32 to vector<8x128xf32>
    %526 = arith.addf %525, %524 : vector<8x128xf32>
    %527 = arith.divf %525, %526 : vector<8x128xf32>
    %528 = vector.extract_strided_slice %521 {offsets = [0, 128], sizes = [8, 128], strides = [1, 1]} : vector<8x512xf32> to vector<8x128xf32>
    %529 = arith.negf %528 : vector<8x128xf32>
    %530 = math.exp %529 : vector<8x128xf32>
    %cst_172 = arith.constant 1.000000e+00 : f32
    %531 = vector.broadcast %cst_172 : f32 to vector<8x128xf32>
    %532 = arith.addf %531, %530 : vector<8x128xf32>
    %533 = arith.divf %531, %532 : vector<8x128xf32>
    %534 = vector.extract_strided_slice %521 {offsets = [0, 256], sizes = [8, 128], strides = [1, 1]} : vector<8x512xf32> to vector<8x128xf32>
    %535 = math.tanh %534 : vector<8x128xf32>
    %536 = vector.extract_strided_slice %521 {offsets = [0, 384], sizes = [8, 128], strides = [1, 1]} : vector<8x512xf32> to vector<8x128xf32>
    %537 = arith.negf %536 : vector<8x128xf32>
    %538 = math.exp %537 : vector<8x128xf32>
    %cst_173 = arith.constant 1.000000e+00 : f32
    %539 = vector.broadcast %cst_173 : f32 to vector<8x128xf32>
    %540 = arith.addf %539, %538 : vector<8x128xf32>
    %541 = arith.divf %539, %540 : vector<8x128xf32>
    %542 = arith.mulf %533, %514 : vector<8x128xf32>
    %543 = arith.mulf %527, %535 : vector<8x128xf32>
    %544 = arith.addf %542, %543 : vector<8x128xf32>
    %545 = math.tanh %544 : vector<8x128xf32>
    %546 = arith.mulf %541, %545 : vector<8x128xf32>
    %547 = vector.broadcast %c3_i32_164 : i32 to vector<8x1xi32>
    %548 = arith.cmpi slt, %547, %6 : vector<8x1xi32>
    %549 = vector.shape_cast %548 : vector<8x1xi1> to vector<8x1xi1>
    %550 = vector.broadcast %549 : vector<8x1xi1> to vector<8x128xi1>
    %551 = arith.select %550, %546, %511 : vector<8x128xi1>, vector<8x128xf32>
    %552 = vector.shape_cast %548 : vector<8x1xi1> to vector<8x1xi1>
    %553 = vector.broadcast %552 : vector<8x1xi1> to vector<8x128xi1>
    %554 = arith.select %553, %544, %514 : vector<8x128xi1>, vector<8x128xf32>
    %c4_i32_174 = arith.constant 4 : i32
    %555 = arith.index_cast %c4_i32_174 : i32 to index
    %c0_175 = arith.constant 0 : index
    %c0_176 = arith.constant 0 : index
    %556 = vector.load %arg13[%555, %c0_175, %c0_176] : memref<8x8x512xf32, #tpu.memory_space<vmem>>, vector<1x8x512xf32>
    %557 = vector.shape_cast %556 : vector<1x8x512xf32> to vector<8x512xf32>
    %c1_177 = arith.constant 1 : index
    %c0_178 = arith.constant 0 : index
    %c0_179 = arith.constant 0 : index
    %558 = vector.load %arg5[%c1_177, %c0_178, %c0_179] : memref<2x128x512xf32, #tpu.memory_space<vmem>>, vector<1x128x512xf32>
    %559 = vector.shape_cast %558 : vector<1x128x512xf32> to vector<128x512xf32>
    %cst_180 = arith.constant dense<0.000000e+00> : vector<8x512xf32>
    %560 = tpu.matmul %551, %559, %cst_180 {dimension_numbers = #tpu.dot_dimension_numbers<[1], [0], [0], [1], [0, 0, 1, 1], [], []>} : vector<8x128xf32>, vector<128x512xf32>, vector<8x512xf32> -> vector<8x512xf32>
    %561 = arith.addf %557, %560 : vector<8x512xf32>
    %562 = vector.extract_strided_slice %561 {offsets = [0, 0], sizes = [8, 128], strides = [1, 1]} : vector<8x512xf32> to vector<8x128xf32>
    %563 = arith.negf %562 : vector<8x128xf32>
    %564 = math.exp %563 : vector<8x128xf32>
    %cst_181 = arith.constant 1.000000e+00 : f32
    %565 = vector.broadcast %cst_181 : f32 to vector<8x128xf32>
    %566 = arith.addf %565, %564 : vector<8x128xf32>
    %567 = arith.divf %565, %566 : vector<8x128xf32>
    %568 = vector.extract_strided_slice %561 {offsets = [0, 128], sizes = [8, 128], strides = [1, 1]} : vector<8x512xf32> to vector<8x128xf32>
    %569 = arith.negf %568 : vector<8x128xf32>
    %570 = math.exp %569 : vector<8x128xf32>
    %cst_182 = arith.constant 1.000000e+00 : f32
    %571 = vector.broadcast %cst_182 : f32 to vector<8x128xf32>
    %572 = arith.addf %571, %570 : vector<8x128xf32>
    %573 = arith.divf %571, %572 : vector<8x128xf32>
    %574 = vector.extract_strided_slice %561 {offsets = [0, 256], sizes = [8, 128], strides = [1, 1]} : vector<8x512xf32> to vector<8x128xf32>
    %575 = math.tanh %574 : vector<8x128xf32>
    %576 = vector.extract_strided_slice %561 {offsets = [0, 384], sizes = [8, 128], strides = [1, 1]} : vector<8x512xf32> to vector<8x128xf32>
    %577 = arith.negf %576 : vector<8x128xf32>
    %578 = math.exp %577 : vector<8x128xf32>
    %cst_183 = arith.constant 1.000000e+00 : f32
    %579 = vector.broadcast %cst_183 : f32 to vector<8x128xf32>
    %580 = arith.addf %579, %578 : vector<8x128xf32>
    %581 = arith.divf %579, %580 : vector<8x128xf32>
    %582 = arith.mulf %573, %554 : vector<8x128xf32>
    %583 = arith.mulf %567, %575 : vector<8x128xf32>
    %584 = arith.addf %582, %583 : vector<8x128xf32>
    %585 = math.tanh %584 : vector<8x128xf32>
    %586 = arith.mulf %581, %585 : vector<8x128xf32>
    %587 = vector.broadcast %c4_i32_174 : i32 to vector<8x1xi32>
    %588 = arith.cmpi slt, %587, %6 : vector<8x1xi32>
    %589 = vector.shape_cast %588 : vector<8x1xi1> to vector<8x1xi1>
    %590 = vector.broadcast %589 : vector<8x1xi1> to vector<8x128xi1>
    %591 = arith.select %590, %586, %551 : vector<8x128xi1>, vector<8x128xf32>
    %592 = vector.shape_cast %588 : vector<8x1xi1> to vector<8x1xi1>
    %593 = vector.broadcast %592 : vector<8x1xi1> to vector<8x128xi1>
    %594 = arith.select %593, %584, %554 : vector<8x128xi1>, vector<8x128xf32>
    %c5_i32_184 = arith.constant 5 : i32
    %595 = arith.index_cast %c5_i32_184 : i32 to index
    %c0_185 = arith.constant 0 : index
    %c0_186 = arith.constant 0 : index
    %596 = vector.load %arg13[%595, %c0_185, %c0_186] : memref<8x8x512xf32, #tpu.memory_space<vmem>>, vector<1x8x512xf32>
    %597 = vector.shape_cast %596 : vector<1x8x512xf32> to vector<8x512xf32>
    %c1_187 = arith.constant 1 : index
    %c0_188 = arith.constant 0 : index
    %c0_189 = arith.constant 0 : index
    %598 = vector.load %arg5[%c1_187, %c0_188, %c0_189] : memref<2x128x512xf32, #tpu.memory_space<vmem>>, vector<1x128x512xf32>
    %599 = vector.shape_cast %598 : vector<1x128x512xf32> to vector<128x512xf32>
    %cst_190 = arith.constant dense<0.000000e+00> : vector<8x512xf32>
    %600 = tpu.matmul %591, %599, %cst_190 {dimension_numbers = #tpu.dot_dimension_numbers<[1], [0], [0], [1], [0, 0, 1, 1], [], []>} : vector<8x128xf32>, vector<128x512xf32>, vector<8x512xf32> -> vector<8x512xf32>
    %601 = arith.addf %597, %600 : vector<8x512xf32>
    %602 = vector.extract_strided_slice %601 {offsets = [0, 0], sizes = [8, 128], strides = [1, 1]} : vector<8x512xf32> to vector<8x128xf32>
    %603 = arith.negf %602 : vector<8x128xf32>
    %604 = math.exp %603 : vector<8x128xf32>
    %cst_191 = arith.constant 1.000000e+00 : f32
    %605 = vector.broadcast %cst_191 : f32 to vector<8x128xf32>
    %606 = arith.addf %605, %604 : vector<8x128xf32>
    %607 = arith.divf %605, %606 : vector<8x128xf32>
    %608 = vector.extract_strided_slice %601 {offsets = [0, 128], sizes = [8, 128], strides = [1, 1]} : vector<8x512xf32> to vector<8x128xf32>
    %609 = arith.negf %608 : vector<8x128xf32>
    %610 = math.exp %609 : vector<8x128xf32>
    %cst_192 = arith.constant 1.000000e+00 : f32
    %611 = vector.broadcast %cst_192 : f32 to vector<8x128xf32>
    %612 = arith.addf %611, %610 : vector<8x128xf32>
    %613 = arith.divf %611, %612 : vector<8x128xf32>
    %614 = vector.extract_strided_slice %601 {offsets = [0, 256], sizes = [8, 128], strides = [1, 1]} : vector<8x512xf32> to vector<8x128xf32>
    %615 = math.tanh %614 : vector<8x128xf32>
    %616 = vector.extract_strided_slice %601 {offsets = [0, 384], sizes = [8, 128], strides = [1, 1]} : vector<8x512xf32> to vector<8x128xf32>
    %617 = arith.negf %616 : vector<8x128xf32>
    %618 = math.exp %617 : vector<8x128xf32>
    %cst_193 = arith.constant 1.000000e+00 : f32
    %619 = vector.broadcast %cst_193 : f32 to vector<8x128xf32>
    %620 = arith.addf %619, %618 : vector<8x128xf32>
    %621 = arith.divf %619, %620 : vector<8x128xf32>
    %622 = arith.mulf %613, %594 : vector<8x128xf32>
    %623 = arith.mulf %607, %615 : vector<8x128xf32>
    %624 = arith.addf %622, %623 : vector<8x128xf32>
    %625 = math.tanh %624 : vector<8x128xf32>
    %626 = arith.mulf %621, %625 : vector<8x128xf32>
    %627 = vector.broadcast %c5_i32_184 : i32 to vector<8x1xi32>
    %628 = arith.cmpi slt, %627, %6 : vector<8x1xi32>
    %629 = vector.shape_cast %628 : vector<8x1xi1> to vector<8x1xi1>
    %630 = vector.broadcast %629 : vector<8x1xi1> to vector<8x128xi1>
    %631 = arith.select %630, %626, %591 : vector<8x128xi1>, vector<8x128xf32>
    %632 = vector.shape_cast %628 : vector<8x1xi1> to vector<8x1xi1>
    %633 = vector.broadcast %632 : vector<8x1xi1> to vector<8x128xi1>
    %634 = arith.select %633, %624, %594 : vector<8x128xi1>, vector<8x128xf32>
    %c6_i32_194 = arith.constant 6 : i32
    %635 = arith.index_cast %c6_i32_194 : i32 to index
    %c0_195 = arith.constant 0 : index
    %c0_196 = arith.constant 0 : index
    %636 = vector.load %arg13[%635, %c0_195, %c0_196] : memref<8x8x512xf32, #tpu.memory_space<vmem>>, vector<1x8x512xf32>
    %637 = vector.shape_cast %636 : vector<1x8x512xf32> to vector<8x512xf32>
    %c1_197 = arith.constant 1 : index
    %c0_198 = arith.constant 0 : index
    %c0_199 = arith.constant 0 : index
    %638 = vector.load %arg5[%c1_197, %c0_198, %c0_199] : memref<2x128x512xf32, #tpu.memory_space<vmem>>, vector<1x128x512xf32>
    %639 = vector.shape_cast %638 : vector<1x128x512xf32> to vector<128x512xf32>
    %cst_200 = arith.constant dense<0.000000e+00> : vector<8x512xf32>
    %640 = tpu.matmul %631, %639, %cst_200 {dimension_numbers = #tpu.dot_dimension_numbers<[1], [0], [0], [1], [0, 0, 1, 1], [], []>} : vector<8x128xf32>, vector<128x512xf32>, vector<8x512xf32> -> vector<8x512xf32>
    %641 = arith.addf %637, %640 : vector<8x512xf32>
    %642 = vector.extract_strided_slice %641 {offsets = [0, 0], sizes = [8, 128], strides = [1, 1]} : vector<8x512xf32> to vector<8x128xf32>
    %643 = arith.negf %642 : vector<8x128xf32>
    %644 = math.exp %643 : vector<8x128xf32>
    %cst_201 = arith.constant 1.000000e+00 : f32
    %645 = vector.broadcast %cst_201 : f32 to vector<8x128xf32>
    %646 = arith.addf %645, %644 : vector<8x128xf32>
    %647 = arith.divf %645, %646 : vector<8x128xf32>
    %648 = vector.extract_strided_slice %641 {offsets = [0, 128], sizes = [8, 128], strides = [1, 1]} : vector<8x512xf32> to vector<8x128xf32>
    %649 = arith.negf %648 : vector<8x128xf32>
    %650 = math.exp %649 : vector<8x128xf32>
    %cst_202 = arith.constant 1.000000e+00 : f32
    %651 = vector.broadcast %cst_202 : f32 to vector<8x128xf32>
    %652 = arith.addf %651, %650 : vector<8x128xf32>
    %653 = arith.divf %651, %652 : vector<8x128xf32>
    %654 = vector.extract_strided_slice %641 {offsets = [0, 256], sizes = [8, 128], strides = [1, 1]} : vector<8x512xf32> to vector<8x128xf32>
    %655 = math.tanh %654 : vector<8x128xf32>
    %656 = vector.extract_strided_slice %641 {offsets = [0, 384], sizes = [8, 128], strides = [1, 1]} : vector<8x512xf32> to vector<8x128xf32>
    %657 = arith.negf %656 : vector<8x128xf32>
    %658 = math.exp %657 : vector<8x128xf32>
    %cst_203 = arith.constant 1.000000e+00 : f32
    %659 = vector.broadcast %cst_203 : f32 to vector<8x128xf32>
    %660 = arith.addf %659, %658 : vector<8x128xf32>
    %661 = arith.divf %659, %660 : vector<8x128xf32>
    %662 = arith.mulf %653, %634 : vector<8x128xf32>
    %663 = arith.mulf %647, %655 : vector<8x128xf32>
    %664 = arith.addf %662, %663 : vector<8x128xf32>
    %665 = math.tanh %664 : vector<8x128xf32>
    %666 = arith.mulf %661, %665 : vector<8x128xf32>
    %667 = vector.broadcast %c6_i32_194 : i32 to vector<8x1xi32>
    %668 = arith.cmpi slt, %667, %6 : vector<8x1xi32>
    %669 = vector.shape_cast %668 : vector<8x1xi1> to vector<8x1xi1>
    %670 = vector.broadcast %669 : vector<8x1xi1> to vector<8x128xi1>
    %671 = arith.select %670, %666, %631 : vector<8x128xi1>, vector<8x128xf32>
    %672 = vector.shape_cast %668 : vector<8x1xi1> to vector<8x1xi1>
    %673 = vector.broadcast %672 : vector<8x1xi1> to vector<8x128xi1>
    %674 = arith.select %673, %664, %634 : vector<8x128xi1>, vector<8x128xf32>
    %c7_i32_204 = arith.constant 7 : i32
    %675 = arith.index_cast %c7_i32_204 : i32 to index
    %c0_205 = arith.constant 0 : index
    %c0_206 = arith.constant 0 : index
    %676 = vector.load %arg13[%675, %c0_205, %c0_206] : memref<8x8x512xf32, #tpu.memory_space<vmem>>, vector<1x8x512xf32>
    %677 = vector.shape_cast %676 : vector<1x8x512xf32> to vector<8x512xf32>
    %c1_207 = arith.constant 1 : index
    %c0_208 = arith.constant 0 : index
    %c0_209 = arith.constant 0 : index
    %678 = vector.load %arg5[%c1_207, %c0_208, %c0_209] : memref<2x128x512xf32, #tpu.memory_space<vmem>>, vector<1x128x512xf32>
    %679 = vector.shape_cast %678 : vector<1x128x512xf32> to vector<128x512xf32>
    %cst_210 = arith.constant dense<0.000000e+00> : vector<8x512xf32>
    %680 = tpu.matmul %671, %679, %cst_210 {dimension_numbers = #tpu.dot_dimension_numbers<[1], [0], [0], [1], [0, 0, 1, 1], [], []>} : vector<8x128xf32>, vector<128x512xf32>, vector<8x512xf32> -> vector<8x512xf32>
    %681 = arith.addf %677, %680 : vector<8x512xf32>
    %682 = vector.extract_strided_slice %681 {offsets = [0, 0], sizes = [8, 128], strides = [1, 1]} : vector<8x512xf32> to vector<8x128xf32>
    %683 = arith.negf %682 : vector<8x128xf32>
    %684 = math.exp %683 : vector<8x128xf32>
    %cst_211 = arith.constant 1.000000e+00 : f32
    %685 = vector.broadcast %cst_211 : f32 to vector<8x128xf32>
    %686 = arith.addf %685, %684 : vector<8x128xf32>
    %687 = arith.divf %685, %686 : vector<8x128xf32>
    %688 = vector.extract_strided_slice %681 {offsets = [0, 128], sizes = [8, 128], strides = [1, 1]} : vector<8x512xf32> to vector<8x128xf32>
    %689 = arith.negf %688 : vector<8x128xf32>
    %690 = math.exp %689 : vector<8x128xf32>
    %cst_212 = arith.constant 1.000000e+00 : f32
    %691 = vector.broadcast %cst_212 : f32 to vector<8x128xf32>
    %692 = arith.addf %691, %690 : vector<8x128xf32>
    %693 = arith.divf %691, %692 : vector<8x128xf32>
    %694 = vector.extract_strided_slice %681 {offsets = [0, 256], sizes = [8, 128], strides = [1, 1]} : vector<8x512xf32> to vector<8x128xf32>
    %695 = math.tanh %694 : vector<8x128xf32>
    %696 = vector.extract_strided_slice %681 {offsets = [0, 384], sizes = [8, 128], strides = [1, 1]} : vector<8x512xf32> to vector<8x128xf32>
    %697 = arith.negf %696 : vector<8x128xf32>
    %698 = math.exp %697 : vector<8x128xf32>
    %cst_213 = arith.constant 1.000000e+00 : f32
    %699 = vector.broadcast %cst_213 : f32 to vector<8x128xf32>
    %700 = arith.addf %699, %698 : vector<8x128xf32>
    %701 = arith.divf %699, %700 : vector<8x128xf32>
    %702 = arith.mulf %693, %674 : vector<8x128xf32>
    %703 = arith.mulf %687, %695 : vector<8x128xf32>
    %704 = arith.addf %702, %703 : vector<8x128xf32>
    %705 = math.tanh %704 : vector<8x128xf32>
    %706 = arith.mulf %701, %705 : vector<8x128xf32>
    %707 = vector.broadcast %c7_i32_204 : i32 to vector<8x1xi32>
    %708 = arith.cmpi slt, %707, %6 : vector<8x1xi32>
    %709 = vector.shape_cast %708 : vector<8x1xi1> to vector<8x1xi1>
    %710 = vector.broadcast %709 : vector<8x1xi1> to vector<8x128xi1>
    %711 = arith.select %710, %706, %671 : vector<8x128xi1>, vector<8x128xf32>
    %712 = vector.shape_cast %708 : vector<8x1xi1> to vector<8x1xi1>
    %713 = vector.broadcast %712 : vector<8x1xi1> to vector<8x128xi1>
    %714 = arith.select %713, %704, %674 : vector<8x128xi1>, vector<8x128xf32>
    %c8_i32_214 = arith.constant 8 : i32
    %c1_215 = arith.constant 1 : index
    %c0_216 = arith.constant 0 : index
    %c0_217 = arith.constant 0 : index
    %715 = vector.load %arg10[%c1_215, %c0_216, %c0_217] : memref<2x8x128xf32, #tpu.memory_space<vmem>>, vector<1x8x128xf32>
    %716 = vector.shape_cast %715 : vector<1x8x128xf32> to vector<8x128xf32>
    %717 = vector.shape_cast %711 : vector<8x128xf32> to vector<1x8x128xf32>
    tpu.vector_store %arg10[%c1_215, %c0_216, %c0_217], %717 {strides = array<i32>} : memref<2x8x128xf32, #tpu.memory_space<vmem>>, vector<1x8x128xf32>,
    %c1_218 = arith.constant 1 : index
    %c0_219 = arith.constant 0 : index
    %c0_220 = arith.constant 0 : index
    %718 = vector.load %arg11[%c1_218, %c0_219, %c0_220] : memref<2x8x128xf32, #tpu.memory_space<vmem>>, vector<1x8x128xf32>
    %719 = vector.shape_cast %718 : vector<1x8x128xf32> to vector<8x128xf32>
    %720 = vector.shape_cast %714 : vector<8x128xf32> to vector<1x8x128xf32>
    tpu.vector_store %arg11[%c1_218, %c0_219, %c0_220], %720 {strides = array<i32>} : memref<2x8x128xf32, #tpu.memory_space<vmem>>, vector<1x8x128xf32>,
    %c0_i32_221 = arith.constant 0 : i32
    %721 = arith.cmpi eq, %arg1, %c0_i32_221 : i32
    %722 = arith.extui %721 : i1 to i32
    %c0_i32_222 = arith.constant 0 : i32
    %723 = arith.cmpi ne, %722, %c0_i32_222 : i32
    scf.if %723 {
      %c1_223 = arith.constant 1 : index
      %c0_224 = arith.constant 0 : index
      %c0_225 = arith.constant 0 : index
      %724 = vector.load %arg10[%c1_223, %c0_224, %c0_225] : memref<2x8x128xf32, #tpu.memory_space<vmem>>, vector<1x8x128xf32>
      %725 = vector.shape_cast %724 : vector<1x8x128xf32> to vector<8x128xf32>
      %c0_226 = arith.constant 0 : index
      %c0_227 = arith.constant 0 : index
      %726 = vector.load %arg7[%c0_226, %c0_227] : memref<128x1xf32, #tpu.memory_space<vmem>>, vector<128x1xf32>
      %cst_228 = arith.constant dense<0.000000e+00> : vector<8x1xf32>
      %727 = tpu.matmul %725, %726, %cst_228 {dimension_numbers = #tpu.dot_dimension_numbers<[1], [0], [0], [1], [0, 0, 1, 1], [], []>} : vector<8x128xf32>, vector<128x1xf32>, vector<8x1xf32> -> vector<8x1xf32>
      %c0_229 = arith.constant 0 : index
      %c0_230 = arith.constant 0 : index
      %728 = vector.load %arg8[%c0_229, %c0_230] : memref<1x1xf32, #tpu.memory_space<vmem>>, vector<1x1xf32>
      %729 = vector.broadcast %728 : vector<1x1xf32> to vector<8x1xf32>
      %730 = arith.addf %727, %729 : vector<8x1xf32>
      %c0_231 = arith.constant 0 : index
      %c0_232 = arith.constant 0 : index
      %731 = vector.load %arg9[%c0_231, %c0_232] : memref<8x1xf32, #tpu.memory_space<vmem>>, vector<8x1xf32>
      tpu.vector_store %arg9[%c0_231, %c0_232], %730 {strides = array<i32>} : memref<8x1xf32, #tpu.memory_space<vmem>>, vector<8x1xf32>,
    } else {
    }
    return
  }
  func.func @transform_0(%arg0: i32, %arg1: i32) -> (i32, i32) {
    %c0_i32 = arith.constant 0 : i32
    %c0_i32_0 = arith.constant 0 : i32
    return %arg0, %c0_i32 : i32, i32
  }
  func.func @transform_1(%arg0: i32, %arg1: i32) -> (i32, i32, i32) {
    %c0_i32 = arith.constant 0 : i32
    %c0_i32_0 = arith.constant 0 : i32
    return %arg1, %arg0, %c0_i32 : i32, i32, i32
  }
  func.func @transform_2(%arg0: i32, %arg1: i32) -> (i32, i32, i32) {
    %c0_i32 = arith.constant 0 : i32
    %c0_i32_0 = arith.constant 0 : i32
    %c0_i32_1 = arith.constant 0 : i32
    %c0_i32_2 = arith.constant 0 : i32
    return %c0_i32, %c0_i32_0, %c0_i32_1 : i32, i32, i32
  }
  func.func @transform_3(%arg0: i32, %arg1: i32) -> (i32, i32, i32) {
    %c0_i32 = arith.constant 0 : i32
    %c0_i32_0 = arith.constant 0 : i32
    %c0_i32_1 = arith.constant 0 : i32
    %c0_i32_2 = arith.constant 0 : i32
    return %c0_i32, %c0_i32_0, %c0_i32_1 : i32, i32, i32
  }
  func.func @transform_4(%arg0: i32, %arg1: i32) -> (i32, i32, i32) {
    %c0_i32 = arith.constant 0 : i32
    %c0_i32_0 = arith.constant 0 : i32
    %c0_i32_1 = arith.constant 0 : i32
    %c0_i32_2 = arith.constant 0 : i32
    return %c0_i32, %c0_i32_0, %c0_i32_1 : i32, i32, i32
  }
  func.func @transform_5(%arg0: i32, %arg1: i32) -> (i32, i32) {
    %c0_i32 = arith.constant 0 : i32
    %c0_i32_0 = arith.constant 0 : i32
    %c0_i32_1 = arith.constant 0 : i32
    return %c0_i32, %c0_i32_0 : i32, i32
  }
  func.func @transform_6(%arg0: i32, %arg1: i32) -> (i32, i32) {
    %c0_i32 = arith.constant 0 : i32
    %c0_i32_0 = arith.constant 0 : i32
    %c0_i32_1 = arith.constant 0 : i32
    return %c0_i32, %c0_i32_0 : i32, i32
  }
  func.func @transform_7(%arg0: i32, %arg1: i32) -> (i32, i32) {
    %c0_i32 = arith.constant 0 : i32
    %c0_i32_0 = arith.constant 0 : i32
    return %arg0, %c0_i32 : i32, i32
  }
}

</mosaic_0001>

<bundles_post_ra>
// kernel: lstm_forward.1
= control target key start
LH: loop header
LB: loop body
LE: loop exit
PB: predicated region body
PF: predicated region fallthrough
CT: control target
= control target key end

     0   :  { %v8438_v3 = vmov 0.0   ;;  %s8430_s2 = inlined_call_operand.vmem [shape: f32[2,128,512], index: 2, kind: input, shape index: {}]   ;;  %s8431_s1 = inlined_call_operand.vmem [shape: f32[8,8,128], index: 1, kind: input, shape index: {}]   ;;  %s8432_s3 = inlined_call_operand.vmem [shape: f32[2,128,512], index: 3, kind: input, shape index: {}]   ;;  %s8433_s0 = inlined_call_operand.vmem [shape: s32[8,1], index: 0, kind: input, shape index: {}]   ;;  %s8434_s4 = inlined_call_operand.vmem [shape: f32[2,1,512], index: 4, kind: input, shape index: {}]   ;;  %s8435_s5 = inlined_call_operand.vmem [shape: f32[128,1], index: 5, kind: input, shape index: {}]   ;;  %s8436_s6 = inlined_call_operand.<no memory space> [shape: f32[1,1], index: 6, kind: input, shape index: {}]   ;;  %s8437_s7 = inlined_call_operand.vmem [shape: f32[8,1], index: 7, kind: output, shape index: {}]  }
   0x1   :  { %v109_v0 = vld [vmem:[%s8430_s2 + $0x1e8] sm:$0xff]  ;;  %v111_v1 = vld [vmem:[%s8430_s2 + $0x1f8] sm:$0xff]  ;;  %v108_v2 = vld [vmem:[%s8430_s2 + $0x1e0] sm:$0xff]  ;;  %198 = vmatprep.mubr.f32.mxu0 %v8438_v3  ;;  %311 = vmatprep.mubr.f32.mxu1 %v8438_v3 }
   0x2   :  { %134 = vmatprep.subr.mxu0 %v109_v0  ;;  %247 = vmatprep.subr.mxu1 %v111_v1  ;;  %v110_v4 = vld [vmem:[%s8430_s2 + $0x1f0] sm:$0xff]  ;;  %v105_v5 = vld [vmem:[%s8430_s2 + $0x1c8] sm:$0xff]  ;;  %v107_v6 = vld [vmem:[%s8430_s2 + $0x1d8] sm:$0xff] }
   0x3   :  { %135 = vmatpush1.msra.mxu0 %v108_v2  ;;  %248 = vmatpush1.msra.mxu1 %v110_v4  ;;  %v104_v7 = vld [vmem:[%s8430_s2 + $0x1c0] sm:$0xff]  ;;  %v106_v8 = vld [vmem:[%s8430_s2 + $0x1d0] sm:$0xff]  ;;  %v101_v9 = vld [vmem:[%s8430_s2 + $0x1a8] sm:$0xff] }
   0x4   :  { %136 = vmatprep.subr.mxu0 %v105_v5  ;;  %249 = vmatprep.subr.mxu1 %v107_v6  ;;  %v103_v10 = vld [vmem:[%s8430_s2 + $0x1b8] sm:$0xff]  ;;  %v100_v11 = vld [vmem:[%s8430_s2 + $0x1a0] sm:$0xff]  ;;  %v102_v12 = vld [vmem:[%s8430_s2 + $0x1b0] sm:$0xff] }
   0x5   :  { %137 = vmatpush1.msra.mxu0 %v104_v7  ;;  %250 = vmatpush1.msra.mxu1 %v106_v8  ;;  %v97_v13 = vld [vmem:[%s8430_s2 + $0x188] sm:$0xff]  ;;  %v99_v14 = vld [vmem:[%s8430_s2 + $0x198] sm:$0xff]  ;;  %v96_v15 = vld [vmem:[%s8430_s2 + $0x180] sm:$0xff] }
   0x6   :  { %138 = vmatprep.subr.mxu0 %v101_v9  ;;  %251 = vmatprep.subr.mxu1 %v103_v10  ;;  %v98_v16 = vld [vmem:[%s8430_s2 + $0x190] sm:$0xff]  ;;  %v93_v17 = vld [vmem:[%s8430_s2 + $0x168] sm:$0xff]  ;;  %v95_v18 = vld [vmem:[%s8430_s2 + $0x178] sm:$0xff] }
   0x7   :  { %139 = vmatpush1.msra.mxu0 %v100_v11  ;;  %252 = vmatpush1.msra.mxu1 %v102_v12  ;;  %v92_v19 = vld [vmem:[%s8430_s2 + $0x160] sm:$0xff]  ;;  %v94_v20 = vld [vmem:[%s8430_s2 + $0x170] sm:$0xff]  ;;  %v89_v21 = vld [vmem:[%s8430_s2 + $0x148] sm:$0xff] }
   0x8   :  { %140 = vmatprep.subr.mxu0 %v97_v13  ;;  %253 = vmatprep.subr.mxu1 %v99_v14  ;;  %v91_v22 = vld [vmem:[%s8430_s2 + $0x158] sm:$0xff]  ;;  %v88_v23 = vld [vmem:[%s8430_s2 + $0x140] sm:$0xff]  ;;  %v90_v24 = vld [vmem:[%s8430_s2 + $0x150] sm:$0xff] }
   0x9   :  { %141 = vmatpush1.msra.mxu0 %v96_v15  ;;  %254 = vmatpush1.msra.mxu1 %v98_v16  ;;  %v85_v25 = vld [vmem:[%s8430_s2 + $0x128] sm:$0xff]  ;;  %v87_v26 = vld [vmem:[%s8430_s2 + $0x138] sm:$0xff]  ;;  %v84_v27 = vld [vmem:[%s8430_s2 + $0x120] sm:$0xff] }
   0xa   :  { %142 = vmatprep.subr.mxu0 %v93_v17  ;;  %255 = vmatprep.subr.mxu1 %v95_v18  ;;  %v86_v28 = vld [vmem:[%s8430_s2 + $0x130] sm:$0xff]  ;;  %v81_v29 = vld [vmem:[%s8430_s2 + $0x108] sm:$0xff]  ;;  %v83_v30 = vld [vmem:[%s8430_s2 + $0x118] sm:$0xff] }
   0xb   :  { %143 = vmatpush1.msra.mxu0 %v92_v19  ;;  %256 = vmatpush1.msra.mxu1 %v94_v20  ;;  %v80_v31 = vld [vmem:[%s8430_s2 + $0x100] sm:$0xff]  ;;  %v82_v32 = vld [vmem:[%s8430_s2 + $0x110] sm:$0xff]  ;;  %v77_v33 = vld [vmem:[%s8430_s2 + $0xe8] sm:$0xff] }
   0xc   :  { %144 = vmatprep.subr.mxu0 %v89_v21  ;;  %257 = vmatprep.subr.mxu1 %v91_v22  ;;  %v79_v34 = vld [vmem:[%s8430_s2 + $0xf8] sm:$0xff]  ;;  %v76_v35 = vld [vmem:[%s8430_s2 + $0xe0] sm:$0xff]  ;;  %v78_v36 = vld [vmem:[%s8430_s2 + $0xf0] sm:$0xff] }
   0xd   :  { %145 = vmatpush1.msra.mxu0 %v88_v23  ;;  %258 = vmatpush1.msra.mxu1 %v90_v24  ;;  %v73_v37 = vld [vmem:[%s8430_s2 + $0xc8] sm:$0xff]  ;;  %v75_v38 = vld [vmem:[%s8430_s2 + $0xd8] sm:$0xff]  ;;  %v72_v39 = vld [vmem:[%s8430_s2 + $0xc0] sm:$0xff] }
   0xe   :  { %146 = vmatprep.subr.mxu0 %v85_v25  ;;  %259 = vmatprep.subr.mxu1 %v87_v26  ;;  %v74_v40 = vld [vmem:[%s8430_s2 + $0xd0] sm:$0xff]  ;;  %v69_v41 = vld [vmem:[%s8430_s2 + $0xa8] sm:$0xff]  ;;  %v71_v42 = vld [vmem:[%s8430_s2 + $0xb8] sm:$0xff] }
   0xf   :  { %147 = vmatpush1.msra.mxu0 %v84_v27  ;;  %260 = vmatpush1.msra.mxu1 %v86_v28  ;;  %v68_v43 = vld [vmem:[%s8430_s2 + $0xa0] sm:$0xff]  ;;  %v70_v44 = vld [vmem:[%s8430_s2 + $0xb0] sm:$0xff]  ;;  %v65_v45 = vld [vmem:[%s8430_s2 + $0x88] sm:$0xff] }
  0x10   :  { %148 = vmatprep.subr.mxu0 %v81_v29  ;;  %261 = vmatprep.subr.mxu1 %v83_v30  ;;  %v67_v46 = vld [vmem:[%s8430_s2 + $0x98] sm:$0xff]  ;;  %v64_v47 = vld [vmem:[%s8430_s2 + $0x80] sm:$0xff]  ;;  %v66_v48 = vld [vmem:[%s8430_s2 + $0x90] sm:$0xff] }
  0x11   :  { %149 = vmatpush1.msra.mxu0 %v80_v31  ;;  %262 = vmatpush1.msra.mxu1 %v82_v32  ;;  %v61_v49 = vld [vmem:[%s8430_s2 + $0x68] sm:$0xff]  ;;  %v63_v50 = vld [vmem:[%s8430_s2 + $0x78] sm:$0xff]  ;;  %v60_v51 = vld [vmem:[%s8430_s2 + $0x60] sm:$0xff] }
  0x12   :  { %150 = vmatprep.subr.mxu0 %v77_v33  ;;  %263 = vmatprep.subr.mxu1 %v79_v34  ;;  %v62_v52 = vld [vmem:[%s8430_s2 + $0x70] sm:$0xff]  ;;  %v57_v53 = vld [vmem:[%s8430_s2 + $0x48] sm:$0xff]  ;;  %v59_v54 = vld [vmem:[%s8430_s2 + $0x58] sm:$0xff] }
  0x13   :  { %151 = vmatpush1.msra.mxu0 %v76_v35  ;;  %264 = vmatpush1.msra.mxu1 %v78_v36  ;;  %v56_v55 = vld [vmem:[%s8430_s2 + $0x40] sm:$0xff]  ;;  %v58_v56 = vld [vmem:[%s8430_s2 + $0x50] sm:$0xff]  ;;  %v53_v57 = vld [vmem:[%s8430_s2 + $0x28] sm:$0xff] }
  0x14   :  { %152 = vmatprep.subr.mxu0 %v73_v37  ;;  %265 = vmatprep.subr.mxu1 %v75_v38  ;;  %v55_v58 = vld [vmem:[%s8430_s2 + $0x38] sm:$0xff]  ;;  %v52_v59 = vld [vmem:[%s8430_s2 + $0x20] sm:$0xff]  ;;  %v54_v60 = vld [vmem:[%s8430_s2 + $0x30] sm:$0xff] }
  0x15   :  { %153 = vmatpush1.msra.mxu0 %v72_v39  ;;  %266 = vmatpush1.msra.mxu1 %v74_v40  ;;  %v49_v61 = vld [vmem:[%s8430_s2 + $0x8] sm:$0xff]  ;;  %v51_v62 = vld [vmem:[%s8430_s2 + $0x18] sm:$0xff]  ;;  %v48_v63 = vld [vmem:[%s8430_s2] sm:$0xff] }
  0x16   :  { %154 = vmatprep.subr.mxu0 %v69_v41  ;;  %267 = vmatprep.subr.mxu1 %v71_v42  ;;  %v50_v0 = vld [vmem:[%s8430_s2 + $0x10] sm:$0xff]  ;;  %v40_v1 = vld [vmem:[%s8431_s1] sm:$0xff]  ;;  %v5126_v2 = vld [vmem:[%s8432_s3 + $0x1e8] sm:$0xff] }
  0x17   :  { %155 = vmatpush1.msra.mxu0 %v68_v43  ;;  %268 = vmatpush1.msra.mxu1 %v70_v44  ;;  %v5131_v4 = vld [vmem:[%s8432_s3 + $0x1f8] sm:$0xff]  ;;  %v5136_v5 = vld [vmem:[%s8432_s3 + $0x1e0] sm:$0xff]  ;;  %v5141_v6 = vld [vmem:[%s8432_s3 + $0x1f0] sm:$0xff] }
  0x18   :  { %156 = vmatprep.subr.mxu0 %v65_v45  ;;  %269 = vmatprep.subr.mxu1 %v67_v46  ;;  %v5146_v7 = vld [vmem:[%s8432_s3 + $0x1c8] sm:$0xff]  ;;  %v5151_v8 = vld [vmem:[%s8432_s3 + $0x1d8] sm:$0xff]  ;;  %v5160_v9 = vld [vmem:[%s8432_s3 + $0x1c0] sm:$0xff] }
  0x19   :  { %157 = vmatpush1.msra.mxu0 %v64_v47  ;;  %270 = vmatpush1.msra.mxu1 %v66_v48  ;;  %v5165_v10 = vld [vmem:[%s8432_s3 + $0x1d0] sm:$0xff]  ;;  %v41_v11 = vld [vmem:[%s8431_s1 + $0x8] sm:$0xff]  ;;  %v5182_v13 = vld [vmem:[%s8432_s3 + $0x1b8] sm:$0xff] }
  0x1a   :  { %158 = vmatprep.subr.mxu0 %v61_v49  ;;  %271 = vmatprep.subr.mxu1 %v63_v50  ;;  %v5177_v12 = vld [vmem:[%s8432_s3 + $0x1a8] sm:$0xff]  ;;  %v5189_v14 = vld [vmem:[%s8432_s3 + $0x1a0] sm:$0xff]  ;;  %v5194_v15 = vld [vmem:[%s8432_s3 + $0x1b0] sm:$0xff] }
  0x1b   :  { %159 = vmatpush1.msra.mxu0 %v60_v51  ;;  %272 = vmatpush1.msra.mxu1 %v62_v52  ;;  %v5199_v16 = vld [vmem:[%s8432_s3 + $0x188] sm:$0xff]  ;;  %v5204_v17 = vld [vmem:[%s8432_s3 + $0x198] sm:$0xff]  ;;  %v5213_v18 = vld [vmem:[%s8432_s3 + $0x180] sm:$0xff] }
  0x1c   :  { %160 = vmatprep.subr.mxu0 %v57_v53  ;;  %273 = vmatprep.subr.mxu1 %v59_v54  ;;  %v5218_v19 = vld [vmem:[%s8432_s3 + $0x190] sm:$0xff]  ;;  %v5230_v21 = vld [vmem:[%s8432_s3 + $0x168] sm:$0xff]  ;;  %v5235_v22 = vld [vmem:[%s8432_s3 + $0x178] sm:$0xff] }
  0x1d   :  { %161 = vmatpush1.msra.mxu0 %v56_v55  ;;  %274 = vmatpush1.msra.mxu1 %v58_v56  ;;  %v42_v20 = vld [vmem:[%s8431_s1 + $0x10] sm:$0xff]  ;;  %v5242_v23 = vld [vmem:[%s8432_s3 + $0x160] sm:$0xff]  ;;  %v5252_v25 = vld [vmem:[%s8432_s3 + $0x148] sm:$0xff] }
  0x1e   :  { %162 = vmatprep.subr.mxu0 %v53_v57  ;;  %275 = vmatprep.subr.mxu1 %v55_v58  ;;  %v5247_v24 = vld [vmem:[%s8432_s3 + $0x170] sm:$0xff]  ;;  %v5257_v26 = vld [vmem:[%s8432_s3 + $0x158] sm:$0xff]  ;;  %v5266_v27 = vld [vmem:[%s8432_s3 + $0x140] sm:$0xff] }
  0x1f   :  { %163 = vmatpush1.msra.mxu0 %v52_v59  ;;  %276 = vmatpush1.msra.mxu1 %v54_v60  ;;  %v5271_v28 = vld [vmem:[%s8432_s3 + $0x150] sm:$0xff]  ;;  %v43_v29 = vld [vmem:[%s8431_s1 + $0x18] sm:$0xff]  ;;  %v5283_v30 = vld [vmem:[%s8432_s3 + $0x128] sm:$0xff] }
  0x20   :  { %164 = vmatprep.subr.mxu0 %v49_v61  ;;  %277 = vmatprep.subr.mxu1 %v51_v62  ;;  %v5288_v31 = vld [vmem:[%s8432_s3 + $0x138] sm:$0xff]  ;;  %v5295_v32 = vld [vmem:[%s8432_s3 + $0x120] sm:$0xff]  ;;  %v5300_v33 = vld [vmem:[%s8432_s3 + $0x130] sm:$0xff] }
  0x21   :  { %165 = vmatpush1.msra.mxu0 %v48_v63  ;;  %278 = vmatpush1.msra.mxu1 %v50_v0  ;;  %v5305_v34 = vld [vmem:[%s8432_s3 + $0x108] sm:$0xff]  ;;  %v5310_v35 = vld [vmem:[%s8432_s3 + $0x118] sm:$0xff]  ;;  %v5319_v36 = vld [vmem:[%s8432_s3 + $0x100] sm:$0xff] }
  0x22   :  { %199 = vmatmul.mubr.f32.vlgmr.msra.gmra.mxu0 %v40_v1  ;;  %312 = vmatmul.mubr.f32.vlgmr.msra.gmra.mxu1 %v40_v1  ;;  %v5324_v37 = vld [vmem:[%s8432_s3 + $0x110] sm:$0xff]  ;;  %v44_v38 = vld [vmem:[%s8431_s1 + $0x20] sm:$0xff]  ;;  %v5336_v39 = vld [vmem:[%s8432_s3 + $0xe8] sm:$0xff] }
  0x23   :  { %462 = vmatprep.subr.mxu0 %v5126_v2  ;;  %533 = vmatprep.subr.mxu1 %v5131_v4  ;;  %v5341_v40 = vld [vmem:[%s8432_s3 + $0xf8] sm:$0xff]  ;;  %v5348_v41 = vld [vmem:[%s8432_s3 + $0xe0] sm:$0xff]  ;;  %v5353_v42 = vld [vmem:[%s8432_s3 + $0xf0] sm:$0xff] }
  0x24   :  { %463 = vmatpush1.msra.mxu0 %v5136_v5  ;;  %534 = vmatpush1.msra.mxu1 %v5141_v6  ;;  %v5358_v43 = vld [vmem:[%s8432_s3 + $0xc8] sm:$0xff]  ;;  %v5363_v44 = vld [vmem:[%s8432_s3 + $0xd8] sm:$0xff]  ;;  %v5372_v45 = vld [vmem:[%s8432_s3 + $0xc0] sm:$0xff] }
  0x25   :  { %464 = vmatprep.subr.mxu0 %v5146_v7  ;;  %535 = vmatprep.subr.mxu1 %v5151_v8  ;;  %v5377_v46 = vld [vmem:[%s8432_s3 + $0xd0] sm:$0xff]  ;;  %v45_v47 = vld [vmem:[%s8431_s1 + $0x28] sm:$0xff]  ;;  %v5394_v49 = vld [vmem:[%s8432_s3 + $0xb8] sm:$0xff] }
  0x26   :  { %204 = vmatprep.mubr.f32.mxu0 %v8438_v3  ;;  %317 = vmatprep.mubr.f32.mxu1 %v8438_v3  ;;  %v5389_v48 = vld [vmem:[%s8432_s3 + $0xa8] sm:$0xff]  ;;  %v5401_v50 = vld [vmem:[%s8432_s3 + $0xa0] sm:$0xff]  ;;  %v5406_v51 = vld [vmem:[%s8432_s3 + $0xb0] sm:$0xff] }
  0x27   :  { %465 = vmatpush1.msra.mxu0 %v5160_v9  ;;  %536 = vmatpush1.msra.mxu1 %v5165_v10  ;;  %8650 = vst [vmem:[#allocation7_spill] sm:$0xff] %v5406_v51  ;;  %v5411_v52 = vld [vmem:[%s8432_s3 + $0x88] sm:$0xff]  ;;  %v5416_v53 = vld [vmem:[%s8432_s3 + $0x98] sm:$0xff]  ;;  %v5425_v54 = vld [vmem:[%s8432_s3 + $0x80] sm:$0xff] }
  0x28   :  { %205 = vmatmul.mubr.f32.gmra.mxu0 %v41_v11  ;;  %318 = vmatmul.mubr.f32.gmra.mxu1 %v41_v11  ;;  %8651 = vst [vmem:[#allocation8_spill] sm:$0xff] %v5411_v52  ;;  %8652 = vst [vmem:[#allocation9_spill] sm:$0xff] %v5416_v53  ;;  %v5430_v55 = vld [vmem:[%s8432_s3 + $0x90] sm:$0xff]  ;;  %v5442_v57 = vld [vmem:[%s8432_s3 + $0x68] sm:$0xff] }
  0x29   :  { %466 = vmatprep.subr.mxu0 %v5177_v12  ;;  %537 = vmatprep.subr.mxu1 %v5182_v13  ;;  %8653 = vst [vmem:[#allocation10_spill] sm:$0xff] %v5425_v54  ;;  %8654 = vst [vmem:[#allocation11_spill] sm:$0xff] %v5430_v55  ;;  %v46_v56 = vld [vmem:[%s8431_s1 + $0x30] sm:$0xff]  ;;  %v5447_v58 = vld [vmem:[%s8432_s3 + $0x78] sm:$0xff] }
  0x2a   :  { %467 = vmatpush1.msra.mxu0 %v5189_v14  ;;  %538 = vmatpush1.msra.mxu1 %v5194_v15  ;;  %8655 = vst [vmem:[#allocation12_spill] sm:$0xff] %v5442_v57  ;;  %8656 = vst [vmem:[#allocation13_spill] sm:$0xff] %v5447_v58  ;;  %v5454_v59 = vld [vmem:[%s8432_s3 + $0x60] sm:$0xff]  ;;  %v5459_v60 = vld [vmem:[%s8432_s3 + $0x70] sm:$0xff] }
  0x2b   :  { %468 = vmatprep.subr.mxu0 %v5199_v16  ;;  %539 = vmatprep.subr.mxu1 %v5204_v17  ;;  %8657 = vst [vmem:[#allocation14_spill] sm:$0xff] %v5454_v59  ;;  %8658 = vst [vmem:[#allocation15_spill] sm:$0xff] %v5459_v60  ;;  %v5464_v61 = vld [vmem:[%s8432_s3 + $0x48] sm:$0xff]  ;;  %v5469_v62 = vld [vmem:[%s8432_s3 + $0x58] sm:$0xff] }
  0x2c   :  { %210 = vmatprep.mubr.f32.mxu0 %v8438_v3  ;;  %323 = vmatprep.mubr.f32.mxu1 %v8438_v3  ;;  %8659 = vst [vmem:[#allocation16_spill] sm:$0xff] %v5464_v61  ;;  %8660 = vst [vmem:[#allocation17_spill] sm:$0xff] %v5469_v62  ;;  %v5478_v63 = vld [vmem:[%s8432_s3 + $0x40] sm:$0xff]  ;;  %v5483_v0 = vld [vmem:[%s8432_s3 + $0x50] sm:$0xff] }
  0x2d   :  { %469 = vmatpush1.msra.mxu0 %v5213_v18  ;;  %540 = vmatpush1.msra.mxu1 %v5218_v19  ;;  %8661 = vst [vmem:[#allocation18_spill] sm:$0xff] %v5478_v63  ;;  %8662 = vst [vmem:[#allocation19_spill] sm:$0xff] %v5483_v0  ;;  %v47_v1 = vld [vmem:[%s8431_s1 + $0x38] sm:$0xff]  ;;  %v5495_v11 = vld [vmem:[%s8432_s3 + $0x28] sm:$0xff] }
  0x2e   :  { %211 = vmatmul.mubr.f32.gmra.mxu0 %v42_v20  ;;  %324 = vmatmul.mubr.f32.gmra.mxu1 %v42_v20  ;;  %8663 = vst [vmem:[#allocation20_spill] sm:$0xff] %v5495_v11  ;;  %v5500_v20 = vld [vmem:[%s8432_s3 + $0x38] sm:$0xff] }
  0x2f   :  { %470 = vmatprep.subr.mxu0 %v5230_v21  ;;  %541 = vmatprep.subr.mxu1 %v5235_v22  ;;  %8664 = vst [vmem:[#allocation21_spill] sm:$0xff] %v5500_v20 }
  0x30   :  { %471 = vmatpush1.msra.mxu0 %v5242_v23  ;;  %542 = vmatpush1.msra.mxu1 %v5247_v24 }
  0x31   :  { %472 = vmatprep.subr.mxu0 %v5252_v25  ;;  %543 = vmatprep.subr.mxu1 %v5257_v26 }
  0x32   :  { %216 = vmatprep.mubr.f32.mxu0 %v8438_v3  ;;  %329 = vmatprep.mubr.f32.mxu1 %v8438_v3 }
  0x33   :  { %473 = vmatpush1.msra.mxu0 %v5266_v27  ;;  %544 = vmatpush1.msra.mxu1 %v5271_v28 }
  0x34   :  { %217 = vmatmul.mubr.f32.gmra.mxu0 %v43_v29  ;;  %330 = vmatmul.mubr.f32.gmra.mxu1 %v43_v29  ;;  %v5507_v29 = vld [vmem:[%s8432_s3 + $0x20] sm:$0xff] }
  0x35   :  { %474 = vmatprep.subr.mxu0 %v5283_v30  ;;  %545 = vmatprep.subr.mxu1 %v5288_v31  ;;  %8665 = vst [vmem:[#allocation22_spill] sm:$0xff] %v5507_v29 }
  0x36   :  { %475 = vmatpush1.msra.mxu0 %v5295_v32  ;;  %546 = vmatpush1.msra.mxu1 %v5300_v33 }
  0x37   :  { %476 = vmatprep.subr.mxu0 %v5305_v34  ;;  %547 = vmatprep.subr.mxu1 %v5310_v35 }
  0x38   :  { %222 = vmatprep.mubr.f32.mxu0 %v8438_v3  ;;  %335 = vmatprep.mubr.f32.mxu1 %v8438_v3 }
  0x39   :  { %477 = vmatpush1.msra.mxu0 %v5319_v36  ;;  %548 = vmatpush1.msra.mxu1 %v5324_v37 }
  0x3a   :  { %223 = vmatmul.mubr.f32.gmra.mxu0 %v44_v38  ;;  %336 = vmatmul.mubr.f32.gmra.mxu1 %v44_v38  ;;  %v5512_v38 = vld [vmem:[%s8432_s3 + $0x30] sm:$0xff] }
  0x3b   :  { %478 = vmatprep.subr.mxu0 %v5336_v39  ;;  %549 = vmatprep.subr.mxu1 %v5341_v40  ;;  %8666 = vst [vmem:[#allocation23_spill] sm:$0xff] %v5512_v38 }
  0x3c   :  { %479 = vmatpush1.msra.mxu0 %v5348_v41  ;;  %550 = vmatpush1.msra.mxu1 %v5353_v42 }
  0x3d   :  { %480 = vmatprep.subr.mxu0 %v5358_v43  ;;  %551 = vmatprep.subr.mxu1 %v5363_v44 }
  0x3e   :  { %228 = vmatprep.mubr.f32.mxu0 %v8438_v3  ;;  %341 = vmatprep.mubr.f32.mxu1 %v8438_v3 }
  0x3f   :  { %481 = vmatpush1.msra.mxu0 %v5372_v45  ;;  %552 = vmatpush1.msra.mxu1 %v5377_v46 }
  0x40   :  { %229 = vmatmul.mubr.f32.gmra.mxu0 %v45_v47  ;;  %342 = vmatmul.mubr.f32.gmra.mxu1 %v45_v47  ;;  %v5517_v47 = vld [vmem:[%s8433_s0] sm:$0xff] }
  0x41   :  { %482 = vmatprep.subr.mxu0 %v5389_v48  ;;  %553 = vmatprep.subr.mxu1 %v5394_v49  ;;  %8667 = vst [vmem:[#allocation24_spill] sm:$0xff] %v5517_v47  ;;  %vm632_vm0 = vcmp.gt.s32.totalorder %v5517_v47, 0  ;;  %vm880_vm1 = vcmp.gt.s32.totalorder %v5517_v47, 1  ;;  %vm1627_vm2 = vcmp.gt.s32.totalorder %v5517_v47, 4  ;;  %vm2125_vm3 = vcmp.gt.s32.totalorder %v5517_v47, 6 }
  0x42   :  { %483 = vmatpush1.msra.mxu0 %v5401_v50  ;;  %554 = vmatpush1.msra.mxu1 %v5406_v51  ;;  %v8676_v47 = vld [vmem:[#allocation23_spill] sm:$0xff] }
  0x43   :  { %484 = vmatprep.subr.mxu0 %v5411_v52  ;;  %555 = vmatprep.subr.mxu1 %v5416_v53 }
  0x44   :  { %234 = vmatprep.mubr.f32.mxu0 %v8438_v3  ;;  %347 = vmatprep.mubr.f32.mxu1 %v8438_v3 }
  0x45   :  { %485 = vmatpush1.msra.mxu0 %v5425_v54  ;;  %556 = vmatpush1.msra.mxu1 %v5430_v55 }
  0x46   :  { %235 = vmatmul.mubr.f32.gmra.mxu0 %v46_v56  ;;  %348 = vmatmul.mubr.f32.gmra.mxu1 %v46_v56  ;;  %v5522_v56 = vld [vmem:[%s8432_s3 + $0x8] sm:$0xff] }
  0x47   :  { %486 = vmatprep.subr.mxu0 %v5442_v57  ;;  %557 = vmatprep.subr.mxu1 %v5447_v58  ;;  %8668 = vst [vmem:[#allocation25_spill] sm:$0xff] %v5522_v56 }
  0x48   :  { %487 = vmatpush1.msra.mxu0 %v5454_v59  ;;  %558 = vmatpush1.msra.mxu1 %v5459_v60 }
  0x49   :  { %488 = vmatprep.subr.mxu0 %v5464_v61  ;;  %559 = vmatprep.subr.mxu1 %v5469_v62 }
  0x4a   :  { %240 = vmatprep.mubr.f32.mxu0 %v8438_v3  ;;  %353 = vmatprep.mubr.f32.mxu1 %v8438_v3  ;;  %v5527_v3 = vld [vmem:[%s8432_s3 + $0x18] sm:$0xff] }
  0x4b   :  { %489 = vmatpush1.msra.mxu0 %v5478_v63  ;;  %560 = vmatpush1.msra.mxu1 %v5483_v0  ;;  %8669 = vst [vmem:[#allocation26_spill] sm:$0xff] %v5527_v3  ;;  %v5534_v0 = vld [vmem:[%s8432_s3] sm:$0xff] }
  0x4c   :  { %241 = vmatmul.mubr.f32.gmra.mxu0 %v47_v1  ;;  %354 = vmatmul.mubr.f32.gmra.mxu1 %v47_v1  ;;  %8670 = vst [vmem:[#allocation27_spill] sm:$0xff] %v5534_v0  ;;  %v5541_v1 = vld [vmem:[%s8432_s3 + $0x10] sm:$0xff] }
  0x4d   :  { %490 = vmatprep.subr.mxu0 %v5495_v11  ;;  %561 = vmatprep.subr.mxu1 %v5500_v20  ;;  %8671 = vst [vmem:[#allocation28_spill] sm:$0xff] %v5541_v1  ;;  %v8672_v20 = vmov 0.0  }
  0x4e   :  { %491 = vmatpush1.msra.mxu0 %v5507_v29  ;;  %562 = vmatpush1.msra.mxu1 %v5512_v38  ;;  %v8450_v38 = vmov 0  }
  0x4f   :  { %492 = vmatprep.subr.mxu0 %v5522_v56  ;;  %563 = vmatprep.subr.mxu1 %v5527_v3  ;;  %v633_v29 = vsel %vm632_vm0, 1, %v8450_v38  ;;  %vm4885_vm0 = vmmov 0  }
  0x50   :  { %493 = vmatpush1.msra.mxu0 %v5534_v0  ;;  %526 = vmatprep.mubr.f32.mxu0 %v8672_v20 }
  0x51   :  { %564 = vmatpush1.msra.mxu1 %v5541_v1  ;;  %597 = vmatprep.mubr.f32.mxu1 %v8672_v20  ;;  %v881_v1 = vsel %vm880_vm1, 1, %v8450_v38  ;;  %vm4316_vm1 = vcmask 7168  }
  0x52   :  { %527 = vmatmul.mubr.f32.vlgmr.msra.gmra.mxu0 %v8672_v20  ;;  %598 = vmatmul.mubr.f32.vlgmr.msra.gmra.mxu1 %v8672_v20 }
  0x53   :  { %4561 = vset.pattern.permute.xlu0 %v8450_v38  ;;  %710 = vmatprep.subr.mxu0 %v5126_v2 }
  0x54   :  { %635 = vperm.xlu0 %4561, %v633_v29   ;;  %781 = vmatprep.subr.mxu1 %v5131_v4  ;;  %v1628_v29 = vsel %vm1627_vm2, 1, %v8450_v38 }
  0x55   :  { %711 = vmatpush1.msra.mxu0 %v5136_v5  ;;  %782 = vmatpush1.msra.mxu1 %v5141_v6 }
  0x56   :  { %712 = vmatprep.subr.mxu0 %v5146_v7  ;;  %783 = vmatprep.subr.mxu1 %v5151_v8 }
  0x57   :  { %713 = vmatpush1.msra.mxu0 %v5160_v9  ;;  %784 = vmatpush1.msra.mxu1 %v5165_v10 }
  0x58   :  { %883 = vperm.xlu0 %4561, %v881_v1   ;;  %714 = vmatprep.subr.mxu0 %v5177_v12  ;;  %v2126_v1 = vsel %vm2125_vm3, 1, %v8450_v38  ;;  %v8675_v38 = vld [vmem:[#allocation22_spill] sm:$0xff] }
  0x59   :  { %785 = vmatprep.subr.mxu1 %v5182_v13  ;;  %715 = vmatpush1.msra.mxu0 %v5189_v14 }
  0x5a   :  { %786 = vmatpush1.msra.mxu1 %v5194_v15  ;;  %716 = vmatprep.subr.mxu0 %v5199_v16 }
  0x5b   :  { %787 = vmatprep.subr.mxu1 %v5204_v17  ;;  %717 = vmatpush1.msra.mxu0 %v5213_v18 }
  0x5c   :  { %1630 = vperm.xlu0 %4561, %v1628_v29   ;;  %788 = vmatpush1.msra.mxu1 %v5218_v19  ;;  %v8673_v29 = vld [vmem:[#allocation19_spill] sm:$0xff] }
  0x5d   :  { %718 = vmatprep.subr.mxu0 %v5230_v21  ;;  %789 = vmatprep.subr.mxu1 %v5235_v22 }
  0x5e   :  { %719 = vmatpush1.msra.mxu0 %v5242_v23  ;;  %790 = vmatpush1.msra.mxu1 %v5247_v24 }
  0x5f   :  { %720 = vmatprep.subr.mxu0 %v5252_v25  ;;  %791 = vmatprep.subr.mxu1 %v5257_v26 }
  0x60   :  { %2128 = vperm.xlu0 %4561, %v2126_v1   ;;  %721 = vmatpush1.msra.mxu0 %v5266_v27  ;;  %v8674_v1 = vld [vmem:[#allocation21_spill] sm:$0xff] }
  0x61   :  { %792 = vmatpush1.msra.mxu1 %v5271_v28  ;;  %722 = vmatprep.subr.mxu0 %v5283_v30 }
  0x62   :  { %793 = vmatprep.subr.mxu1 %v5288_v31  ;;  %723 = vmatpush1.msra.mxu0 %v5295_v32 }
  0x63   :  { %794 = vmatpush1.msra.mxu1 %v5300_v33  ;;  %724 = vmatprep.subr.mxu0 %v5305_v34 }
  0x64   :  { %795 = vmatprep.subr.mxu1 %v5310_v35  ;;  %725 = vmatpush1.msra.mxu0 %v5319_v36 }
  0x65   :  { %796 = vmatpush1.msra.mxu1 %v5324_v37  ;;  %726 = vmatprep.subr.mxu0 %v5336_v39 }
  0x66   :  { %797 = vmatprep.subr.mxu1 %v5341_v40  ;;  %727 = vmatpush1.msra.mxu0 %v5348_v41 }
  0x67   :  { %798 = vmatpush1.msra.mxu1 %v5353_v42  ;;  %728 = vmatprep.subr.mxu0 %v5358_v43 }
  0x68   :  { %799 = vmatprep.subr.mxu1 %v5363_v44  ;;  %729 = vmatpush1.msra.mxu0 %v5372_v45 }
  0x69   :  { %800 = vmatpush1.msra.mxu1 %v5377_v46  ;;  %730 = vmatprep.subr.mxu0 %v5389_v48 }
  0x6a   :  { %801 = vmatprep.subr.mxu1 %v5394_v49  ;;  %731 = vmatpush1.msra.mxu0 %v5401_v50 }
  0x6b   :  { %802 = vmatpush1.msra.mxu1 %v5406_v51  ;;  %732 = vmatprep.subr.mxu0 %v5411_v52 }
  0x6c   :  { %803 = vmatprep.subr.mxu1 %v5416_v53  ;;  %733 = vmatpush1.msra.mxu0 %v5425_v54 }
  0x6d   :  { %804 = vmatpush1.msra.mxu1 %v5430_v55  ;;  %734 = vmatprep.subr.mxu0 %v5442_v57 }
  0x6e   :  { %805 = vmatprep.subr.mxu1 %v5447_v58  ;;  %735 = vmatpush1.msra.mxu0 %v5454_v59 }
  0x6f   :  { %806 = vmatpush1.msra.mxu1 %v5459_v60  ;;  %736 = vmatprep.subr.mxu0 %v5464_v61 }
  0x70   :  { %807 = vmatprep.subr.mxu1 %v5469_v62  ;;  %737 = vmatpush1.msra.mxu0 %v5478_v63  ;;  %v8677_v62 = vld [vmem:[#allocation28_spill] sm:$0xff] }
  0x71   :  { %808 = vmatpush1.msra.mxu1 %v8673_v29  ;;  %738 = vmatprep.subr.mxu0 %v5495_v11 }
  0x72   :  { %809 = vmatprep.subr.mxu1 %v8674_v1  ;;  %739 = vmatpush1.msra.mxu0 %v8675_v38  ;;  %v8678_v1 = vmov 0   ;;  %v114_v38 = vlaneseq }
  0x73   :  { %810 = vmatpush1.msra.mxu1 %v8676_v47  ;;  %740 = vmatprep.subr.mxu0 %v5522_v56 }
  0x74   :  { %811 = vmatprep.subr.mxu1 %v5527_v3  ;;  %741 = vmatpush1.msra.mxu0 %v5534_v0  ;;  %v5629_v47 = vshrl.u32 %v114_v38, 7 }
  0x75   :  { %774 = vmatprep.mubr.f32.mxu0 %v8672_v20  ;;  %812 = vmatpush1.msra.mxu1 %v8677_v62  ;;  %v112_v62 = vld [vmem:[%s8434_s4] sm:$0xf] }
  0x76   :  { %845 = vmatprep.mubr.f32.mxu1 %v8672_v20  ;;  %959 = vmatprep.subr.mxu0 %v5126_v2  ;;  %8679 = vst [vmem:[#allocation29_spill] sm:$0xff] %v5629_v47  ;;  %v8467_v0 = vsub.s32 0, %v5629_v47  ;;  %v8469_v11 = vsub.s32 2, %v5629_v47  ;;  %v8474_v38 = vsub.s32 3, %v5629_v47 }
  0x77   :  { %1030 = vmatprep.subr.mxu1 %v5131_v4  ;;  %4562 = vset.pattern.permute.xlu1 %v8678_v1  ;;  %v8473_v1 = vsub.s32 1, %v5629_v47 }
  0x78   :  { %v117_v20 = vrot.slane %v112_v62, %v8467_v0  ;;  %v5650_v29 = vrot.slane %v112_v62, %v8469_v11  ;;  %v5656_v59 = vrot.slane %v112_v62, %v8474_v38 }
  0x79   :  { %v121_v60 = vrot.slane %v112_v62, %v8473_v1 }
  0xe2   :  { %v5631_v56 = vpop.f32.mrf.mxu0  ;;  %v5633_v3 = vpop.f32.mrf.mxu1 }
  0xe4   :  { %v5640_v2 = vpop.f32.mrf.mxu0  ;;  %v5642_v4 = vpop.f32.mrf.mxu1 }
  0xe8   :  { %v206_v63 = vpop.f32.mrf.mxu0  ;;  %v319_v61 = vpop.f32.mrf.mxu1 }
  0xe9   :  { %v5658_v58 = vadd.f32 %v206_v63, %v117_v20  ;;  %v5661_v57 = vadd.f32 %v319_v61, %v5650_v29 }
  0xea   :  { %v208_v55 = vpop.f32.mrf.mxu0  ;;  %v321_v0 = vpop.f32.mrf.mxu1 }
  0xeb   :  { %8680 = vst [vmem:[#allocation30_spill] sm:$0xff] %v5661_v57  ;;  %v5663_v54 = vadd.f32 %v208_v55, %v121_v60  ;;  %v5666_v11 = vadd.f32 %v321_v0, %v5656_v59 }
  0xed   :  { %8681 = vst [vmem:[#allocation31_spill] sm:$0xff] %v5663_v54  ;;  %8682 = vst [vmem:[#allocation32_spill] sm:$0xff] %v5666_v11 }
  0xee   :  { %v212_v53 = vpop.f32.mrf.mxu0  ;;  %v325_v52 = vpop.f32.mrf.mxu1 }
  0xef   :  { %v5668_v51 = vadd.f32 %v212_v53, %v117_v20  ;;  %v5671_v1 = vadd.f32 %v325_v52, %v5650_v29 }
  0xf0   :  { %v214_v62 = vpop.f32.mrf.mxu0  ;;  %v327_v63 = vpop.f32.mrf.mxu1 }
  0xf1   :  { %8683 = vst [vmem:[#allocation33_spill] sm:$0xff] %v5668_v51  ;;  %8684 = vst [vmem:[#allocation34_spill] sm:$0xff] %v5671_v1  ;;  %v5673_v38 = vadd.f32 %v214_v62, %v121_v60  ;;  %v5676_v61 = vadd.f32 %v327_v63, %v5656_v59 }
  0xf3   :  { %8685 = vst [vmem:[#allocation35_spill] sm:$0xff] %v5673_v38  ;;  %8686 = vst [vmem:[#allocation36_spill] sm:$0xff] %v5676_v61 }
  0xf4   :  { %v218_v47 = vpop.f32.mrf.mxu0  ;;  %v331_v55 = vpop.f32.mrf.mxu1 }
  0xf5   :  { %v5678_v57 = vadd.f32 %v218_v47, %v117_v20  ;;  %v5681_v0 = vadd.f32 %v331_v55, %v5650_v29 }
  0xf6   :  { %v220_v11 = vpop.f32.mrf.mxu0  ;;  %v333_v53 = vpop.f32.mrf.mxu1 }
  0xf7   :  { %8687 = vst [vmem:[#allocation37_spill] sm:$0xff] %v5678_v57  ;;  %8688 = vst [vmem:[#allocation38_spill] sm:$0xff] %v5681_v0  ;;  %v5683_v51 = vadd.f32 %v220_v11, %v121_v60  ;;  %v5686_v52 = vadd.f32 %v333_v53, %v5656_v59 }
  0xf9   :  { %8689 = vst [vmem:[#allocation39_spill] sm:$0xff] %v5683_v51  ;;  %8690 = vst [vmem:[#allocation40_spill] sm:$0xff] %v5686_v52 }
  0xfa   :  { %v224_v1 = vpop.f32.mrf.mxu0  ;;  %v337_v62 = vpop.f32.mrf.mxu1 }
  0xfb   :  { %v5688_v38 = vadd.f32 %v224_v1, %v117_v20  ;;  %v5691_v63 = vadd.f32 %v337_v62, %v5650_v29 }
  0xfc   :  { %v226_v61 = vpop.f32.mrf.mxu0  ;;  %v339_v47 = vpop.f32.mrf.mxu1 }
  0xfd   :  { %8691 = vst [vmem:[#allocation41_spill] sm:$0xff] %v5688_v38  ;;  %8692 = vst [vmem:[#allocation42_spill] sm:$0xff] %v5691_v63  ;;  %v5693_v57 = vadd.f32 %v226_v61, %v121_v60  ;;  %v5696_v55 = vadd.f32 %v339_v47, %v5656_v59 }
  0xff   :  { %8693 = vst [vmem:[#allocation43_spill] sm:$0xff] %v5693_v57  ;;  %8694 = vst [vmem:[#allocation44_spill] sm:$0xff] %v5696_v55 }
 0x100   :  { %v230_v0 = vpop.f32.mrf.mxu0  ;;  %v343_v11 = vpop.f32.mrf.mxu1 }
 0x101   :  { %v5698_v51 = vadd.f32 %v230_v0, %v117_v20  ;;  %v5701_v53 = vadd.f32 %v343_v11, %v5650_v29 }
 0x102   :  { %v232_v52 = vpop.f32.mrf.mxu0  ;;  %v345_v1 = vpop.f32.mrf.mxu1 }
 0x103   :  { %8695 = vst [vmem:[#allocation45_spill] sm:$0xff] %v5698_v51  ;;  %8696 = vst [vmem:[#allocation46_spill] sm:$0xff] %v5701_v53  ;;  %v5703_v38 = vadd.f32 %v232_v52, %v121_v60  ;;  %v5706_v62 = vadd.f32 %v345_v1, %v5656_v59 }
 0x105   :  { %8697 = vst [vmem:[#allocation47_spill] sm:$0xff] %v5703_v38  ;;  %8698 = vst [vmem:[#allocation48_spill] sm:$0xff] %v5706_v62 }
 0x106   :  { %v236_v63 = vpop.f32.mrf.mxu0  ;;  %v349_v61 = vpop.f32.mrf.mxu1 }
 0x107   :  { %v5708_v57 = vadd.f32 %v236_v63, %v117_v20  ;;  %v5711_v47 = vadd.f32 %v349_v61, %v5650_v29 }
 0x108   :  { %v238_v55 = vpop.f32.mrf.mxu0  ;;  %v351_v0 = vpop.f32.mrf.mxu1 }
 0x109   :  { %8699 = vst [vmem:[#allocation49_spill] sm:$0xff] %v5708_v57  ;;  %8700 = vst [vmem:[#allocation50_spill] sm:$0xff] %v5711_v47  ;;  %v5713_v51 = vadd.f32 %v238_v55, %v121_v60  ;;  %v5716_v11 = vadd.f32 %v351_v0, %v5656_v59  ;;  %v201_v55 = vadd.f32 %v5631_v56, %v117_v20 }
 0x10a   :  { %v203_v0 = vadd.f32 %v5640_v2, %v121_v60 }
 0x10b   :  { %8701 = vst [vmem:[#allocation51_spill] sm:$0xff] %v5713_v51  ;;  %8702 = vst [vmem:[#allocation52_spill] sm:$0xff] %v5716_v11 }
 0x10c   :  { %v242_v53 = vpop.f32.mrf.mxu0  ;;  %v355_v52 = vpop.f32.mrf.mxu1 }
 0x10d   :  { %v5718_v38 = vadd.f32 %v242_v53, %v117_v20  ;;  %v5721_v1 = vadd.f32 %v355_v52, %v5650_v29 }
 0x10e   :  { %v244_v62 = vpop.f32.mrf.mxu0  ;;  %v357_v63 = vpop.f32.mrf.mxu1 }
 0x10f   :  { %8703 = vst [vmem:[#allocation53_spill] sm:$0xff] %v5718_v38  ;;  %8704 = vst [vmem:[#allocation54_spill] sm:$0xff] %v5721_v1  ;;  %v5723_v57 = vadd.f32 %v244_v62, %v121_v60  ;;  %v5726_v61 = vadd.f32 %v357_v63, %v5656_v59  ;;  %v316_v62 = vadd.f32 %v5642_v4, %v5656_v59 }
 0x110   :  { %v314_v63 = vadd.f32 %v5633_v3, %v5650_v29 }
 0x111   :  { %8705 = vst [vmem:[#allocation55_spill] sm:$0xff] %v5723_v57  ;;  %8706 = vst [vmem:[#allocation56_spill] sm:$0xff] %v5726_v61 }
 0x112   :  { %v528_v47 = vpop.f32.mrf.mxu0  ;;  %v599_v38 = vpop.f32.mrf.mxu1 }
 0x113   :  { %v604_v11 = vadd.f32 %v528_v47, %v201_v55  ;;  %v606_v61 = vadd.f32 %v599_v38, %v314_v63 }
 0x114   :  { %v530_v51 = vpop.f32.mrf.mxu0  ;;  %v601_v1 = vpop.f32.mrf.mxu1 }
 0x115   :  { %v4322_v54 = vmul.f32 -1.442695, %v604_v11  ;;  %v605_v53 = vadd.f32 %v530_v51, %v203_v0  ;;  %v607_v57 = vadd.f32 %v601_v1, %v316_v62 }
 0x117   :  { %4563 = vpow2.f32 %v4322_v54  ;;  %v4323_v52 = vmul.f32 -1.442695, %v605_v53  ;;  %v4324_v20 = vmul.f32 -1.442695, %v607_v57  ;;  %v5737_v57 = vpop.permute.xlu0 %635 }
 0x118   :  { %8707 = vst [vmem:[#allocation57_spill] sm:$0xff] %v5737_v57  ;;  %vm637_vm4 = vcmp.eq.s32.totalorder %v5737_v57, 1  ;;  %v6201_v57 = vld [vmem:[%s8432_s3 + $0x30] sm:$0xff] }
 0x119   :  { %4565 = vpow2.f32 %v4323_v52 }
 0x11a   :  { %4567 = vpow2.f32 %v4324_v20 }
 0x124   :  { %v4564_v56 = vpop.eup %4563 }
 0x125   :  { %v611_v60 = vadd.f32 1.0, %v4564_v56 }
 0x126   :  { %v4566_v2 = vpop.eup %4565 }
 0x127   :  { %4569 = vrcp.f32 %v611_v60  ;;  %v617_v51 = vadd.f32 1.0, %v4566_v2  ;;  %v4568_v54 = vpop.eup %4567 }
 0x128   :  { %4571 = vtanh.f32 %v606_v61  ;;  %v624_v0 = vadd.f32 1.0, %v4568_v54 }
 0x129   :  { %4573 = vrcp.f32 %v617_v51 }
 0x12a   :  { %4575 = vrcp.f32 %v624_v0 }
 0x134   :  { %v4570_v47 = vpop.eup %4569 }
 0x135   :  { %v4572_v11 = vpop.eup %4571 }
 0x136   :  { %v4574_v55 = vpop.eup %4573  ;;  %v628_v4 = vmul.f32 %v4572_v11, %v4570_v47  ;;  %v5827_v11 = vpop.permute.xlu0 %883 }
 0x137   :  { %v627_v59 = vmul.f32 0.0, %v4574_v55  ;;  %v4576_v3 = vpop.eup %4575  ;;  %vm885_vm9 = vcmp.eq.s32.totalorder %v5827_v11, 1 }
 0x139   :  { %v5734_v1 = vadd.f32 %v628_v4, %v627_v59 }
 0x13b   :  { %4577 = vtanh.f32 %v5734_v1  ;;  %v639_v51 = vsel %vm637_vm4, %v5734_v1, 0.0 }
 0x148   :  { %v4578_v29 = vpop.eup %4577 }
 0x149   :  { %v5739_v38 = vmul.f32 %v4578_v29, %v4576_v3 }
 0x14b   :  { %8708 = vst [vmem:[#allocation58_spill] sm:$0xff] %v5739_v38  ;;  %4500 = vmatmul.mubr.msk.f32.vlgmr.msra.gmra.mxu0 %vm637_vm4, %v5739_v38  ;;  %4501 = vmatmul.mubr.msk.f32.vlgmr.msra.gmra.mxu1 %vm637_vm4, %v5739_v38  ;;  %v638_v1 = vsel %vm637_vm4, %v5739_v38, 0.0  ;;  %v6208_v38 = vld [vmem:[%s8432_s3 + $0x8] sm:$0xff] }
 0x14c   :  { %960 = vmatpush1.msra.mxu0 %v5136_v5  ;;  %1031 = vmatpush1.msra.mxu1 %v5141_v6  ;;  %v8709_v5 = vld [vmem:[#allocation7_spill] sm:$0xff]  ;;  %v8710_v6 = vld [vmem:[#allocation8_spill] sm:$0xff] }
 0x14d   :  { %961 = vmatprep.subr.mxu0 %v5146_v7  ;;  %1032 = vmatprep.subr.mxu1 %v5151_v8  ;;  %v8711_v7 = vld [vmem:[#allocation9_spill] sm:$0xff]  ;;  %v8712_v8 = vld [vmem:[#allocation10_spill] sm:$0xff]  ;;  %8736 = vst [vmem:[#allocation7_spill] sm:$0xff] %v5827_v11 }
 0x14e   :  { %962 = vmatpush1.msra.mxu0 %v5160_v9  ;;  %1033 = vmatpush1.msra.mxu1 %v5165_v10  ;;  %v8713_v9 = vld [vmem:[#allocation11_spill] sm:$0xff]  ;;  %v8714_v10 = vld [vmem:[#allocation12_spill] sm:$0xff] }
 0x14f   :  { %963 = vmatprep.subr.mxu0 %v5177_v12  ;;  %1034 = vmatprep.subr.mxu1 %v5182_v13  ;;  %v8715_v12 = vld [vmem:[#allocation13_spill] sm:$0xff]  ;;  %v8716_v13 = vld [vmem:[#allocation14_spill] sm:$0xff] }
 0x150   :  { %964 = vmatpush1.msra.mxu0 %v5189_v14  ;;  %1035 = vmatpush1.msra.mxu1 %v5194_v15  ;;  %v8717_v14 = vld [vmem:[#allocation15_spill] sm:$0xff]  ;;  %v8718_v15 = vld [vmem:[#allocation16_spill] sm:$0xff] }
 0x151   :  { %965 = vmatprep.subr.mxu0 %v5199_v16  ;;  %1036 = vmatprep.subr.mxu1 %v5204_v17  ;;  %v8719_v16 = vld [vmem:[#allocation17_spill] sm:$0xff]  ;;  %v8720_v17 = vld [vmem:[#allocation18_spill] sm:$0xff] }
 0x152   :  { %966 = vmatpush1.msra.mxu0 %v5213_v18  ;;  %1037 = vmatpush1.msra.mxu1 %v5218_v19  ;;  %v8721_v18 = vld [vmem:[#allocation19_spill] sm:$0xff]  ;;  %v8722_v19 = vld [vmem:[#allocation20_spill] sm:$0xff] }
 0x153   :  { %967 = vmatprep.subr.mxu0 %v5230_v21  ;;  %1038 = vmatprep.subr.mxu1 %v5235_v22  ;;  %v8723_v21 = vld [vmem:[#allocation21_spill] sm:$0xff]  ;;  %v8724_v22 = vld [vmem:[#allocation22_spill] sm:$0xff] }
 0x154   :  { %968 = vmatpush1.msra.mxu0 %v5242_v23  ;;  %1039 = vmatpush1.msra.mxu1 %v5247_v24  ;;  %v8725_v23 = vld [vmem:[#allocation23_spill] sm:$0xff]  ;;  %v8726_v24 = vld [vmem:[#allocation25_spill] sm:$0xff] }
 0x155   :  { %969 = vmatprep.subr.mxu0 %v5252_v25  ;;  %1040 = vmatprep.subr.mxu1 %v5257_v26  ;;  %v8727_v25 = vld [vmem:[#allocation26_spill] sm:$0xff]  ;;  %v8728_v26 = vld [vmem:[#allocation27_spill] sm:$0xff]  ;;  %8753 = vst [vmem:[#allocation25_spill] sm:$0xff] %v6201_v57 }
 0x156   :  { %970 = vmatpush1.msra.mxu0 %v5266_v27  ;;  %1041 = vmatpush1.msra.mxu1 %v5271_v28  ;;  %v8729_v27 = vmov 0.0   ;;  %v8730_v28 = vld [vmem:[#allocation28_spill] sm:$0xff]  ;;  %v6196_v11 = vld [vmem:[%s8432_s3 + $0x20] sm:$0xff]  ;;  %8754 = vst [vmem:[#allocation26_spill] sm:$0xff] %v6208_v38 }
 0x157   :  { %971 = vmatprep.subr.mxu0 %v5283_v30  ;;  %1042 = vmatprep.subr.mxu1 %v5288_v31  ;;  %v8731_v30 = vld [vmem:[#allocation24_spill] sm:$0xff]  ;;  %v8732_v31 = vmov 0   ;;  %8752 = vst [vmem:[#allocation23_spill] sm:$0xff] %v6196_v11 }
 0x158   :  { %972 = vmatpush1.msra.mxu0 %v5295_v32  ;;  %1043 = vmatpush1.msra.mxu1 %v5300_v33  ;;  %vm1129_vm5 = vcmp.gt.s32.totalorder %v8731_v30, 2  ;;  %vm1378_vm6 = vcmp.gt.s32.totalorder %v8731_v30, 3  ;;  %vm1876_vm7 = vcmp.gt.s32.totalorder %v8731_v30, 5  ;;  %vm2374_vm8 = vcmp.gt.s32.totalorder %v8731_v30, 7  ;;  %v5969_v30 = vld [vmem:[%s8432_s3 + $0x158] sm:$0xff] }
 0x159   :  { %973 = vmatprep.subr.mxu0 %v5305_v34  ;;  %1044 = vmatprep.subr.mxu1 %v5310_v35  ;;  %v1130_v32 = vsel %vm1129_vm5, 1, %v8732_v31  ;;  %v1379_v33 = vsel %vm1378_vm6, 1, %v8732_v31  ;;  %v1877_v34 = vsel %vm1876_vm7, 1, %v8732_v31  ;;  %v2375_v35 = vsel %vm2374_vm8, 1, %v8732_v31  ;;  %v5976_v31 = vld [vmem:[%s8432_s3 + $0x140] sm:$0xff] }
 0x15a   :  { %974 = vmatpush1.msra.mxu0 %v5319_v36  ;;  %1045 = vmatpush1.msra.mxu1 %v5324_v37 }
 0x15b   :  { %975 = vmatprep.subr.mxu0 %v5336_v39  ;;  %1046 = vmatprep.subr.mxu1 %v5341_v40 }
 0x15c   :  { %976 = vmatpush1.msra.mxu0 %v5348_v41  ;;  %1047 = vmatpush1.msra.mxu1 %v5353_v42  ;;  %v8733_v41 = vld [vmem:[#allocation31_spill] sm:$0xff] }
 0x15d   :  { %977 = vmatprep.subr.mxu0 %v5358_v43  ;;  %1048 = vmatprep.subr.mxu1 %v5363_v44 }
 0x15e   :  { %978 = vmatpush1.msra.mxu0 %v5372_v45  ;;  %1049 = vmatpush1.msra.mxu1 %v5377_v46  ;;  %v8734_v46 = vld [vmem:[#allocation32_spill] sm:$0xff] }
 0x15f   :  { %979 = vmatprep.subr.mxu0 %v5389_v48  ;;  %1050 = vmatprep.subr.mxu1 %v5394_v49  ;;  %v8735_v49 = vld [vmem:[#allocation30_spill] sm:$0xff] }
 0x160   :  { %980 = vmatpush1.msra.mxu0 %v5401_v50  ;;  %1051 = vmatpush1.msra.mxu1 %v8709_v5  ;;  %v5848_v5 = vld [vmem:[%s8432_s3 + $0x1e8] sm:$0xff] }
 0x161   :  { %981 = vmatprep.subr.mxu0 %v8710_v6  ;;  %1052 = vmatprep.subr.mxu1 %v8711_v7  ;;  %8738 = vst [vmem:[#allocation9_spill] sm:$0xff] %v5848_v5  ;;  %v5853_v6 = vld [vmem:[%s8432_s3 + $0x1f8] sm:$0xff]  ;;  %v5858_v7 = vld [vmem:[%s8432_s3 + $0x1e0] sm:$0xff] }
 0x162   :  { %982 = vmatpush1.msra.mxu0 %v8712_v8  ;;  %1053 = vmatpush1.msra.mxu1 %v8713_v9  ;;  %8739 = vst [vmem:[#allocation10_spill] sm:$0xff] %v5853_v6  ;;  %v5865_v8 = vld [vmem:[%s8432_s3 + $0x1f0] sm:$0xff]  ;;  %v5870_v9 = vld [vmem:[%s8432_s3 + $0x1c8] sm:$0xff] }
 0x163   :  { %983 = vmatprep.subr.mxu0 %v8714_v10  ;;  %1054 = vmatprep.subr.mxu1 %v8715_v12  ;;  %v5875_v10 = vld [vmem:[%s8432_s3 + $0x1d8] sm:$0xff]  ;;  %v5882_v12 = vld [vmem:[%s8432_s3 + $0x1c0] sm:$0xff] }
 0x164   :  { %984 = vmatpush1.msra.mxu0 %v8716_v13  ;;  %1055 = vmatpush1.msra.mxu1 %v8717_v14  ;;  %v5887_v13 = vld [vmem:[%s8432_s3 + $0x1d0] sm:$0xff]  ;;  %v5892_v14 = vld [vmem:[%s8432_s3 + $0x1a8] sm:$0xff] }
 0x165   :  { %985 = vmatprep.subr.mxu0 %v8718_v15  ;;  %1056 = vmatprep.subr.mxu1 %v8719_v16  ;;  %v5899_v15 = vld [vmem:[%s8432_s3 + $0x1b8] sm:$0xff]  ;;  %v5904_v16 = vld [vmem:[%s8432_s3 + $0x1a0] sm:$0xff] }
 0x166   :  { %986 = vmatpush1.msra.mxu0 %v8720_v17  ;;  %1057 = vmatpush1.msra.mxu1 %v8721_v18  ;;  %v5909_v17 = vld [vmem:[%s8432_s3 + $0x1b0] sm:$0xff]  ;;  %v5916_v18 = vld [vmem:[%s8432_s3 + $0x188] sm:$0xff] }
 0x167   :  { %987 = vmatprep.subr.mxu0 %v8722_v19  ;;  %1058 = vmatprep.subr.mxu1 %v8723_v21  ;;  %v5921_v19 = vld [vmem:[%s8432_s3 + $0x198] sm:$0xff]  ;;  %v5928_v21 = vld [vmem:[%s8432_s3 + $0x180] sm:$0xff] }
 0x168   :  { %988 = vmatpush1.msra.mxu0 %v8724_v22  ;;  %1059 = vmatpush1.msra.mxu1 %v8725_v23  ;;  %v5933_v22 = vld [vmem:[%s8432_s3 + $0x190] sm:$0xff]  ;;  %v5940_v23 = vld [vmem:[%s8432_s3 + $0x168] sm:$0xff] }
 0x169   :  { %989 = vmatprep.subr.mxu0 %v8726_v24  ;;  %1060 = vmatprep.subr.mxu1 %v8727_v25  ;;  %v5945_v24 = vld [vmem:[%s8432_s3 + $0x178] sm:$0xff]  ;;  %v5952_v25 = vld [vmem:[%s8432_s3 + $0x160] sm:$0xff] }
 0x16a   :  { %990 = vmatpush1.msra.mxu0 %v8728_v26  ;;  %1023 = vmatprep.mubr.f32.mxu0 %v8729_v27  ;;  %v5957_v26 = vld [vmem:[%s8432_s3 + $0x170] sm:$0xff] }
 0x16b   :  { %1061 = vmatpush1.msra.mxu1 %v8730_v28  ;;  %1094 = vmatprep.mubr.f32.mxu1 %v8729_v27  ;;  %v5964_v28 = vld [vmem:[%s8432_s3 + $0x148] sm:$0xff] }
 0x16c   :  { %1132 = vperm.xlu1 %4562, %v1130_v32   ;;  %1208 = vmatprep.subr.mxu0 %v5848_v5  ;;  %v5981_v32 = vld [vmem:[%s8432_s3 + $0x150] sm:$0xff] }
 0x16d   :  { %1279 = vmatprep.subr.mxu1 %v5853_v6 }
 0x170   :  { %1381 = vperm.xlu1 %4562, %v1379_v33   ;;  %v5988_v33 = vld [vmem:[%s8432_s3 + $0x128] sm:$0xff] }
 0x174   :  { %1879 = vperm.xlu1 %4562, %v1877_v34   ;;  %v5993_v34 = vld [vmem:[%s8432_s3 + $0x138] sm:$0xff] }
 0x178   :  { %2377 = vperm.xlu1 %4562, %v2375_v35   ;;  %v6004_v35 = vld [vmem:[%s8432_s3 + $0x120] sm:$0xff] }
 0x20b   :  { %v776_v36 = vpop.f32.mrf.mxu0  ;;  %v847_v43 = vpop.f32.mrf.mxu1 }
 0x20c   :  { %v852_v37 = vadd.f32 %v776_v36, %v5658_v58  ;;  %v854_v50 = vadd.f32 %v847_v43, %v8735_v49  ;;  %v6009_v36 = vld [vmem:[%s8432_s3 + $0x130] sm:$0xff]  ;;  %v6045_v43 = vld [vmem:[%s8432_s3 + $0xf8] sm:$0xff]  ;;  %v6076_v49 = vld [vmem:[%s8432_s3 + $0xc0] sm:$0xff] }
 0x20d   :  { %v778_v39 = vpop.f32.mrf.mxu0  ;;  %v849_v45 = vpop.f32.mrf.mxu1 }
 0x20e   :  { %v4325_v40 = vmul.f32 -1.442695, %v852_v37  ;;  %v853_v42 = vadd.f32 %v778_v39, %v8733_v41  ;;  %v855_v48 = vadd.f32 %v849_v45, %v8734_v46  ;;  %v6016_v37 = vld [vmem:[%s8432_s3 + $0x108] sm:$0xff]  ;;  %v6021_v39 = vld [vmem:[%s8432_s3 + $0x118] sm:$0xff]  ;;  %v6033_v41 = vld [vmem:[%s8432_s3 + $0x110] sm:$0xff] }
 0x20f   :  { %v6057_v45 = vld [vmem:[%s8432_s3 + $0xf0] sm:$0xff]  ;;  %v6064_v46 = vld [vmem:[%s8432_s3 + $0xc8] sm:$0xff] }
 0x210   :  { %4579 = vpow2.f32 %v4325_v40  ;;  %v4326_v44 = vmul.f32 -1.442695, %v853_v42  ;;  %v4327_v61 = vmul.f32 -1.442695, %v855_v48  ;;  %v6028_v40 = vld [vmem:[%s8432_s3 + $0x100] sm:$0xff]  ;;  %v6040_v42 = vld [vmem:[%s8432_s3 + $0xe8] sm:$0xff] }
 0x211   :  { %v6069_v48 = vld [vmem:[%s8432_s3 + $0xd8] sm:$0xff] }
 0x212   :  { %4581 = vpow2.f32 %v4326_v44  ;;  %v6052_v44 = vld [vmem:[%s8432_s3 + $0xe0] sm:$0xff] }
 0x213   :  { %4583 = vtanh.f32 %v854_v50  ;;  %v6081_v50 = vld [vmem:[%s8432_s3 + $0xd0] sm:$0xff] }
 0x214   :  { %4585 = vpow2.f32 %v4327_v61  ;;  %v6088_v61 = vld [vmem:[%s8432_s3 + $0xa8] sm:$0xff] }
 0x21d   :  { %v4580_v53 = vpop.eup %4579 }
 0x21e   :  { %v859_v52 = vadd.f32 1.0, %v4580_v53  ;;  %v6093_v53 = vld [vmem:[%s8432_s3 + $0xb8] sm:$0xff] }
 0x21f   :  { %v4582_v62 = vpop.eup %4581 }
 0x220   :  { %4587 = vrcp.f32 %v859_v52  ;;  %v865_v58 = vadd.f32 1.0, %v4582_v62  ;;  %v4584_v63 = vpop.eup %4583  ;;  %v6100_v52 = vld [vmem:[%s8432_s3 + $0xa0] sm:$0xff]  ;;  %v6105_v62 = vld [vmem:[%s8432_s3 + $0xb0] sm:$0xff] }
 0x221   :  { %v4586_v20 = vpop.eup %4585 }
 0x222   :  { %4589 = vrcp.f32 %v865_v58  ;;  %v872_v54 = vadd.f32 1.0, %v4586_v20  ;;  %v6112_v58 = vld [vmem:[%s8432_s3 + $0x88] sm:$0xff]  ;;  %v6124_v20 = vld [vmem:[%s8432_s3 + $0x80] sm:$0xff] }
 0x223   :  { %8740 = vst [vmem:[#allocation11_spill] sm:$0xff] %v6124_v20 }
 0x224   :  { %4591 = vrcp.f32 %v872_v54  ;;  %v6153_v54 = vld [vmem:[%s8432_s3 + $0x70] sm:$0xff] }
 0x225   :  { %8745 = vst [vmem:[#allocation16_spill] sm:$0xff] %v6153_v54 }
 0x22d   :  { %v4588_v56 = vpop.eup %4587 }
 0x22e   :  { %v876_v60 = vmul.f32 %v4588_v56, %v4584_v63  ;;  %v6117_v63 = vld [vmem:[%s8432_s3 + $0x98] sm:$0xff]  ;;  %v6129_v56 = vld [vmem:[%s8432_s3 + $0x90] sm:$0xff] }
 0x22f   :  { %v4590_v2 = vpop.eup %4589  ;;  %8741 = vst [vmem:[#allocation12_spill] sm:$0xff] %v6129_v56 }
 0x230   :  { %v875_v47 = vmul.f32 %v4590_v2, %v639_v51  ;;  %v6141_v2 = vld [vmem:[%s8432_s3 + $0x78] sm:$0xff] }
 0x231   :  { %v4592_v59 = vpop.eup %4591  ;;  %8743 = vst [vmem:[#allocation14_spill] sm:$0xff] %v6141_v2 }
 0x232   :  { %v877_v55 = vadd.f32 %v876_v60, %v875_v47  ;;  %v6136_v60 = vld [vmem:[%s8432_s3 + $0x68] sm:$0xff] }
 0x233   :  { %8742 = vst [vmem:[#allocation13_spill] sm:$0xff] %v6136_v60  ;;  %v6160_v47 = vld [vmem:[%s8432_s3 + $0x48] sm:$0xff] }
 0x234   :  { %4593 = vtanh.f32 %v877_v55  ;;  %v5832_v0 = vsel %vm885_vm9, %v877_v55, %v639_v51  ;;  %v6148_v51 = vld [vmem:[%s8432_s3 + $0x60] sm:$0xff]  ;;  %8746 = vst [vmem:[#allocation17_spill] sm:$0xff] %v6160_v47  ;;  %v6165_v55 = vld [vmem:[%s8432_s3 + $0x58] sm:$0xff] }
 0x235   :  { %8744 = vst [vmem:[#allocation15_spill] sm:$0xff] %v6148_v51  ;;  %8747 = vst [vmem:[#allocation18_spill] sm:$0xff] %v6165_v55 }
 0x241   :  { %v4594_v4 = vpop.eup %4593 }
 0x242   :  { %v879_v3 = vmul.f32 %v4594_v4, %v4592_v59  ;;  %v6172_v59 = vld [vmem:[%s8432_s3 + $0x40] sm:$0xff]  ;;  %v6177_v4 = vld [vmem:[%s8432_s3 + $0x50] sm:$0xff] }
 0x243   :  { %8748 = vst [vmem:[#allocation19_spill] sm:$0xff] %v6172_v59  ;;  %8749 = vst [vmem:[#allocation20_spill] sm:$0xff] %v6177_v4 }
 0x244   :  { %v5839_v29 = vsel %vm885_vm9, %v879_v3, %v638_v1  ;;  %v6184_v3 = vld [vmem:[%s8432_s3 + $0x28] sm:$0xff]  ;;  %v6189_v1 = vld [vmem:[%s8432_s3 + $0x38] sm:$0xff] }
 0x245   :  { %8737 = vst [vmem:[#allocation8_spill] sm:$0xff] %v5839_v29  ;;  %1024 = vmatmul.mubr.f32.vlgmr.msra.gmra.mxu0 %v5839_v29  ;;  %1095 = vmatmul.mubr.f32.vlgmr.msra.gmra.mxu1 %v5839_v29  ;;  %8750 = vst [vmem:[#allocation21_spill] sm:$0xff] %v6184_v3 }
 0x246   :  { %1272 = vmatprep.mubr.f32.mxu0 %v8729_v27  ;;  %1343 = vmatprep.mubr.f32.mxu1 %v8729_v27  ;;  %8751 = vst [vmem:[#allocation22_spill] sm:$0xff] %v6189_v1  ;;  %v6213_v27 = vld [vmem:[%s8432_s3 + $0x18] sm:$0xff] }
 0x247   :  { %1209 = vmatpush1.msra.mxu0 %v5858_v7  ;;  %1280 = vmatpush1.msra.mxu1 %v5865_v8  ;;  %8755 = vst [vmem:[#allocation27_spill] sm:$0xff] %v6213_v27 }
 0x248   :  { %1210 = vmatprep.subr.mxu0 %v5870_v9  ;;  %1281 = vmatprep.subr.mxu1 %v5875_v10 }
 0x249   :  { %1211 = vmatpush1.msra.mxu0 %v5882_v12  ;;  %1282 = vmatpush1.msra.mxu1 %v5887_v13 }
 0x24a   :  { %1212 = vmatprep.subr.mxu0 %v5892_v14  ;;  %1283 = vmatprep.subr.mxu1 %v5899_v15 }
 0x24b   :  { %1213 = vmatpush1.msra.mxu0 %v5904_v16  ;;  %1284 = vmatpush1.msra.mxu1 %v5909_v17 }
 0x24c   :  { %1214 = vmatprep.subr.mxu0 %v5916_v18  ;;  %1285 = vmatprep.subr.mxu1 %v5921_v19 }
 0x24d   :  { %1215 = vmatpush1.msra.mxu0 %v5928_v21  ;;  %1286 = vmatpush1.msra.mxu1 %v5933_v22 }
 0x24e   :  { %1216 = vmatprep.subr.mxu0 %v5940_v23  ;;  %1287 = vmatprep.subr.mxu1 %v5945_v24 }
 0x24f   :  { %1217 = vmatpush1.msra.mxu0 %v5952_v25  ;;  %1288 = vmatpush1.msra.mxu1 %v5957_v26 }
 0x250   :  { %1218 = vmatprep.subr.mxu0 %v5964_v28  ;;  %1289 = vmatprep.subr.mxu1 %v5969_v30 }
 0x251   :  { %1219 = vmatpush1.msra.mxu0 %v5976_v31  ;;  %1290 = vmatpush1.msra.mxu1 %v5981_v32 }
 0x252   :  { %1220 = vmatprep.subr.mxu0 %v5988_v33  ;;  %1291 = vmatprep.subr.mxu1 %v5993_v34 }
 0x253   :  { %1221 = vmatpush1.msra.mxu0 %v6004_v35  ;;  %1292 = vmatpush1.msra.mxu1 %v6009_v36 }
 0x254   :  { %1222 = vmatprep.subr.mxu0 %v6016_v37  ;;  %1293 = vmatprep.subr.mxu1 %v6021_v39 }
 0x255   :  { %1223 = vmatpush1.msra.mxu0 %v6028_v40  ;;  %1294 = vmatpush1.msra.mxu1 %v6033_v41 }
 0x256   :  { %1224 = vmatprep.subr.mxu0 %v6040_v42  ;;  %1295 = vmatprep.subr.mxu1 %v6045_v43 }
 0x257   :  { %1225 = vmatpush1.msra.mxu0 %v6052_v44  ;;  %1296 = vmatpush1.msra.mxu1 %v6057_v45 }
 0x258   :  { %1226 = vmatprep.subr.mxu0 %v6064_v46  ;;  %1297 = vmatprep.subr.mxu1 %v6069_v48 }
 0x259   :  { %1227 = vmatpush1.msra.mxu0 %v6076_v49  ;;  %1298 = vmatpush1.msra.mxu1 %v6081_v50 }
 0x25a   :  { %1228 = vmatprep.subr.mxu0 %v6088_v61  ;;  %1299 = vmatprep.subr.mxu1 %v6093_v53 }
 0x25b   :  { %1229 = vmatpush1.msra.mxu0 %v6100_v52  ;;  %1300 = vmatpush1.msra.mxu1 %v6105_v62 }
 0x25c   :  { %1230 = vmatprep.subr.mxu0 %v6112_v58  ;;  %1301 = vmatprep.subr.mxu1 %v6117_v63 }
 0x25d   :  { %1231 = vmatpush1.msra.mxu0 %v6124_v20  ;;  %1302 = vmatpush1.msra.mxu1 %v6129_v56 }
 0x25e   :  { %1232 = vmatprep.subr.mxu0 %v6136_v60  ;;  %1303 = vmatprep.subr.mxu1 %v6141_v2  ;;  %v8760_v2 = vld [vmem:[#allocation36_spill] sm:$0xff]  ;;  %v8761_v60 = vld [vmem:[#allocation34_spill] sm:$0xff] }
 0x25f   :  { %1233 = vmatpush1.msra.mxu0 %v6148_v51  ;;  %1304 = vmatpush1.msra.mxu1 %v6153_v54 }
 0x260   :  { %1234 = vmatprep.subr.mxu0 %v6160_v47  ;;  %1305 = vmatprep.subr.mxu1 %v6165_v55 }
 0x261   :  { %1235 = vmatpush1.msra.mxu0 %v6172_v59  ;;  %1306 = vmatpush1.msra.mxu1 %v6177_v4  ;;  %v8759_v59 = vld [vmem:[#allocation35_spill] sm:$0xff] }
 0x262   :  { %1236 = vmatprep.subr.mxu0 %v6184_v3  ;;  %1307 = vmatprep.subr.mxu1 %v6189_v1 }
 0x263   :  { %1237 = vmatpush1.msra.mxu0 %v6196_v11  ;;  %1308 = vmatpush1.msra.mxu1 %v6201_v57  ;;  %v6220_v11 = vld [vmem:[%s8432_s3] sm:$0xff]  ;;  %v6225_v57 = vld [vmem:[%s8432_s3 + $0x10] sm:$0xff] }
 0x264   :  { %1238 = vmatprep.subr.mxu0 %v6208_v38  ;;  %1309 = vmatprep.subr.mxu1 %v6213_v27  ;;  %8756 = vst [vmem:[#allocation28_spill] sm:$0xff] %v6220_v11  ;;  %8757 = vst [vmem:[#allocation24_spill] sm:$0xff] %v6225_v57  ;;  %v8758_v27 = vld [vmem:[#allocation33_spill] sm:$0xff] }
 0x265   :  { %1239 = vmatpush1.msra.mxu0 %v6220_v11  ;;  %1310 = vmatpush1.msra.mxu1 %v6225_v57 }
 0x266   :  { %1457 = vmatprep.subr.mxu0 %v5848_v5  ;;  %1528 = vmatprep.subr.mxu1 %v5853_v6 }
 0x305   :  { %v1025_v38 = vpop.f32.mrf.mxu0  ;;  %v1096_v47 = vpop.f32.mrf.mxu1 }
 0x306   :  { %v1101_v1 = vadd.f32 %v1025_v38, %v8758_v27  ;;  %v1103_v57 = vadd.f32 %v1096_v47, %v8761_v60  ;;  %v8765_v60 = vld [vmem:[#allocation12_spill] sm:$0xff]  ;;  %v8767_v47 = vld [vmem:[#allocation14_spill] sm:$0xff] }
 0x307   :  { %v1027_v3 = vpop.f32.mrf.mxu0  ;;  %v1098_v51 = vpop.f32.mrf.mxu1 }
 0x308   :  { %v4328_v4 = vmul.f32 -1.442695, %v1101_v1  ;;  %v1102_v55 = vadd.f32 %v1027_v3, %v8759_v59  ;;  %v1104_v11 = vadd.f32 %v1098_v51, %v8760_v2  ;;  %v6235_v3 = vpop.permute.xlu1 %1132  ;;  %v8766_v51 = vld [vmem:[#allocation13_spill] sm:$0xff] }
 0x309   :  { %8762 = vst [vmem:[#allocation31_spill] sm:$0xff] %v6235_v3  ;;  %vm1134_vm10 = vcmp.eq.s32.totalorder %v6235_v3, 1  ;;  %v8780_v3 = vld [vmem:[#allocation28_spill] sm:$0xff] }
 0x30a   :  { %4595 = vpow2.f32 %v4328_v4  ;;  %v4329_v54 = vmul.f32 -1.442695, %v1102_v55  ;;  %v4330_v56 = vmul.f32 -1.442695, %v1104_v11 }
 0x30c   :  { %4597 = vpow2.f32 %v4329_v54 }
 0x30d   :  { %4599 = vtanh.f32 %v1103_v57 }
 0x30e   :  { %4601 = vpow2.f32 %v4330_v56 }
 0x317   :  { %v4596_v5 = vpop.eup %4595 }
 0x318   :  { %v1108_v20 = vadd.f32 1.0, %v4596_v5 }
 0x319   :  { %v4598_v6 = vpop.eup %4597 }
 0x31a   :  { %4603 = vrcp.f32 %v1108_v20  ;;  %v1114_v38 = vadd.f32 1.0, %v4598_v6  ;;  %v4600_v27 = vpop.eup %4599 }
 0x31b   :  { %v4602_v59 = vpop.eup %4601 }
 0x31c   :  { %4605 = vrcp.f32 %v1114_v38  ;;  %v1121_v1 = vadd.f32 1.0, %v4602_v59  ;;  %v8768_v38 = vld [vmem:[#allocation15_spill] sm:$0xff]  ;;  %v8770_v59 = vld [vmem:[#allocation17_spill] sm:$0xff] }
 0x31e   :  { %4607 = vrcp.f32 %v1121_v1  ;;  %v8774_v1 = vld [vmem:[#allocation21_spill] sm:$0xff] }
 0x327   :  { %v4604_v4 = vpop.eup %4603 }
 0x328   :  { %v1125_v54 = vmul.f32 %v4604_v4, %v4600_v27  ;;  %v8769_v27 = vld [vmem:[#allocation16_spill] sm:$0xff]  ;;  %v8771_v4 = vld [vmem:[#allocation18_spill] sm:$0xff] }
 0x329   :  { %v4606_v55 = vpop.eup %4605 }
 0x32a   :  { %v1124_v2 = vmul.f32 %v4606_v55, %v5832_v0  ;;  %v8773_v55 = vld [vmem:[#allocation20_spill] sm:$0xff] }
 0x32b   :  { %v4608_v5 = vpop.eup %4607 }
 0x32c   :  { %v1126_v11 = vadd.f32 %v1125_v54, %v1124_v2  ;;  %v8772_v54 = vld [vmem:[#allocation19_spill] sm:$0xff]  ;;  %v8775_v2 = vld [vmem:[#allocation22_spill] sm:$0xff] }
 0x32e   :  { %4609 = vtanh.f32 %v1126_v11  ;;  %v6242_v57 = vsel %vm1134_vm10, %v1126_v11, %v5832_v0  ;;  %v8764_v0 = vld [vmem:[#allocation11_spill] sm:$0xff] }
 0x32f   :  { %v8776_v11 = vld [vmem:[#allocation23_spill] sm:$0xff] }
 0x33b   :  { %v4610_v6 = vpop.eup %4609 }
 0x33c   :  { %v1128_v20 = vmul.f32 %v4610_v6, %v4608_v5  ;;  %v8777_v5 = vld [vmem:[#allocation25_spill] sm:$0xff]  ;;  %v8778_v6 = vld [vmem:[#allocation26_spill] sm:$0xff] }
 0x33e   :  { %v6247_v56 = vsel %vm1134_vm10, %v1128_v20, %v5839_v29  ;;  %v8779_v20 = vld [vmem:[#allocation27_spill] sm:$0xff]  ;;  %v8781_v29 = vmov 0.0  }
 0x33f   :  { %8763 = vst [vmem:[#allocation32_spill] sm:$0xff] %v6247_v56  ;;  %1273 = vmatmul.mubr.f32.vlgmr.msra.gmra.mxu0 %v6247_v56  ;;  %1344 = vmatmul.mubr.f32.vlgmr.msra.gmra.mxu1 %v6247_v56 }
 0x340   :  { %1458 = vmatpush1.msra.mxu0 %v5858_v7  ;;  %1529 = vmatpush1.msra.mxu1 %v5865_v8 }
 0x341   :  { %1459 = vmatprep.subr.mxu0 %v5870_v9  ;;  %1530 = vmatprep.subr.mxu1 %v5875_v10 }
 0x342   :  { %1460 = vmatpush1.msra.mxu0 %v5882_v12  ;;  %1531 = vmatpush1.msra.mxu1 %v5887_v13 }
 0x343   :  { %1461 = vmatprep.subr.mxu0 %v5892_v14  ;;  %1532 = vmatprep.subr.mxu1 %v5899_v15 }
 0x344   :  { %1462 = vmatpush1.msra.mxu0 %v5904_v16  ;;  %1533 = vmatpush1.msra.mxu1 %v5909_v17 }
 0x345   :  { %1463 = vmatprep.subr.mxu0 %v5916_v18  ;;  %1534 = vmatprep.subr.mxu1 %v5921_v19 }
 0x346   :  { %1464 = vmatpush1.msra.mxu0 %v5928_v21  ;;  %1535 = vmatpush1.msra.mxu1 %v5933_v22 }
 0x347   :  { %1465 = vmatprep.subr.mxu0 %v5940_v23  ;;  %1536 = vmatprep.subr.mxu1 %v5945_v24 }
 0x348   :  { %1466 = vmatpush1.msra.mxu0 %v5952_v25  ;;  %1537 = vmatpush1.msra.mxu1 %v5957_v26 }
 0x349   :  { %1467 = vmatprep.subr.mxu0 %v5964_v28  ;;  %1538 = vmatprep.subr.mxu1 %v5969_v30 }
 0x34a   :  { %1468 = vmatpush1.msra.mxu0 %v5976_v31  ;;  %1539 = vmatpush1.msra.mxu1 %v5981_v32 }
 0x34b   :  { %1469 = vmatprep.subr.mxu0 %v5988_v33  ;;  %1540 = vmatprep.subr.mxu1 %v5993_v34 }
 0x34c   :  { %1470 = vmatpush1.msra.mxu0 %v6004_v35  ;;  %1541 = vmatpush1.msra.mxu1 %v6009_v36 }
 0x34d   :  { %1471 = vmatprep.subr.mxu0 %v6016_v37  ;;  %1542 = vmatprep.subr.mxu1 %v6021_v39 }
 0x34e   :  { %1472 = vmatpush1.msra.mxu0 %v6028_v40  ;;  %1543 = vmatpush1.msra.mxu1 %v6033_v41 }
 0x34f   :  { %1473 = vmatprep.subr.mxu0 %v6040_v42  ;;  %1544 = vmatprep.subr.mxu1 %v6045_v43 }
 0x350   :  { %1474 = vmatpush1.msra.mxu0 %v6052_v44  ;;  %1545 = vmatpush1.msra.mxu1 %v6057_v45 }
 0x351   :  { %1475 = vmatprep.subr.mxu0 %v6064_v46  ;;  %1546 = vmatprep.subr.mxu1 %v6069_v48 }
 0x352   :  { %1476 = vmatpush1.msra.mxu0 %v6076_v49  ;;  %1547 = vmatpush1.msra.mxu1 %v6081_v50 }
 0x353   :  { %1477 = vmatprep.subr.mxu0 %v6088_v61  ;;  %1548 = vmatprep.subr.mxu1 %v6093_v53 }
 0x354   :  { %1478 = vmatpush1.msra.mxu0 %v6100_v52  ;;  %1549 = vmatpush1.msra.mxu1 %v6105_v62 }
 0x355   :  { %1479 = vmatprep.subr.mxu0 %v6112_v58  ;;  %1550 = vmatprep.subr.mxu1 %v6117_v63 }
 0x356   :  { %1480 = vmatpush1.msra.mxu0 %v8764_v0  ;;  %1551 = vmatpush1.msra.mxu1 %v8765_v60 }
 0x357   :  { %1481 = vmatprep.subr.mxu0 %v8766_v51  ;;  %1552 = vmatprep.subr.mxu1 %v8767_v47  ;;  %v8787_v47 = vld [vmem:[#allocation40_spill] sm:$0xff]  ;;  %v8788_v51 = vld [vmem:[#allocation38_spill] sm:$0xff] }
 0x358   :  { %1482 = vmatpush1.msra.mxu0 %v8768_v38  ;;  %1553 = vmatpush1.msra.mxu1 %v8769_v27 }
 0x359   :  { %1483 = vmatprep.subr.mxu0 %v8770_v59  ;;  %1554 = vmatprep.subr.mxu1 %v8771_v4  ;;  %v8782_v4 = vld [vmem:[#allocation24_spill] sm:$0xff] }
 0x35a   :  { %1484 = vmatpush1.msra.mxu0 %v8772_v54  ;;  %1555 = vmatpush1.msra.mxu1 %v8773_v55  ;;  %v8783_v55 = vld [vmem:[#allocation9_spill] sm:$0xff] }
 0x35b   :  { %1485 = vmatprep.subr.mxu0 %v8774_v1  ;;  %1556 = vmatprep.subr.mxu1 %v8775_v2  ;;  %v8784_v1 = vld [vmem:[#allocation10_spill] sm:$0xff] }
 0x35c   :  { %1486 = vmatpush1.msra.mxu0 %v8776_v11  ;;  %1557 = vmatpush1.msra.mxu1 %v8777_v5  ;;  %v8785_v11 = vld [vmem:[#allocation37_spill] sm:$0xff] }
 0x35d   :  { %1487 = vmatprep.subr.mxu0 %v8778_v6  ;;  %1558 = vmatprep.subr.mxu1 %v8779_v20  ;;  %v8786_v6 = vld [vmem:[#allocation39_spill] sm:$0xff] }
 0x35e   :  { %1488 = vmatpush1.msra.mxu0 %v8780_v3  ;;  %1521 = vmatprep.mubr.f32.mxu0 %v8781_v29 }
 0x35f   :  { %1559 = vmatpush1.msra.mxu1 %v8782_v4  ;;  %1592 = vmatprep.mubr.f32.mxu1 %v8781_v29 }
 0x360   :  { %1706 = vmatprep.subr.mxu0 %v8783_v55  ;;  %1777 = vmatprep.subr.mxu1 %v8784_v1 }
 0x3ff   :  { %v1274_v2 = vpop.f32.mrf.mxu0  ;;  %v1345_v20 = vpop.f32.mrf.mxu1 }
 0x400   :  { %v1350_v54 = vadd.f32 %v1274_v2, %v8785_v11  ;;  %v1352_v29 = vadd.f32 %v1345_v20, %v8788_v51  ;;  %v8793_v20 = vld [vmem:[#allocation14_spill] sm:$0xff] }
 0x401   :  { %v1276_v5 = vpop.f32.mrf.mxu0  ;;  %v1347_v38 = vpop.f32.mrf.mxu1 }
 0x402   :  { %v4331_v59 = vmul.f32 -1.442695, %v1350_v54  ;;  %v1351_v27 = vadd.f32 %v1276_v5, %v8786_v6  ;;  %v1353_v4 = vadd.f32 %v1347_v38, %v8787_v47  ;;  %v6322_v47 = vpop.permute.xlu1 %1381 }
 0x403   :  { %8789 = vst [vmem:[#allocation30_spill] sm:$0xff] %v6322_v47  ;;  %vm1383_vm11 = vcmp.eq.s32.totalorder %v6322_v47, 1  ;;  %v8806_v47 = vld [vmem:[#allocation28_spill] sm:$0xff] }
 0x404   :  { %4611 = vpow2.f32 %v4331_v59  ;;  %v4332_v3 = vmul.f32 -1.442695, %v1351_v27  ;;  %v4333_v60 = vmul.f32 -1.442695, %v1353_v4 }
 0x406   :  { %4613 = vpow2.f32 %v4332_v3 }
 0x407   :  { %4615 = vtanh.f32 %v1352_v29 }
 0x408   :  { %4617 = vpow2.f32 %v4333_v60 }
 0x411   :  { %v4612_v55 = vpop.eup %4611 }
 0x412   :  { %v1357_v0 = vadd.f32 1.0, %v4612_v55  ;;  %v8791_v55 = vld [vmem:[#allocation12_spill] sm:$0xff] }
 0x413   :  { %v4614_v1 = vpop.eup %4613 }
 0x414   :  { %4619 = vrcp.f32 %v1357_v0  ;;  %v1363_v2 = vadd.f32 1.0, %v4614_v1  ;;  %v4616_v54 = vpop.eup %4615  ;;  %v8792_v1 = vld [vmem:[#allocation13_spill] sm:$0xff] }
 0x415   :  { %v4618_v11 = vpop.eup %4617 }
 0x416   :  { %4621 = vrcp.f32 %v1363_v2  ;;  %v1370_v3 = vadd.f32 1.0, %v4618_v11  ;;  %v8794_v2 = vld [vmem:[#allocation15_spill] sm:$0xff]  ;;  %v8796_v11 = vld [vmem:[#allocation17_spill] sm:$0xff] }
 0x418   :  { %4623 = vrcp.f32 %v1370_v3  ;;  %v8800_v3 = vld [vmem:[#allocation21_spill] sm:$0xff] }
 0x421   :  { %v4620_v59 = vpop.eup %4619 }
 0x422   :  { %v1374_v5 = vmul.f32 %v4620_v59, %v4616_v54  ;;  %v8795_v54 = vld [vmem:[#allocation16_spill] sm:$0xff]  ;;  %v8797_v59 = vld [vmem:[#allocation18_spill] sm:$0xff] }
 0x423   :  { %v4622_v27 = vpop.eup %4621 }
 0x424   :  { %v1373_v6 = vmul.f32 %v4622_v27, %v6242_v57  ;;  %v8799_v27 = vld [vmem:[#allocation20_spill] sm:$0xff] }
 0x425   :  { %v4624_v0 = vpop.eup %4623 }
 0x426   :  { %v1375_v51 = vadd.f32 %v1374_v5, %v1373_v6  ;;  %v8798_v5 = vld [vmem:[#allocation19_spill] sm:$0xff]  ;;  %v8801_v6 = vld [vmem:[#allocation22_spill] sm:$0xff] }
 0x428   :  { %4625 = vtanh.f32 %v1375_v51  ;;  %v6328_v29 = vsel %vm1383_vm11, %v1375_v51, %v6242_v57  ;;  %v8790_v57 = vld [vmem:[#allocation11_spill] sm:$0xff] }
 0x429   :  { %v8802_v51 = vld [vmem:[#allocation23_spill] sm:$0xff] }
 0x435   :  { %v4626_v60 = vpop.eup %4625 }
 0x436   :  { %v1377_v38 = vmul.f32 %v4626_v60, %v4624_v0  ;;  %v8803_v0 = vld [vmem:[#allocation25_spill] sm:$0xff]  ;;  %v8804_v60 = vld [vmem:[#allocation26_spill] sm:$0xff] }
 0x438   :  { %v6333_v4 = vsel %vm1383_vm11, %v1377_v38, %v6247_v56  ;;  %v8805_v38 = vld [vmem:[#allocation27_spill] sm:$0xff]  ;;  %v8807_v56 = vmov 0.0  }
 0x439   :  { %1522 = vmatmul.mubr.f32.vlgmr.msra.gmra.mxu0 %v6333_v4  ;;  %1593 = vmatmul.mubr.f32.vlgmr.msra.gmra.mxu1 %v6333_v4 }
 0x43a   :  { %1707 = vmatpush1.msra.mxu0 %v5858_v7  ;;  %1778 = vmatpush1.msra.mxu1 %v5865_v8 }
 0x43b   :  { %1708 = vmatprep.subr.mxu0 %v5870_v9  ;;  %1779 = vmatprep.subr.mxu1 %v5875_v10 }
 0x43c   :  { %1709 = vmatpush1.msra.mxu0 %v5882_v12  ;;  %1780 = vmatpush1.msra.mxu1 %v5887_v13 }
 0x43d   :  { %1710 = vmatprep.subr.mxu0 %v5892_v14  ;;  %1781 = vmatprep.subr.mxu1 %v5899_v15 }
 0x43e   :  { %1711 = vmatpush1.msra.mxu0 %v5904_v16  ;;  %1782 = vmatpush1.msra.mxu1 %v5909_v17 }
 0x43f   :  { %1712 = vmatprep.subr.mxu0 %v5916_v18  ;;  %1783 = vmatprep.subr.mxu1 %v5921_v19 }
 0x440   :  { %1713 = vmatpush1.msra.mxu0 %v5928_v21  ;;  %1784 = vmatpush1.msra.mxu1 %v5933_v22 }
 0x441   :  { %1714 = vmatprep.subr.mxu0 %v5940_v23  ;;  %1785 = vmatprep.subr.mxu1 %v5945_v24 }
 0x442   :  { %1715 = vmatpush1.msra.mxu0 %v5952_v25  ;;  %1786 = vmatpush1.msra.mxu1 %v5957_v26 }
 0x443   :  { %1716 = vmatprep.subr.mxu0 %v5964_v28  ;;  %1787 = vmatprep.subr.mxu1 %v5969_v30 }
 0x444   :  { %1717 = vmatpush1.msra.mxu0 %v5976_v31  ;;  %1788 = vmatpush1.msra.mxu1 %v5981_v32 }
 0x445   :  { %1718 = vmatprep.subr.mxu0 %v5988_v33  ;;  %1789 = vmatprep.subr.mxu1 %v5993_v34 }
 0x446   :  { %1719 = vmatpush1.msra.mxu0 %v6004_v35  ;;  %1790 = vmatpush1.msra.mxu1 %v6009_v36 }
 0x447   :  { %1720 = vmatprep.subr.mxu0 %v6016_v37  ;;  %1791 = vmatprep.subr.mxu1 %v6021_v39 }
 0x448   :  { %1721 = vmatpush1.msra.mxu0 %v6028_v40  ;;  %1792 = vmatpush1.msra.mxu1 %v6033_v41 }
 0x449   :  { %1722 = vmatprep.subr.mxu0 %v6040_v42  ;;  %1793 = vmatprep.subr.mxu1 %v6045_v43 }
 0x44a   :  { %1723 = vmatpush1.msra.mxu0 %v6052_v44  ;;  %1794 = vmatpush1.msra.mxu1 %v6057_v45 }
 0x44b   :  { %1724 = vmatprep.subr.mxu0 %v6064_v46  ;;  %1795 = vmatprep.subr.mxu1 %v6069_v48 }
 0x44c   :  { %1725 = vmatpush1.msra.mxu0 %v6076_v49  ;;  %1796 = vmatpush1.msra.mxu1 %v6081_v50 }
 0x44d   :  { %1726 = vmatprep.subr.mxu0 %v6088_v61  ;;  %1797 = vmatprep.subr.mxu1 %v6093_v53 }
 0x44e   :  { %1727 = vmatpush1.msra.mxu0 %v6100_v52  ;;  %1798 = vmatpush1.msra.mxu1 %v6105_v62 }
 0x44f   :  { %1728 = vmatprep.subr.mxu0 %v6112_v58  ;;  %1799 = vmatprep.subr.mxu1 %v6117_v63 }
 0x450   :  { %1729 = vmatpush1.msra.mxu0 %v8790_v57  ;;  %1800 = vmatpush1.msra.mxu1 %v8791_v55 }
 0x451   :  { %1730 = vmatprep.subr.mxu0 %v8792_v1  ;;  %1801 = vmatprep.subr.mxu1 %v8793_v20  ;;  %v8813_v20 = vld [vmem:[#allocation44_spill] sm:$0xff]  ;;  %v8814_v1 = vld [vmem:[#allocation42_spill] sm:$0xff] }
 0x452   :  { %1731 = vmatpush1.msra.mxu0 %v8794_v2  ;;  %1802 = vmatpush1.msra.mxu1 %v8795_v54 }
 0x453   :  { %1732 = vmatprep.subr.mxu0 %v8796_v11  ;;  %1803 = vmatprep.subr.mxu1 %v8797_v59  ;;  %v8808_v59 = vld [vmem:[#allocation24_spill] sm:$0xff] }
 0x454   :  { %1733 = vmatpush1.msra.mxu0 %v8798_v5  ;;  %1804 = vmatpush1.msra.mxu1 %v8799_v27  ;;  %v8809_v27 = vld [vmem:[#allocation9_spill] sm:$0xff] }
 0x455   :  { %1734 = vmatprep.subr.mxu0 %v8800_v3  ;;  %1805 = vmatprep.subr.mxu1 %v8801_v6  ;;  %v8810_v3 = vld [vmem:[#allocation10_spill] sm:$0xff] }
 0x456   :  { %1735 = vmatpush1.msra.mxu0 %v8802_v51  ;;  %1806 = vmatpush1.msra.mxu1 %v8803_v0  ;;  %v8811_v51 = vld [vmem:[#allocation41_spill] sm:$0xff] }
 0x457   :  { %1736 = vmatprep.subr.mxu0 %v8804_v60  ;;  %1807 = vmatprep.subr.mxu1 %v8805_v38  ;;  %v8812_v60 = vld [vmem:[#allocation43_spill] sm:$0xff] }
 0x458   :  { %1737 = vmatpush1.msra.mxu0 %v8806_v47  ;;  %1770 = vmatprep.mubr.f32.mxu0 %v8807_v56 }
 0x459   :  { %1808 = vmatpush1.msra.mxu1 %v8808_v59  ;;  %1841 = vmatprep.mubr.f32.mxu1 %v8807_v56 }
 0x45a   :  { %1955 = vmatprep.subr.mxu0 %v8809_v27  ;;  %2026 = vmatprep.subr.mxu1 %v8810_v3 }
 0x4f9   :  { %v1523_v6 = vpop.f32.mrf.mxu0  ;;  %v1594_v38 = vpop.f32.mrf.mxu1 }
 0x4fa   :  { %v1599_v5 = vadd.f32 %v1523_v6, %v8811_v51  ;;  %v1601_v56 = vadd.f32 %v1594_v38, %v8814_v1  ;;  %v6492_v38 = vpop.permute.xlu1 %1879 }
 0x4fb   :  { %v1525_v0 = vpop.f32.mrf.mxu0  ;;  %v1596_v2 = vpop.f32.mrf.mxu1  ;;  %8839 = vst [vmem:[#allocation35_spill] sm:$0xff] %v6492_v38  ;;  %vm1881_vm13 = vcmp.eq.s32.totalorder %v6492_v38, 1  ;;  %v7298_v38 = vld [vmem:[%s8432_s3 + $0x220] sm:$0xff] }
 0x4fc   :  { %v4334_v11 = vmul.f32 -1.442695, %v1599_v5  ;;  %v1600_v54 = vadd.f32 %v1525_v0, %v8812_v60  ;;  %v1602_v59 = vadd.f32 %v1596_v2, %v8813_v20  ;;  %v6408_v20 = vpop.permute.xlu0 %1630 }
 0x4fd   :  { %8815 = vst [vmem:[#allocation33_spill] sm:$0xff] %v6408_v20  ;;  %vm1632_vm12 = vcmp.eq.s32.totalorder %v6408_v20, 1  ;;  %v7303_v20 = vld [vmem:[%s8432_s3 + $0x230] sm:$0xff] }
 0x4fe   :  { %4627 = vpow2.f32 %v4334_v11  ;;  %v4335_v47 = vmul.f32 -1.442695, %v1600_v54  ;;  %v4336_v55 = vmul.f32 -1.442695, %v1602_v59 }
 0x500   :  { %4629 = vpow2.f32 %v4335_v47 }
 0x501   :  { %4631 = vtanh.f32 %v1601_v56 }
 0x502   :  { %4633 = vpow2.f32 %v4336_v55 }
 0x50b   :  { %v4628_v27 = vpop.eup %4627 }
 0x50c   :  { %v1606_v57 = vadd.f32 1.0, %v4628_v27 }
 0x50d   :  { %v4630_v3 = vpop.eup %4629 }
 0x50e   :  { %4635 = vrcp.f32 %v1606_v57  ;;  %v1612_v6 = vadd.f32 1.0, %v4630_v3  ;;  %v4632_v5 = vpop.eup %4631 }
 0x50f   :  { %v4634_v51 = vpop.eup %4633 }
 0x510   :  { %4637 = vrcp.f32 %v1612_v6  ;;  %v1619_v47 = vadd.f32 1.0, %v4634_v51 }
 0x512   :  { %4639 = vrcp.f32 %v1619_v47  ;;  %v2200_v47 = vld [vmem:[%s8432_s3 + $0x1e0] sm:$0xff] }
 0x51b   :  { %v4636_v11 = vpop.eup %4635 }
 0x51c   :  { %v1623_v0 = vmul.f32 %v4636_v11, %v4632_v5 }
 0x51d   :  { %v4638_v54 = vpop.eup %4637 }
 0x51e   :  { %v1622_v60 = vmul.f32 %v4638_v54, %v6328_v29  ;;  %v2203_v54 = vld [vmem:[%s8432_s3 + $0x1f8] sm:$0xff] }
 0x51f   :  { %v4640_v57 = vpop.eup %4639 }
 0x520   :  { %v1624_v1 = vadd.f32 %v1623_v0, %v1622_v60  ;;  %v2201_v0 = vld [vmem:[%s8432_s3 + $0x1e8] sm:$0xff]  ;;  %v2202_v60 = vld [vmem:[%s8432_s3 + $0x1f0] sm:$0xff] }
 0x522   :  { %4641 = vtanh.f32 %v1624_v1  ;;  %v6414_v56 = vsel %vm1632_vm12, %v1624_v1, %v6328_v29  ;;  %v2197_v1 = vld [vmem:[%s8432_s3 + $0x1c8] sm:$0xff] }
 0x52f   :  { %v4642_v55 = vpop.eup %4641 }
 0x530   :  { %v1626_v2 = vmul.f32 %v4642_v55, %v4640_v57  ;;  %v2196_v57 = vld [vmem:[%s8432_s3 + $0x1c0] sm:$0xff]  ;;  %v2198_v55 = vld [vmem:[%s8432_s3 + $0x1d0] sm:$0xff] }
 0x532   :  { %v6419_v59 = vsel %vm1632_vm12, %v1626_v2, %v6333_v4  ;;  %v2193_v2 = vld [vmem:[%s8432_s3 + $0x1a8] sm:$0xff] }
 0x533   :  { %1771 = vmatmul.mubr.f32.vlgmr.msra.gmra.mxu0 %v6419_v59  ;;  %1842 = vmatmul.mubr.f32.vlgmr.msra.gmra.mxu1 %v6419_v59 }
 0x534   :  { %1956 = vmatpush1.msra.mxu0 %v5858_v7  ;;  %2027 = vmatpush1.msra.mxu1 %v5865_v8  ;;  %v8816_v7 = vld [vmem:[#allocation11_spill] sm:$0xff]  ;;  %v8817_v8 = vld [vmem:[#allocation12_spill] sm:$0xff] }
 0x535   :  { %1957 = vmatprep.subr.mxu0 %v5870_v9  ;;  %2028 = vmatprep.subr.mxu1 %v5875_v10  ;;  %v8818_v9 = vld [vmem:[#allocation13_spill] sm:$0xff]  ;;  %v8819_v10 = vld [vmem:[#allocation14_spill] sm:$0xff] }
 0x536   :  { %1958 = vmatpush1.msra.mxu0 %v5882_v12  ;;  %2029 = vmatpush1.msra.mxu1 %v5887_v13  ;;  %v8820_v12 = vld [vmem:[#allocation15_spill] sm:$0xff]  ;;  %v8821_v13 = vld [vmem:[#allocation16_spill] sm:$0xff] }
 0x537   :  { %1959 = vmatprep.subr.mxu0 %v5892_v14  ;;  %2030 = vmatprep.subr.mxu1 %v5899_v15  ;;  %v8822_v14 = vld [vmem:[#allocation17_spill] sm:$0xff]  ;;  %v8823_v15 = vld [vmem:[#allocation18_spill] sm:$0xff] }
 0x538   :  { %1960 = vmatpush1.msra.mxu0 %v5904_v16  ;;  %2031 = vmatpush1.msra.mxu1 %v5909_v17  ;;  %v8824_v16 = vld [vmem:[#allocation19_spill] sm:$0xff]  ;;  %v8825_v17 = vld [vmem:[#allocation20_spill] sm:$0xff] }
 0x539   :  { %1961 = vmatprep.subr.mxu0 %v5916_v18  ;;  %2032 = vmatprep.subr.mxu1 %v5921_v19  ;;  %v8826_v18 = vld [vmem:[#allocation21_spill] sm:$0xff]  ;;  %v8827_v19 = vld [vmem:[#allocation22_spill] sm:$0xff]  ;;  %8868 = vst [vmem:[#allocation19_spill] sm:$0xff] %v7298_v38  ;;  %8869 = vst [vmem:[#allocation20_spill] sm:$0xff] %v7303_v20 }
 0x53a   :  { %1962 = vmatpush1.msra.mxu0 %v5928_v21  ;;  %2033 = vmatpush1.msra.mxu1 %v5933_v22  ;;  %v8828_v21 = vld [vmem:[#allocation23_spill] sm:$0xff]  ;;  %v8829_v22 = vld [vmem:[#allocation25_spill] sm:$0xff] }
 0x53b   :  { %1963 = vmatprep.subr.mxu0 %v5940_v23  ;;  %2034 = vmatprep.subr.mxu1 %v5945_v24  ;;  %v8830_v23 = vld [vmem:[#allocation26_spill] sm:$0xff]  ;;  %v8831_v24 = vld [vmem:[#allocation27_spill] sm:$0xff] }
 0x53c   :  { %1964 = vmatpush1.msra.mxu0 %v5952_v25  ;;  %2035 = vmatpush1.msra.mxu1 %v5957_v26  ;;  %v8832_v25 = vld [vmem:[#allocation28_spill] sm:$0xff]  ;;  %v8833_v26 = vmov 0.0  }
 0x53d   :  { %1965 = vmatprep.subr.mxu0 %v5964_v28  ;;  %2036 = vmatprep.subr.mxu1 %v5969_v30  ;;  %v8834_v28 = vld [vmem:[#allocation24_spill] sm:$0xff] }
 0x53e   :  { %1966 = vmatpush1.msra.mxu0 %v5976_v31  ;;  %2037 = vmatpush1.msra.mxu1 %v5981_v32  ;;  %v8835_v31 = vld [vmem:[#allocation45_spill] sm:$0xff] }
 0x53f   :  { %1967 = vmatprep.subr.mxu0 %v5988_v33  ;;  %2038 = vmatprep.subr.mxu1 %v5993_v34 }
 0x540   :  { %1968 = vmatpush1.msra.mxu0 %v6004_v35  ;;  %2039 = vmatpush1.msra.mxu1 %v6009_v36  ;;  %v8836_v35 = vld [vmem:[#allocation47_spill] sm:$0xff] }
 0x541   :  { %1969 = vmatprep.subr.mxu0 %v6016_v37  ;;  %2040 = vmatprep.subr.mxu1 %v6021_v39 }
 0x542   :  { %1970 = vmatpush1.msra.mxu0 %v6028_v40  ;;  %2041 = vmatpush1.msra.mxu1 %v6033_v41  ;;  %v8837_v41 = vld [vmem:[#allocation48_spill] sm:$0xff] }
 0x543   :  { %1971 = vmatprep.subr.mxu0 %v6040_v42  ;;  %2042 = vmatprep.subr.mxu1 %v6045_v43  ;;  %v8838_v43 = vld [vmem:[#allocation46_spill] sm:$0xff] }
 0x544   :  { %1972 = vmatpush1.msra.mxu0 %v6052_v44  ;;  %2043 = vmatpush1.msra.mxu1 %v6057_v45 }
 0x545   :  { %1973 = vmatprep.subr.mxu0 %v6064_v46  ;;  %2044 = vmatprep.subr.mxu1 %v6069_v48 }
 0x546   :  { %1974 = vmatpush1.msra.mxu0 %v6076_v49  ;;  %2045 = vmatpush1.msra.mxu1 %v6081_v50 }
 0x547   :  { %1975 = vmatprep.subr.mxu0 %v6088_v61  ;;  %2046 = vmatprep.subr.mxu1 %v6093_v53 }
 0x548   :  { %1976 = vmatpush1.msra.mxu0 %v6100_v52  ;;  %2047 = vmatpush1.msra.mxu1 %v6105_v62 }
 0x549   :  { %1977 = vmatprep.subr.mxu0 %v6112_v58  ;;  %2048 = vmatprep.subr.mxu1 %v6117_v63 }
 0x54a   :  { %1978 = vmatpush1.msra.mxu0 %v8816_v7  ;;  %2049 = vmatpush1.msra.mxu1 %v8817_v8  ;;  %v2195_v7 = vld [vmem:[%s8432_s3 + $0x1b8] sm:$0xff]  ;;  %v2192_v8 = vld [vmem:[%s8432_s3 + $0x1a0] sm:$0xff] }
 0x54b   :  { %1979 = vmatprep.subr.mxu0 %v8818_v9  ;;  %2050 = vmatprep.subr.mxu1 %v8819_v10  ;;  %v2194_v9 = vld [vmem:[%s8432_s3 + $0x1b0] sm:$0xff]  ;;  %v2189_v10 = vld [vmem:[%s8432_s3 + $0x188] sm:$0xff] }
 0x54c   :  { %1980 = vmatpush1.msra.mxu0 %v8820_v12  ;;  %2051 = vmatpush1.msra.mxu1 %v8821_v13  ;;  %v2191_v12 = vld [vmem:[%s8432_s3 + $0x198] sm:$0xff]  ;;  %v2188_v13 = vld [vmem:[%s8432_s3 + $0x180] sm:$0xff] }
 0x54d   :  { %1981 = vmatprep.subr.mxu0 %v8822_v14  ;;  %2052 = vmatprep.subr.mxu1 %v8823_v15  ;;  %v2190_v14 = vld [vmem:[%s8432_s3 + $0x190] sm:$0xff]  ;;  %v2185_v15 = vld [vmem:[%s8432_s3 + $0x168] sm:$0xff] }
 0x54e   :  { %1982 = vmatpush1.msra.mxu0 %v8824_v16  ;;  %2053 = vmatpush1.msra.mxu1 %v8825_v17  ;;  %v2187_v16 = vld [vmem:[%s8432_s3 + $0x178] sm:$0xff]  ;;  %v2184_v17 = vld [vmem:[%s8432_s3 + $0x160] sm:$0xff] }
 0x54f   :  { %1983 = vmatprep.subr.mxu0 %v8826_v18  ;;  %2054 = vmatprep.subr.mxu1 %v8827_v19  ;;  %v2186_v18 = vld [vmem:[%s8432_s3 + $0x170] sm:$0xff]  ;;  %v2181_v19 = vld [vmem:[%s8432_s3 + $0x148] sm:$0xff] }
 0x550   :  { %1984 = vmatpush1.msra.mxu0 %v8828_v21  ;;  %2055 = vmatpush1.msra.mxu1 %v8829_v22  ;;  %v2183_v21 = vld [vmem:[%s8432_s3 + $0x158] sm:$0xff]  ;;  %v2180_v22 = vld [vmem:[%s8432_s3 + $0x140] sm:$0xff] }
 0x551   :  { %1985 = vmatprep.subr.mxu0 %v8830_v23  ;;  %2056 = vmatprep.subr.mxu1 %v8831_v24  ;;  %v2182_v23 = vld [vmem:[%s8432_s3 + $0x150] sm:$0xff]  ;;  %v2177_v24 = vld [vmem:[%s8432_s3 + $0x128] sm:$0xff] }
 0x552   :  { %1986 = vmatpush1.msra.mxu0 %v8832_v25  ;;  %2019 = vmatprep.mubr.f32.mxu0 %v8833_v26  ;;  %v2179_v25 = vld [vmem:[%s8432_s3 + $0x138] sm:$0xff] }
 0x553   :  { %2057 = vmatpush1.msra.mxu1 %v8834_v28  ;;  %2090 = vmatprep.mubr.f32.mxu1 %v8833_v26  ;;  %v2176_v28 = vld [vmem:[%s8432_s3 + $0x120] sm:$0xff] }
 0x554   :  { %2204 = vmatprep.subr.mxu0 %v2201_v0  ;;  %2275 = vmatprep.subr.mxu1 %v2203_v54  ;;  %v2147_v0 = vld [vmem:[%s8432_s3 + $0x38] sm:$0xff]  ;;  %v2144_v54 = vld [vmem:[%s8432_s3 + $0x20] sm:$0xff] }
 0x5f3   :  { %v1772_v30 = vpop.f32.mrf.mxu0  ;;  %v1843_v37 = vpop.f32.mrf.mxu1 }
 0x5f4   :  { %v1848_v32 = vadd.f32 %v1772_v30, %v8835_v31  ;;  %v1850_v44 = vadd.f32 %v1843_v37, %v8838_v43  ;;  %v2178_v30 = vld [vmem:[%s8432_s3 + $0x130] sm:$0xff]  ;;  %v2173_v31 = vld [vmem:[%s8432_s3 + $0x108] sm:$0xff]  ;;  %v2168_v37 = vld [vmem:[%s8432_s3 + $0xe0] sm:$0xff] }
 0x5f5   :  { %v1774_v33 = vpop.f32.mrf.mxu0  ;;  %v1845_v40 = vpop.f32.mrf.mxu1  ;;  %v2166_v43 = vld [vmem:[%s8432_s3 + $0xd0] sm:$0xff] }
 0x5f6   :  { %v4337_v34 = vmul.f32 -1.442695, %v1848_v32  ;;  %v1849_v36 = vadd.f32 %v1774_v33, %v8836_v35  ;;  %v1851_v42 = vadd.f32 %v1845_v40, %v8837_v41  ;;  %v2175_v32 = vld [vmem:[%s8432_s3 + $0x118] sm:$0xff]  ;;  %v2172_v33 = vld [vmem:[%s8432_s3 + $0x100] sm:$0xff]  ;;  %v2169_v35 = vld [vmem:[%s8432_s3 + $0xe8] sm:$0xff] }
 0x5f7   :  { %v2165_v40 = vld [vmem:[%s8432_s3 + $0xc8] sm:$0xff]  ;;  %v2167_v41 = vld [vmem:[%s8432_s3 + $0xd8] sm:$0xff] }
 0x5f8   :  { %4643 = vpow2.f32 %v4337_v34  ;;  %v4338_v39 = vmul.f32 -1.442695, %v1849_v36  ;;  %v4339_v45 = vmul.f32 -1.442695, %v1851_v42  ;;  %v2174_v34 = vld [vmem:[%s8432_s3 + $0x110] sm:$0xff]  ;;  %v2171_v36 = vld [vmem:[%s8432_s3 + $0xf8] sm:$0xff] }
 0x5f9   :  { %v2164_v42 = vld [vmem:[%s8432_s3 + $0xc0] sm:$0xff] }
 0x5fa   :  { %4645 = vpow2.f32 %v4338_v39  ;;  %v2170_v39 = vld [vmem:[%s8432_s3 + $0xf0] sm:$0xff] }
 0x5fb   :  { %4647 = vtanh.f32 %v1850_v44  ;;  %v2161_v44 = vld [vmem:[%s8432_s3 + $0xa8] sm:$0xff] }
 0x5fc   :  { %4649 = vpow2.f32 %v4339_v45  ;;  %v2163_v45 = vld [vmem:[%s8432_s3 + $0xb8] sm:$0xff] }
 0x605   :  { %v4644_v46 = vpop.eup %4643 }
 0x606   :  { %v1855_v48 = vadd.f32 1.0, %v4644_v46  ;;  %v2160_v46 = vld [vmem:[%s8432_s3 + $0xa0] sm:$0xff] }
 0x607   :  { %v4646_v49 = vpop.eup %4645 }
 0x608   :  { %4651 = vrcp.f32 %v1855_v48  ;;  %v1861_v50 = vadd.f32 1.0, %v4646_v49  ;;  %v4648_v61 = vpop.eup %4647  ;;  %v2162_v48 = vld [vmem:[%s8432_s3 + $0xb0] sm:$0xff]  ;;  %v2157_v49 = vld [vmem:[%s8432_s3 + $0x88] sm:$0xff] }
 0x609   :  { %v4650_v53 = vpop.eup %4649 }
 0x60a   :  { %4653 = vrcp.f32 %v1861_v50  ;;  %v1868_v63 = vadd.f32 1.0, %v4650_v53  ;;  %v2159_v50 = vld [vmem:[%s8432_s3 + $0x98] sm:$0xff]  ;;  %v2158_v53 = vld [vmem:[%s8432_s3 + $0x90] sm:$0xff] }
 0x60c   :  { %4655 = vrcp.f32 %v1868_v63  ;;  %v2154_v63 = vld [vmem:[%s8432_s3 + $0x70] sm:$0xff] }
 0x615   :  { %v4652_v52 = vpop.eup %4651 }
 0x616   :  { %v1872_v62 = vmul.f32 %v4652_v52, %v4648_v61  ;;  %v2156_v61 = vld [vmem:[%s8432_s3 + $0x80] sm:$0xff]  ;;  %v2153_v52 = vld [vmem:[%s8432_s3 + $0x68] sm:$0xff] }
 0x617   :  { %v4654_v58 = vpop.eup %4653 }
 0x618   :  { %v1871_v29 = vmul.f32 %v4654_v58, %v6414_v56  ;;  %v2152_v58 = vld [vmem:[%s8432_s3 + $0x60] sm:$0xff] }
 0x619   :  { %v4656_v6 = vpop.eup %4655 }
 0x61a   :  { %v1873_v27 = vadd.f32 %v1872_v62, %v1871_v29  ;;  %v2155_v62 = vld [vmem:[%s8432_s3 + $0x78] sm:$0xff]  ;;  %v2149_v29 = vld [vmem:[%s8432_s3 + $0x48] sm:$0xff] }
 0x61c   :  { %4657 = vtanh.f32 %v1873_v27  ;;  %v6498_v3 = vsel %vm1881_vm13, %v1873_v27, %v6414_v56  ;;  %v2199_v56 = vld [vmem:[%s8432_s3 + $0x1d8] sm:$0xff] }
 0x61d   :  { %v2151_v27 = vld [vmem:[%s8432_s3 + $0x58] sm:$0xff] }
 0x629   :  { %v4658_v5 = vpop.eup %4657 }
 0x62a   :  { %v1875_v51 = vmul.f32 %v4658_v5, %v4656_v6  ;;  %v2148_v6 = vld [vmem:[%s8432_s3 + $0x40] sm:$0xff]  ;;  %v2150_v5 = vld [vmem:[%s8432_s3 + $0x50] sm:$0xff] }
 0x62c   :  { %v6503_v11 = vsel %vm1881_vm13, %v1875_v51, %v6419_v59  ;;  %v2145_v51 = vld [vmem:[%s8432_s3 + $0x28] sm:$0xff] }
 0x62d   :  { %2020 = vmatmul.mubr.f32.vlgmr.msra.gmra.mxu0 %v6503_v11  ;;  %2091 = vmatmul.mubr.f32.vlgmr.msra.gmra.mxu1 %v6503_v11 }
 0x62e   :  { %2268 = vmatprep.mubr.f32.mxu0 %v8833_v26  ;;  %2339 = vmatprep.mubr.f32.mxu1 %v8833_v26 }
 0x62f   :  { %2205 = vmatpush1.msra.mxu0 %v2200_v47  ;;  %2276 = vmatpush1.msra.mxu1 %v2202_v60  ;;  %v2146_v47 = vld [vmem:[%s8432_s3 + $0x30] sm:$0xff]  ;;  %v2141_v60 = vld [vmem:[%s8432_s3 + $0x8] sm:$0xff] }
 0x630   :  { %2206 = vmatprep.subr.mxu0 %v2197_v1  ;;  %2277 = vmatprep.subr.mxu1 %v2199_v56  ;;  %v2143_v1 = vld [vmem:[%s8432_s3 + $0x18] sm:$0xff]  ;;  %v2140_v56 = vld [vmem:[%s8432_s3] sm:$0xff] }
 0x631   :  { %2207 = vmatpush1.msra.mxu0 %v2196_v57  ;;  %2278 = vmatpush1.msra.mxu1 %v2198_v55  ;;  %v2142_v57 = vld [vmem:[%s8432_s3 + $0x10] sm:$0xff]  ;;  %v4407_v55 = vld [vmem:[%s8430_s2 + $0x3e8] sm:$0xff] }
 0x632   :  { %2208 = vmatprep.subr.mxu0 %v2193_v2  ;;  %2279 = vmatprep.subr.mxu1 %v2195_v7  ;;  %v4409_v2 = vld [vmem:[%s8430_s2 + $0x3f8] sm:$0xff] }
 0x633   :  { %2209 = vmatpush1.msra.mxu0 %v2192_v8  ;;  %2280 = vmatpush1.msra.mxu1 %v2194_v9  ;;  %v8840_v8 = vld [vmem:[#allocation49_spill] sm:$0xff] }
 0x634   :  { %2210 = vmatprep.subr.mxu0 %v2189_v10  ;;  %2281 = vmatprep.subr.mxu1 %v2191_v12 }
 0x635   :  { %2211 = vmatpush1.msra.mxu0 %v2188_v13  ;;  %2282 = vmatpush1.msra.mxu1 %v2190_v14  ;;  %v8841_v13 = vld [vmem:[#allocation51_spill] sm:$0xff] }
 0x636   :  { %2212 = vmatprep.subr.mxu0 %v2185_v15  ;;  %2283 = vmatprep.subr.mxu1 %v2187_v16 }
 0x637   :  { %2213 = vmatpush1.msra.mxu0 %v2184_v17  ;;  %2284 = vmatpush1.msra.mxu1 %v2186_v18  ;;  %v8842_v18 = vld [vmem:[#allocation52_spill] sm:$0xff] }
 0x638   :  { %2214 = vmatprep.subr.mxu0 %v2181_v19  ;;  %2285 = vmatprep.subr.mxu1 %v2183_v21  ;;  %v8843_v21 = vld [vmem:[#allocation50_spill] sm:$0xff] }
 0x639   :  { %2215 = vmatpush1.msra.mxu0 %v2180_v22  ;;  %2286 = vmatpush1.msra.mxu1 %v2182_v23 }
 0x63a   :  { %2216 = vmatprep.subr.mxu0 %v2177_v24  ;;  %2287 = vmatprep.subr.mxu1 %v2179_v25 }
 0x63b   :  { %2217 = vmatpush1.msra.mxu0 %v2176_v28  ;;  %2288 = vmatpush1.msra.mxu1 %v2178_v30 }
 0x63c   :  { %2218 = vmatprep.subr.mxu0 %v2173_v31  ;;  %2289 = vmatprep.subr.mxu1 %v2175_v32 }
 0x63d   :  { %2219 = vmatpush1.msra.mxu0 %v2172_v33  ;;  %2290 = vmatpush1.msra.mxu1 %v2174_v34 }
 0x63e   :  { %2220 = vmatprep.subr.mxu0 %v2169_v35  ;;  %2291 = vmatprep.subr.mxu1 %v2171_v36 }
 0x63f   :  { %2221 = vmatpush1.msra.mxu0 %v2168_v37  ;;  %2292 = vmatpush1.msra.mxu1 %v2170_v39  ;;  %v6711_v37 = vpop.permute.xlu0 %2128 }
 0x640   :  { %2222 = vmatprep.subr.mxu0 %v2165_v40  ;;  %2293 = vmatprep.subr.mxu1 %v2167_v41  ;;  %8844 = vst [vmem:[#allocation36_spill] sm:$0xff] %v6711_v37  ;;  %vm2130_vm14 = vcmp.eq.s32.totalorder %v6711_v37, 1  ;;  %v7291_v37 = vld [vmem:[%s8432_s3 + $0x238] sm:$0xff] }
 0x641   :  { %2223 = vmatpush1.msra.mxu0 %v2164_v42  ;;  %2294 = vmatpush1.msra.mxu1 %v2166_v43  ;;  %8867 = vst [vmem:[#allocation18_spill] sm:$0xff] %v7291_v37 }
 0x642   :  { %2224 = vmatprep.subr.mxu0 %v2161_v44  ;;  %2295 = vmatprep.subr.mxu1 %v2163_v45  ;;  %v4406_v45 = vld [vmem:[%s8430_s2 + $0x3e0] sm:$0xff] }
 0x643   :  { %2225 = vmatpush1.msra.mxu0 %v2160_v46  ;;  %2296 = vmatpush1.msra.mxu1 %v2162_v48  ;;  %v4408_v46 = vld [vmem:[%s8430_s2 + $0x3f0] sm:$0xff] }
 0x644   :  { %2226 = vmatprep.subr.mxu0 %v2157_v49  ;;  %2297 = vmatprep.subr.mxu1 %v2159_v50  ;;  %v4405_v49 = vld [vmem:[%s8430_s2 + $0x3d8] sm:$0xff]  ;;  %v4402_v50 = vld [vmem:[%s8430_s2 + $0x3c0] sm:$0xff] }
 0x645   :  { %2227 = vmatpush1.msra.mxu0 %v2156_v61  ;;  %2298 = vmatpush1.msra.mxu1 %v2158_v53  ;;  %v4404_v61 = vld [vmem:[%s8430_s2 + $0x3d0] sm:$0xff]  ;;  %v4399_v53 = vld [vmem:[%s8430_s2 + $0x3a8] sm:$0xff] }
 0x646   :  { %2228 = vmatprep.subr.mxu0 %v2153_v52  ;;  %2299 = vmatprep.subr.mxu1 %v2155_v62  ;;  %v4401_v52 = vld [vmem:[%s8430_s2 + $0x3b8] sm:$0xff]  ;;  %v4398_v62 = vld [vmem:[%s8430_s2 + $0x3a0] sm:$0xff] }
 0x647   :  { %2229 = vmatpush1.msra.mxu0 %v2152_v58  ;;  %2300 = vmatpush1.msra.mxu1 %v2154_v63  ;;  %v4400_v58 = vld [vmem:[%s8430_s2 + $0x3b0] sm:$0xff]  ;;  %v4395_v63 = vld [vmem:[%s8430_s2 + $0x388] sm:$0xff] }
 0x648   :  { %2230 = vmatprep.subr.mxu0 %v2149_v29  ;;  %2301 = vmatprep.subr.mxu1 %v2151_v27  ;;  %v4397_v29 = vld [vmem:[%s8430_s2 + $0x398] sm:$0xff]  ;;  %v4394_v27 = vld [vmem:[%s8430_s2 + $0x380] sm:$0xff] }
 0x649   :  { %2231 = vmatpush1.msra.mxu0 %v2148_v6  ;;  %2302 = vmatpush1.msra.mxu1 %v2150_v5  ;;  %v4396_v6 = vld [vmem:[%s8430_s2 + $0x390] sm:$0xff]  ;;  %v4391_v5 = vld [vmem:[%s8430_s2 + $0x368] sm:$0xff] }
 0x64a   :  { %2232 = vmatprep.subr.mxu0 %v2145_v51  ;;  %2303 = vmatprep.subr.mxu1 %v2147_v0  ;;  %v4393_v51 = vld [vmem:[%s8430_s2 + $0x378] sm:$0xff]  ;;  %v4390_v0 = vld [vmem:[%s8430_s2 + $0x360] sm:$0xff] }
 0x64b   :  { %2233 = vmatpush1.msra.mxu0 %v2144_v54  ;;  %2304 = vmatpush1.msra.mxu1 %v2146_v47  ;;  %v4392_v54 = vld [vmem:[%s8430_s2 + $0x370] sm:$0xff]  ;;  %v4387_v47 = vld [vmem:[%s8430_s2 + $0x348] sm:$0xff] }
 0x64c   :  { %2234 = vmatprep.subr.mxu0 %v2141_v60  ;;  %2305 = vmatprep.subr.mxu1 %v2143_v1  ;;  %v4389_v60 = vld [vmem:[%s8430_s2 + $0x358] sm:$0xff]  ;;  %v4386_v1 = vld [vmem:[%s8430_s2 + $0x340] sm:$0xff] }
 0x64d   :  { %2235 = vmatpush1.msra.mxu0 %v2140_v56  ;;  %2306 = vmatpush1.msra.mxu1 %v2142_v57  ;;  %v4388_v56 = vld [vmem:[%s8430_s2 + $0x350] sm:$0xff]  ;;  %v4383_v57 = vld [vmem:[%s8430_s2 + $0x328] sm:$0xff] }
 0x64e   :  { %2482 = vmatprep.subr.mxu0 %v4407_v55  ;;  %2595 = vmatprep.subr.mxu1 %v4409_v2  ;;  %v4385_v55 = vld [vmem:[%s8430_s2 + $0x338] sm:$0xff]  ;;  %v4382_v2 = vld [vmem:[%s8430_s2 + $0x320] sm:$0xff] }
 0x6ed   :  { %v2021_v7 = vpop.f32.mrf.mxu0  ;;  %v2092_v15 = vpop.f32.mrf.mxu1 }
 0x6ee   :  { %v2097_v9 = vadd.f32 %v2021_v7, %v8840_v8  ;;  %v2099_v22 = vadd.f32 %v2092_v15, %v8843_v21  ;;  %v4384_v7 = vld [vmem:[%s8430_s2 + $0x330] sm:$0xff]  ;;  %v4379_v8 = vld [vmem:[%s8430_s2 + $0x308] sm:$0xff]  ;;  %v4374_v15 = vld [vmem:[%s8430_s2 + $0x2e0] sm:$0xff] }
 0x6ef   :  { %v2023_v10 = vpop.f32.mrf.mxu0  ;;  %v2094_v17 = vpop.f32.mrf.mxu1  ;;  %v4372_v21 = vld [vmem:[%s8430_s2 + $0x2d0] sm:$0xff] }
 0x6f0   :  { %v4340_v12 = vmul.f32 -1.442695, %v2097_v9  ;;  %v2098_v14 = vadd.f32 %v2023_v10, %v8841_v13  ;;  %v2100_v19 = vadd.f32 %v2094_v17, %v8842_v18  ;;  %v4381_v9 = vld [vmem:[%s8430_s2 + $0x318] sm:$0xff]  ;;  %v4378_v10 = vld [vmem:[%s8430_s2 + $0x300] sm:$0xff]  ;;  %v4375_v13 = vld [vmem:[%s8430_s2 + $0x2e8] sm:$0xff] }
 0x6f1   :  { %v4371_v17 = vld [vmem:[%s8430_s2 + $0x2c8] sm:$0xff]  ;;  %v4373_v18 = vld [vmem:[%s8430_s2 + $0x2d8] sm:$0xff] }
 0x6f2   :  { %4659 = vpow2.f32 %v4340_v12  ;;  %v4341_v16 = vmul.f32 -1.442695, %v2098_v14  ;;  %v4342_v23 = vmul.f32 -1.442695, %v2100_v19  ;;  %v4380_v12 = vld [vmem:[%s8430_s2 + $0x310] sm:$0xff]  ;;  %v4377_v14 = vld [vmem:[%s8430_s2 + $0x2f8] sm:$0xff] }
 0x6f3   :  { %v4370_v19 = vld [vmem:[%s8430_s2 + $0x2c0] sm:$0xff] }
 0x6f4   :  { %4661 = vpow2.f32 %v4341_v16  ;;  %v4376_v16 = vld [vmem:[%s8430_s2 + $0x2f0] sm:$0xff] }
 0x6f5   :  { %4663 = vtanh.f32 %v2099_v22  ;;  %v4367_v22 = vld [vmem:[%s8430_s2 + $0x2a8] sm:$0xff] }
 0x6f6   :  { %4665 = vpow2.f32 %v4342_v23  ;;  %v4369_v23 = vld [vmem:[%s8430_s2 + $0x2b8] sm:$0xff] }
 0x6ff   :  { %v4660_v24 = vpop.eup %4659 }
 0x700   :  { %v2104_v25 = vadd.f32 1.0, %v4660_v24  ;;  %v4366_v24 = vld [vmem:[%s8430_s2 + $0x2a0] sm:$0xff] }
 0x701   :  { %v4662_v28 = vpop.eup %4661 }
 0x702   :  { %4667 = vrcp.f32 %v2104_v25  ;;  %v2110_v30 = vadd.f32 1.0, %v4662_v28  ;;  %v4664_v31 = vpop.eup %4663  ;;  %v4368_v25 = vld [vmem:[%s8430_s2 + $0x2b0] sm:$0xff]  ;;  %v4363_v28 = vld [vmem:[%s8430_s2 + $0x288] sm:$0xff] }
 0x703   :  { %v4666_v32 = vpop.eup %4665 }
 0x704   :  { %4669 = vrcp.f32 %v2110_v30  ;;  %v2117_v36 = vadd.f32 1.0, %v4666_v32  ;;  %v4365_v30 = vld [vmem:[%s8430_s2 + $0x298] sm:$0xff]  ;;  %v4364_v32 = vld [vmem:[%s8430_s2 + $0x290] sm:$0xff] }
 0x706   :  { %4671 = vrcp.f32 %v2117_v36  ;;  %v4360_v36 = vld [vmem:[%s8430_s2 + $0x270] sm:$0xff] }
 0x70f   :  { %v4668_v33 = vpop.eup %4667 }
 0x710   :  { %v2121_v34 = vmul.f32 %v4668_v33, %v4664_v31  ;;  %v4362_v31 = vld [vmem:[%s8430_s2 + $0x280] sm:$0xff]  ;;  %v4359_v33 = vld [vmem:[%s8430_s2 + $0x268] sm:$0xff] }
 0x711   :  { %v4670_v35 = vpop.eup %4669 }
 0x712   :  { %v2120_v39 = vmul.f32 %v4670_v35, %v6498_v3  ;;  %v4358_v35 = vld [vmem:[%s8430_s2 + $0x260] sm:$0xff] }
 0x713   :  { %v4672_v42 = vpop.eup %4671 }
 0x714   :  { %v2122_v40 = vadd.f32 %v2121_v34, %v2120_v39  ;;  %v4361_v34 = vld [vmem:[%s8430_s2 + $0x278] sm:$0xff]  ;;  %v4355_v39 = vld [vmem:[%s8430_s2 + $0x248] sm:$0xff] }
 0x716   :  { %4673 = vtanh.f32 %v2122_v40  ;;  %v6718_v41 = vsel %vm2130_vm14, %v2122_v40, %v6498_v3  ;;  %v4403_v3 = vld [vmem:[%s8430_s2 + $0x3c8] sm:$0xff]  ;;  %v4357_v40 = vld [vmem:[%s8430_s2 + $0x258] sm:$0xff] }
 0x723   :  { %v4674_v43 = vpop.eup %4673 }
 0x724   :  { %v2124_v44 = vmul.f32 %v4674_v43, %v4672_v42  ;;  %v4354_v42 = vld [vmem:[%s8430_s2 + $0x240] sm:$0xff]  ;;  %v4356_v43 = vld [vmem:[%s8430_s2 + $0x250] sm:$0xff] }
 0x726   :  { %v6729_v48 = vsel %vm2130_vm14, %v2124_v44, %v6503_v11  ;;  %v4351_v44 = vld [vmem:[%s8430_s2 + $0x228] sm:$0xff] }
 0x727   :  { %2269 = vmatmul.mubr.f32.vlgmr.msra.gmra.mxu0 %v6729_v48  ;;  %2340 = vmatmul.mubr.f32.vlgmr.msra.gmra.mxu1 %v6729_v48 }
 0x728   :  { %2483 = vmatpush1.msra.mxu0 %v4406_v45  ;;  %2596 = vmatpush1.msra.mxu1 %v4408_v46  ;;  %v4353_v45 = vld [vmem:[%s8430_s2 + $0x238] sm:$0xff]  ;;  %v4350_v46 = vld [vmem:[%s8430_s2 + $0x220] sm:$0xff] }
 0x729   :  { %2484 = vmatprep.subr.mxu0 %v4403_v3  ;;  %2597 = vmatprep.subr.mxu1 %v4405_v49  ;;  %v4352_v3 = vld [vmem:[%s8430_s2 + $0x230] sm:$0xff]  ;;  %v4347_v49 = vld [vmem:[%s8430_s2 + $0x208] sm:$0xff] }
 0x72a   :  { %2485 = vmatpush1.msra.mxu0 %v4402_v50  ;;  %2598 = vmatpush1.msra.mxu1 %v4404_v61  ;;  %v4349_v50 = vld [vmem:[%s8430_s2 + $0x218] sm:$0xff]  ;;  %v4346_v61 = vld [vmem:[%s8430_s2 + $0x200] sm:$0xff] }
 0x72b   :  { %2486 = vmatprep.subr.mxu0 %v4399_v53  ;;  %2599 = vmatprep.subr.mxu1 %v4401_v52  ;;  %v4348_v53 = vld [vmem:[%s8430_s2 + $0x210] sm:$0xff]  ;;  %v8845_v52 = vld [vmem:[#allocation58_spill] sm:$0xff] }
 0x72c   :  { %2487 = vmatpush1.msra.mxu0 %v4398_v62  ;;  %2600 = vmatpush1.msra.mxu1 %v4400_v58  ;;  %v8847_v58 = vld [vmem:[#allocation8_spill] sm:$0xff] }
 0x72d   :  { %2488 = vmatprep.subr.mxu0 %v4395_v63  ;;  %2601 = vmatprep.subr.mxu1 %v4397_v29  ;;  %v8848_v63 = vld [vmem:[#allocation32_spill] sm:$0xff] }
 0x72e   :  { %2489 = vmatpush1.msra.mxu0 %v4394_v27  ;;  %2602 = vmatpush1.msra.mxu1 %v4396_v6  ;;  %v6967_v29 = vld [vmem:[%s8432_s3 + $0x3f0] sm:$0xff]  ;;  %v6974_v27 = vld [vmem:[%s8432_s3 + $0x3c8] sm:$0xff]  ;;  %v6979_v6 = vld [vmem:[%s8432_s3 + $0x3d8] sm:$0xff] }
 0x72f   :  { %2490 = vmatprep.subr.mxu0 %v4391_v5  ;;  %2603 = vmatprep.subr.mxu1 %v4393_v51  ;;  %v6986_v5 = vld [vmem:[%s8432_s3 + $0x3c0] sm:$0xff]  ;;  %v6991_v51 = vld [vmem:[%s8432_s3 + $0x3d0] sm:$0xff]  ;;  %v7308_v62 = vld [vmem:[%s8432_s3 + $0x208] sm:$0xff] }
 0x730   :  { %2491 = vmatpush1.msra.mxu0 %v4390_v0  ;;  %2604 = vmatpush1.msra.mxu1 %v4392_v54  ;;  %v6998_v0 = vld [vmem:[%s8432_s3 + $0x3a8] sm:$0xff]  ;;  %v7003_v54 = vld [vmem:[%s8432_s3 + $0x3b8] sm:$0xff]  ;;  %8870 = vst [vmem:[#allocation21_spill] sm:$0xff] %v7308_v62 }
 0x731   :  { %2492 = vmatprep.subr.mxu0 %v4387_v47  ;;  %2605 = vmatprep.subr.mxu1 %v4389_v60  ;;  %v7010_v47 = vld [vmem:[%s8432_s3 + $0x3a0] sm:$0xff]  ;;  %v7015_v60 = vld [vmem:[%s8432_s3 + $0x3b0] sm:$0xff] }
 0x732   :  { %2493 = vmatpush1.msra.mxu0 %v4386_v1  ;;  %2606 = vmatpush1.msra.mxu1 %v4388_v56  ;;  %v7022_v1 = vld [vmem:[%s8432_s3 + $0x388] sm:$0xff]  ;;  %v7027_v56 = vld [vmem:[%s8432_s3 + $0x398] sm:$0xff] }
 0x733   :  { %2494 = vmatprep.subr.mxu0 %v4383_v57  ;;  %2607 = vmatprep.subr.mxu1 %v4385_v55  ;;  %v7034_v57 = vld [vmem:[%s8432_s3 + $0x380] sm:$0xff]  ;;  %v7039_v55 = vld [vmem:[%s8432_s3 + $0x390] sm:$0xff] }
 0x734   :  { %2495 = vmatpush1.msra.mxu0 %v4382_v2  ;;  %2608 = vmatpush1.msra.mxu1 %v4384_v7  ;;  %v7046_v2 = vld [vmem:[%s8432_s3 + $0x368] sm:$0xff]  ;;  %v7051_v7 = vld [vmem:[%s8432_s3 + $0x378] sm:$0xff] }
 0x735   :  { %2496 = vmatprep.subr.mxu0 %v4379_v8  ;;  %2609 = vmatprep.subr.mxu1 %v4381_v9  ;;  %v7058_v8 = vld [vmem:[%s8432_s3 + $0x360] sm:$0xff]  ;;  %v7063_v9 = vld [vmem:[%s8432_s3 + $0x370] sm:$0xff] }
 0x736   :  { %2497 = vmatpush1.msra.mxu0 %v4378_v10  ;;  %2610 = vmatpush1.msra.mxu1 %v4380_v12  ;;  %v7070_v10 = vld [vmem:[%s8432_s3 + $0x348] sm:$0xff]  ;;  %v7075_v12 = vld [vmem:[%s8432_s3 + $0x358] sm:$0xff] }
 0x737   :  { %2498 = vmatprep.subr.mxu0 %v4375_v13  ;;  %2611 = vmatprep.subr.mxu1 %v4377_v14  ;;  %v7082_v13 = vld [vmem:[%s8432_s3 + $0x340] sm:$0xff]  ;;  %v7087_v14 = vld [vmem:[%s8432_s3 + $0x350] sm:$0xff] }
 0x738   :  { %2499 = vmatpush1.msra.mxu0 %v4374_v15  ;;  %2612 = vmatpush1.msra.mxu1 %v4376_v16  ;;  %v7094_v15 = vld [vmem:[%s8432_s3 + $0x328] sm:$0xff]  ;;  %v7099_v16 = vld [vmem:[%s8432_s3 + $0x338] sm:$0xff] }
 0x739   :  { %2500 = vmatprep.subr.mxu0 %v4371_v17  ;;  %2613 = vmatprep.subr.mxu1 %v4373_v18  ;;  %v7106_v17 = vld [vmem:[%s8432_s3 + $0x320] sm:$0xff]  ;;  %v7111_v18 = vld [vmem:[%s8432_s3 + $0x330] sm:$0xff] }
 0x73a   :  { %2501 = vmatpush1.msra.mxu0 %v4370_v19  ;;  %2614 = vmatpush1.msra.mxu1 %v4372_v21  ;;  %v7118_v19 = vld [vmem:[%s8432_s3 + $0x308] sm:$0xff]  ;;  %v7123_v21 = vld [vmem:[%s8432_s3 + $0x318] sm:$0xff] }
 0x73b   :  { %2502 = vmatprep.subr.mxu0 %v4367_v22  ;;  %2615 = vmatprep.subr.mxu1 %v4369_v23  ;;  %v7130_v22 = vld [vmem:[%s8432_s3 + $0x300] sm:$0xff]  ;;  %v7135_v23 = vld [vmem:[%s8432_s3 + $0x310] sm:$0xff] }
 0x73c   :  { %2503 = vmatpush1.msra.mxu0 %v4366_v24  ;;  %2616 = vmatpush1.msra.mxu1 %v4368_v25  ;;  %v7142_v24 = vld [vmem:[%s8432_s3 + $0x2e8] sm:$0xff]  ;;  %v7147_v25 = vld [vmem:[%s8432_s3 + $0x2f8] sm:$0xff] }
 0x73d   :  { %2504 = vmatprep.subr.mxu0 %v4363_v28  ;;  %2617 = vmatprep.subr.mxu1 %v4365_v30  ;;  %v7154_v28 = vld [vmem:[%s8432_s3 + $0x2e0] sm:$0xff]  ;;  %v7159_v30 = vld [vmem:[%s8432_s3 + $0x2f0] sm:$0xff] }
 0x73e   :  { %2505 = vmatpush1.msra.mxu0 %v4362_v31  ;;  %2618 = vmatpush1.msra.mxu1 %v4364_v32  ;;  %v7166_v31 = vld [vmem:[%s8432_s3 + $0x2c8] sm:$0xff]  ;;  %v7171_v32 = vld [vmem:[%s8432_s3 + $0x2d8] sm:$0xff] }
 0x73f   :  { %2506 = vmatprep.subr.mxu0 %v4359_v33  ;;  %2619 = vmatprep.subr.mxu1 %v4361_v34  ;;  %v7178_v33 = vld [vmem:[%s8432_s3 + $0x2c0] sm:$0xff]  ;;  %v7183_v34 = vld [vmem:[%s8432_s3 + $0x2d0] sm:$0xff] }
 0x740   :  { %2507 = vmatpush1.msra.mxu0 %v4358_v35  ;;  %2620 = vmatpush1.msra.mxu1 %v4360_v36  ;;  %v7190_v35 = vld [vmem:[%s8432_s3 + $0x2a8] sm:$0xff]  ;;  %v7195_v36 = vld [vmem:[%s8432_s3 + $0x2b8] sm:$0xff] }
 0x741   :  { %2508 = vmatprep.subr.mxu0 %v4355_v39  ;;  %2621 = vmatprep.subr.mxu1 %v4357_v40  ;;  %8851 = vst [vmem:[#allocation39_spill] sm:$0xff] %v7195_v36  ;;  %v7202_v39 = vld [vmem:[%s8432_s3 + $0x2a0] sm:$0xff]  ;;  %v7207_v40 = vld [vmem:[%s8432_s3 + $0x2b0] sm:$0xff] }
 0x742   :  { %2509 = vmatpush1.msra.mxu0 %v4354_v42  ;;  %2622 = vmatpush1.msra.mxu1 %v4356_v43  ;;  %8852 = vst [vmem:[#allocation40_spill] sm:$0xff] %v7202_v39  ;;  %8853 = vst [vmem:[#allocation38_spill] sm:$0xff] %v7207_v40  ;;  %v7214_v42 = vld [vmem:[%s8432_s3 + $0x288] sm:$0xff]  ;;  %v7219_v43 = vld [vmem:[%s8432_s3 + $0x298] sm:$0xff] }
 0x743   :  { %2510 = vmatprep.subr.mxu0 %v4351_v44  ;;  %2623 = vmatprep.subr.mxu1 %v4353_v45  ;;  %8854 = vst [vmem:[#allocation9_spill] sm:$0xff] %v7214_v42  ;;  %8855 = vst [vmem:[#allocation10_spill] sm:$0xff] %v7219_v43  ;;  %v7226_v44 = vld [vmem:[%s8432_s3 + $0x280] sm:$0xff]  ;;  %v7231_v45 = vld [vmem:[%s8432_s3 + $0x290] sm:$0xff] }
 0x744   :  { %2511 = vmatpush1.msra.mxu0 %v4350_v46  ;;  %2624 = vmatpush1.msra.mxu1 %v4352_v3  ;;  %8856 = vst [vmem:[#allocation41_spill] sm:$0xff] %v7226_v44  ;;  %8857 = vst [vmem:[#allocation43_spill] sm:$0xff] %v7231_v45  ;;  %v7238_v46 = vld [vmem:[%s8432_s3 + $0x268] sm:$0xff]  ;;  %v7243_v3 = vld [vmem:[%s8432_s3 + $0x278] sm:$0xff] }
 0x745   :  { %2512 = vmatprep.subr.mxu0 %v4347_v49  ;;  %2625 = vmatprep.subr.mxu1 %v4349_v50  ;;  %8858 = vst [vmem:[#allocation44_spill] sm:$0xff] %v7238_v46  ;;  %8859 = vst [vmem:[#allocation42_spill] sm:$0xff] %v7243_v3  ;;  %v7250_v49 = vld [vmem:[%s8432_s3 + $0x260] sm:$0xff]  ;;  %v7255_v50 = vld [vmem:[%s8432_s3 + $0x270] sm:$0xff] }
 0x746   :  { %2513 = vmatpush1.msra.mxu0 %v4346_v61  ;;  %2546 = vmatprep.mubr.f32.mxu0 %v8833_v26  ;;  %8860 = vst [vmem:[#allocation11_spill] sm:$0xff] %v7250_v49  ;;  %8861 = vst [vmem:[#allocation12_spill] sm:$0xff] %v7255_v50  ;;  %v7262_v61 = vld [vmem:[%s8432_s3 + $0x248] sm:$0xff] }
 0x747   :  { %2626 = vmatpush1.msra.mxu1 %v4348_v53  ;;  %2659 = vmatprep.mubr.f32.mxu1 %v8833_v26  ;;  %8862 = vst [vmem:[#allocation13_spill] sm:$0xff] %v7262_v61  ;;  %v7267_v53 = vld [vmem:[%s8432_s3 + $0x258] sm:$0xff] }
 0x748   :  { %4502 = vmatmul.mubr.msk.f32.vlgmr.msra.gmra.mxu0 %vm637_vm4, %v8845_v52  ;;  %4503 = vmatmul.mubr.msk.f32.vlgmr.msra.gmra.mxu1 %vm637_vm4, %v8845_v52  ;;  %8863 = vst [vmem:[#allocation14_spill] sm:$0xff] %v7267_v53  ;;  %v7274_v52 = vld [vmem:[%s8432_s3 + $0x240] sm:$0xff] }
 0x749   :  { %2552 = vmatprep.mubr.f32.mxu0 %v8833_v26  ;;  %2665 = vmatprep.mubr.f32.mxu1 %v8833_v26  ;;  %8864 = vst [vmem:[#allocation15_spill] sm:$0xff] %v7274_v52 }
 0x74c   :  { %2553 = vmatmul.mubr.f32.gmra.mxu0 %v8847_v58  ;;  %2666 = vmatmul.mubr.f32.gmra.mxu1 %v8847_v58  ;;  %v7279_v58 = vld [vmem:[%s8432_s3 + $0x250] sm:$0xff] }
 0x74d   :  { %2558 = vmatprep.mubr.f32.mxu0 %v8833_v26  ;;  %2671 = vmatprep.mubr.f32.mxu1 %v8833_v26  ;;  %8865 = vst [vmem:[#allocation16_spill] sm:$0xff] %v7279_v58 }
 0x750   :  { %2559 = vmatmul.mubr.f32.gmra.mxu0 %v8848_v63  ;;  %2672 = vmatmul.mubr.f32.gmra.mxu1 %v8848_v63  ;;  %v7286_v63 = vld [vmem:[%s8432_s3 + $0x228] sm:$0xff] }
 0x751   :  { %2564 = vmatprep.mubr.f32.mxu0 %v8833_v26  ;;  %2677 = vmatprep.mubr.f32.mxu1 %v8833_v26  ;;  %8866 = vst [vmem:[#allocation17_spill] sm:$0xff] %v7286_v63 }
 0x754   :  { %2565 = vmatmul.mubr.f32.gmra.mxu0 %v6333_v4  ;;  %2678 = vmatmul.mubr.f32.gmra.mxu1 %v6333_v4  ;;  %v6950_v4 = vld [vmem:[%s8432_s3 + $0x3e8] sm:$0xff] }
 0x755   :  { %2570 = vmatprep.mubr.f32.mxu0 %v8833_v26  ;;  %2683 = vmatprep.mubr.f32.mxu1 %v8833_v26  ;;  %8849 = vst [vmem:[#allocation34_spill] sm:$0xff] %v6950_v4 }
 0x756   :  { %2813 = vmatprep.subr.mxu0 %v6950_v4 }
 0x758   :  { %2571 = vmatmul.mubr.f32.gmra.mxu0 %v6419_v59  ;;  %2684 = vmatmul.mubr.f32.gmra.mxu1 %v6419_v59  ;;  %v6955_v59 = vld [vmem:[%s8432_s3 + $0x3f8] sm:$0xff] }
 0x759   :  { %2576 = vmatprep.mubr.f32.mxu0 %v8833_v26  ;;  %2689 = vmatprep.mubr.f32.mxu1 %v8833_v26  ;;  %8850 = vst [vmem:[#allocation37_spill] sm:$0xff] %v6955_v59 }
 0x75a   :  { %2884 = vmatprep.subr.mxu1 %v6955_v59 }
 0x75b   :  { %2885 = vmatpush1.msra.mxu1 %v6967_v29 }
 0x75c   :  { %2577 = vmatmul.mubr.f32.gmra.mxu0 %v6503_v11  ;;  %2690 = vmatmul.mubr.f32.gmra.mxu1 %v6503_v11  ;;  %v6962_v11 = vld [vmem:[%s8432_s3 + $0x3e0] sm:$0xff] }
 0x75d   :  { %2582 = vmatprep.mubr.f32.mxu0 %v8833_v26  ;;  %2695 = vmatprep.mubr.f32.mxu1 %v8833_v26 }
 0x75e   :  { %2814 = vmatpush1.msra.mxu0 %v6962_v11  ;;  %2886 = vmatprep.subr.mxu1 %v6979_v6 }
 0x75f   :  { %2815 = vmatprep.subr.mxu0 %v6974_v27  ;;  %2887 = vmatpush1.msra.mxu1 %v6991_v51 }
 0x760   :  { %2583 = vmatmul.mubr.f32.gmra.mxu0 %v6729_v48  ;;  %2696 = vmatmul.mubr.f32.gmra.mxu1 %v6729_v48 }
 0x761   :  { %2588 = vmatprep.mubr.f32.mxu0 %v8833_v26  ;;  %2701 = vmatprep.mubr.f32.mxu1 %v8833_v26 }
 0x762   :  { %2816 = vmatpush1.msra.mxu0 %v6986_v5  ;;  %2888 = vmatprep.subr.mxu1 %v7003_v54 }
 0x763   :  { %2817 = vmatprep.subr.mxu0 %v6998_v0  ;;  %2889 = vmatpush1.msra.mxu1 %v7015_v60 }
 0x764   :  { %2818 = vmatpush1.msra.mxu0 %v7010_v47  ;;  %2890 = vmatprep.subr.mxu1 %v7027_v56 }
 0x765   :  { %2819 = vmatprep.subr.mxu0 %v7022_v1  ;;  %2891 = vmatpush1.msra.mxu1 %v7039_v55 }
 0x766   :  { %2820 = vmatpush1.msra.mxu0 %v7034_v57  ;;  %2892 = vmatprep.subr.mxu1 %v7051_v7 }
 0x767   :  { %2821 = vmatprep.subr.mxu0 %v7046_v2  ;;  %2893 = vmatpush1.msra.mxu1 %v7063_v9 }
 0x768   :  { %2822 = vmatpush1.msra.mxu0 %v7058_v8  ;;  %2894 = vmatprep.subr.mxu1 %v7075_v12 }
 0x769   :  { %2823 = vmatprep.subr.mxu0 %v7070_v10  ;;  %2895 = vmatpush1.msra.mxu1 %v7087_v14 }
 0x76a   :  { %2824 = vmatpush1.msra.mxu0 %v7082_v13  ;;  %2896 = vmatprep.subr.mxu1 %v7099_v16 }
 0x76b   :  { %2825 = vmatprep.subr.mxu0 %v7094_v15  ;;  %2897 = vmatpush1.msra.mxu1 %v7111_v18 }
 0x76c   :  { %2826 = vmatpush1.msra.mxu0 %v7106_v17  ;;  %2898 = vmatprep.subr.mxu1 %v7123_v21 }
 0x76d   :  { %2827 = vmatprep.subr.mxu0 %v7118_v19  ;;  %2899 = vmatpush1.msra.mxu1 %v7135_v23 }
 0x76e   :  { %2828 = vmatpush1.msra.mxu0 %v7130_v22  ;;  %2900 = vmatprep.subr.mxu1 %v7147_v25 }
 0x76f   :  { %2829 = vmatprep.subr.mxu0 %v7142_v24  ;;  %2901 = vmatpush1.msra.mxu1 %v7159_v30 }
 0x770   :  { %2830 = vmatpush1.msra.mxu0 %v7154_v28  ;;  %2902 = vmatprep.subr.mxu1 %v7171_v32 }
 0x771   :  { %2831 = vmatprep.subr.mxu0 %v7166_v31  ;;  %2903 = vmatpush1.msra.mxu1 %v7183_v34 }
 0x772   :  { %2832 = vmatpush1.msra.mxu0 %v7178_v33  ;;  %2904 = vmatprep.subr.mxu1 %v7195_v36 }
 0x773   :  { %2833 = vmatprep.subr.mxu0 %v7190_v35  ;;  %2905 = vmatpush1.msra.mxu1 %v7207_v40 }
 0x774   :  { %2834 = vmatpush1.msra.mxu0 %v7202_v39  ;;  %2906 = vmatprep.subr.mxu1 %v7219_v43 }
 0x775   :  { %2835 = vmatprep.subr.mxu0 %v7214_v42  ;;  %2907 = vmatpush1.msra.mxu1 %v7231_v45  ;;  %v8877_v45 = vld [vmem:[#allocation54_spill] sm:$0xff] }
 0x776   :  { %2836 = vmatpush1.msra.mxu0 %v7226_v44  ;;  %2908 = vmatprep.subr.mxu1 %v7243_v3 }
 0x777   :  { %2837 = vmatprep.subr.mxu0 %v7238_v46  ;;  %2909 = vmatpush1.msra.mxu1 %v7255_v50  ;;  %v8875_v50 = vld [vmem:[#allocation55_spill] sm:$0xff]  ;;  %v8876_v46 = vld [vmem:[#allocation56_spill] sm:$0xff] }
 0x778   :  { %2838 = vmatpush1.msra.mxu0 %v7250_v49  ;;  %2910 = vmatprep.subr.mxu1 %v7267_v53 }
 0x779   :  { %2839 = vmatprep.subr.mxu0 %v7262_v61  ;;  %2911 = vmatpush1.msra.mxu1 %v7279_v58  ;;  %v7325_v58 = vld [vmem:[%s8432_s3 + $0x210] sm:$0xff] }
 0x77a   :  { %2840 = vmatpush1.msra.mxu0 %v7274_v52  ;;  %2912 = vmatprep.subr.mxu1 %v7291_v37  ;;  %v7315_v37 = vld [vmem:[%s8432_s3 + $0x218] sm:$0xff]  ;;  %8873 = vst [vmem:[#allocation25_spill] sm:$0xff] %v7325_v58 }
 0x77b   :  { %2841 = vmatprep.subr.mxu0 %v7286_v63  ;;  %2913 = vmatpush1.msra.mxu1 %v7303_v20  ;;  %8871 = vst [vmem:[#allocation22_spill] sm:$0xff] %v7315_v37  ;;  %v7320_v63 = vld [vmem:[%s8432_s3 + $0x200] sm:$0xff] }
 0x77c   :  { %2842 = vmatpush1.msra.mxu0 %v7298_v38  ;;  %8872 = vst [vmem:[#allocation23_spill] sm:$0xff] %v7320_v63  ;;  %2914 = vmatprep.subr.mxu1 %v7315_v37  ;;  %v8874_v38 = vld [vmem:[#allocation53_spill] sm:$0xff] }
 0x77d   :  { %2843 = vmatprep.subr.mxu0 %v7308_v62  ;;  %2915 = vmatpush1.msra.mxu1 %v7325_v58 }
 0x77e   :  { %2844 = vmatpush1.msra.mxu0 %v7320_v63  ;;  %3060 = vmatprep.subr.mxu1 %v6955_v59 }
 0x77f   :  { %2989 = vmatprep.subr.mxu0 %v6950_v4 }
 0x7e7   :  { %v2270_v20 = vpop.f32.mrf.mxu0  ;;  %v2341_v3 = vpop.f32.mrf.mxu1 }
 0x7e8   :  { %v2346_v52 = vadd.f32 %v2270_v20, %v8874_v38  ;;  %v2348_v58 = vadd.f32 %v2341_v3, %v8877_v45 }
 0x7e9   :  { %v2272_v53 = vpop.f32.mrf.mxu0  ;;  %v2343_v37 = vpop.f32.mrf.mxu1 }
 0x7ea   :  { %v4343_v61 = vmul.f32 -1.442695, %v2346_v52  ;;  %v2347_v49 = vadd.f32 %v2272_v53, %v8875_v50  ;;  %v2349_v63 = vadd.f32 %v2343_v37, %v8876_v46  ;;  %v7338_v46 = vpop.permute.xlu1 %2377 }
 0x7eb   :  { %8878 = vst [vmem:[#allocation26_spill] sm:$0xff] %v7338_v46  ;;  %vm2379_vm15 = vcmp.eq.s32.totalorder %v7338_v46, 1  ;;  %v8898_v46 = vld [vmem:[#allocation34_spill] sm:$0xff] }
 0x7ec   :  { %4675 = vpow2.f32 %v4343_v61  ;;  %v4344_v62 = vmul.f32 -1.442695, %v2347_v49  ;;  %v4345_v44 = vmul.f32 -1.442695, %v2349_v63  ;;  %v8884_v63 = vld [vmem:[#allocation11_spill] sm:$0xff] }
 0x7ee   :  { %4677 = vpow2.f32 %v4344_v62 }
 0x7ef   :  { %4679 = vtanh.f32 %v2348_v58  ;;  %v8883_v58 = vld [vmem:[#allocation42_spill] sm:$0xff] }
 0x7f0   :  { %4681 = vpow2.f32 %v4345_v44  ;;  %v8882_v44 = vld [vmem:[#allocation44_spill] sm:$0xff] }
 0x7f9   :  { %v4676_v4 = vpop.eup %4675 }
 0x7fa   :  { %v2353_v43 = vadd.f32 1.0, %v4676_v4 }
 0x7fb   :  { %v4678_v59 = vpop.eup %4677 }
 0x7fc   :  { %4683 = vrcp.f32 %v2353_v43  ;;  %v2359_v20 = vadd.f32 1.0, %v4678_v59  ;;  %v4680_v38 = vpop.eup %4679  ;;  %v8881_v43 = vld [vmem:[#allocation43_spill] sm:$0xff] }
 0x7fd   :  { %v4682_v50 = vpop.eup %4681 }
 0x7fe   :  { %4685 = vrcp.f32 %v2359_v20  ;;  %v2366_v62 = vadd.f32 1.0, %v4682_v50  ;;  %v8885_v20 = vld [vmem:[#allocation12_spill] sm:$0xff]  ;;  %v8887_v50 = vld [vmem:[#allocation14_spill] sm:$0xff] }
 0x800   :  { %4687 = vrcp.f32 %v2366_v62  ;;  %v8891_v62 = vld [vmem:[#allocation18_spill] sm:$0xff] }
 0x809   :  { %v4684_v61 = vpop.eup %4683 }
 0x80a   :  { %v2370_v53 = vmul.f32 %v4684_v61, %v4680_v38  ;;  %v8886_v38 = vld [vmem:[#allocation13_spill] sm:$0xff]  ;;  %v8888_v61 = vld [vmem:[#allocation15_spill] sm:$0xff] }
 0x80b   :  { %v4686_v49 = vpop.eup %4685 }
 0x80c   :  { %v2369_v52 = vmul.f32 %v4686_v49, %v6718_v41  ;;  %v8879_v41 = vld [vmem:[#allocation10_spill] sm:$0xff]  ;;  %v8890_v49 = vld [vmem:[#allocation17_spill] sm:$0xff] }
 0x80d   :  { %v4688_v45 = vpop.eup %4687 }
 0x80e   :  { %v2371_v37 = vadd.f32 %v2370_v53, %v2369_v52  ;;  %v8889_v53 = vld [vmem:[#allocation16_spill] sm:$0xff]  ;;  %v8892_v52 = vld [vmem:[#allocation19_spill] sm:$0xff] }
 0x810   :  { %4689 = vtanh.f32 %v2371_v37  ;;  %v8893_v37 = vld [vmem:[#allocation20_spill] sm:$0xff] }
 0x81d   :  { %v4690_v4 = vpop.eup %4689 }
 0x81e   :  { %v2373_v3 = vmul.f32 %v4690_v4, %v4688_v45  ;;  %v8894_v45 = vld [vmem:[#allocation21_spill] sm:$0xff]  ;;  %v8895_v4 = vld [vmem:[#allocation22_spill] sm:$0xff] }
 0x820   :  { %v2380_v59 = vsel %vm2379_vm15, %v2373_v3, %v6729_v48  ;;  %v8880_v48 = vld [vmem:[#allocation41_spill] sm:$0xff]  ;;  %v8896_v3 = vld [vmem:[#allocation23_spill] sm:$0xff] }
 0x821   :  { %2589 = vmatmul.mubr.f32.gmra.mxu0 %v2380_v59  ;;  %2702 = vmatmul.mubr.f32.gmra.mxu1 %v2380_v59  ;;  %v8897_v59 = vld [vmem:[#allocation25_spill] sm:$0xff] }
 0x822   :  { %2877 = vmatprep.mubr.f32.mxu0 %v8833_v26  ;;  %2948 = vmatprep.mubr.f32.mxu1 %v8833_v26 }
 0x825   :  { %2878 = vmatmul.mubr.f32.vlgmr.msra.gmra.mxu0 %v8833_v26  ;;  %2949 = vmatmul.mubr.f32.vlgmr.msra.gmra.mxu1 %v8833_v26 }
 0x826   :  { %2990 = vmatpush1.msra.mxu0 %v6962_v11  ;;  %3061 = vmatpush1.msra.mxu1 %v6967_v29 }
 0x827   :  { %2991 = vmatprep.subr.mxu0 %v6974_v27  ;;  %3062 = vmatprep.subr.mxu1 %v6979_v6 }
 0x828   :  { %2992 = vmatpush1.msra.mxu0 %v6986_v5  ;;  %3063 = vmatpush1.msra.mxu1 %v6991_v51 }
 0x829   :  { %2993 = vmatprep.subr.mxu0 %v6998_v0  ;;  %3064 = vmatprep.subr.mxu1 %v7003_v54 }
 0x82a   :  { %2994 = vmatpush1.msra.mxu0 %v7010_v47  ;;  %3065 = vmatpush1.msra.mxu1 %v7015_v60 }
 0x82b   :  { %2995 = vmatprep.subr.mxu0 %v7022_v1  ;;  %3066 = vmatprep.subr.mxu1 %v7027_v56 }
 0x82c   :  { %2996 = vmatpush1.msra.mxu0 %v7034_v57  ;;  %3067 = vmatpush1.msra.mxu1 %v7039_v55 }
 0x82d   :  { %2997 = vmatprep.subr.mxu0 %v7046_v2  ;;  %3068 = vmatprep.subr.mxu1 %v7051_v7 }
 0x82e   :  { %2998 = vmatpush1.msra.mxu0 %v7058_v8  ;;  %3069 = vmatpush1.msra.mxu1 %v7063_v9 }
 0x82f   :  { %2999 = vmatprep.subr.mxu0 %v7070_v10  ;;  %3070 = vmatprep.subr.mxu1 %v7075_v12 }
 0x830   :  { %3000 = vmatpush1.msra.mxu0 %v7082_v13  ;;  %3071 = vmatpush1.msra.mxu1 %v7087_v14 }
 0x831   :  { %3001 = vmatprep.subr.mxu0 %v7094_v15  ;;  %3072 = vmatprep.subr.mxu1 %v7099_v16 }
 0x832   :  { %3002 = vmatpush1.msra.mxu0 %v7106_v17  ;;  %3073 = vmatpush1.msra.mxu1 %v7111_v18 }
 0x833   :  { %3003 = vmatprep.subr.mxu0 %v7118_v19  ;;  %3074 = vmatprep.subr.mxu1 %v7123_v21 }
 0x834   :  { %3004 = vmatpush1.msra.mxu0 %v7130_v22  ;;  %3075 = vmatpush1.msra.mxu1 %v7135_v23 }
 0x835   :  { %3005 = vmatprep.subr.mxu0 %v7142_v24  ;;  %3076 = vmatprep.subr.mxu1 %v7147_v25 }
 0x836   :  { %3006 = vmatpush1.msra.mxu0 %v7154_v28  ;;  %3077 = vmatpush1.msra.mxu1 %v7159_v30 }
 0x837   :  { %3007 = vmatprep.subr.mxu0 %v7166_v31  ;;  %3078 = vmatprep.subr.mxu1 %v7171_v32 }
 0x838   :  { %3008 = vmatpush1.msra.mxu0 %v7178_v33  ;;  %3079 = vmatpush1.msra.mxu1 %v7183_v34 }
 0x839   :  { %3009 = vmatprep.subr.mxu0 %v7190_v35  ;;  %3080 = vmatprep.subr.mxu1 %v7195_v36 }
 0x83a   :  { %3010 = vmatpush1.msra.mxu0 %v7202_v39  ;;  %3081 = vmatpush1.msra.mxu1 %v7207_v40 }
 0x83b   :  { %3011 = vmatprep.subr.mxu0 %v7214_v42  ;;  %3082 = vmatprep.subr.mxu1 %v8879_v41 }
 0x83c   :  { %3012 = vmatpush1.msra.mxu0 %v8880_v48  ;;  %3083 = vmatpush1.msra.mxu1 %v8881_v43 }
 0x83d   :  { %3013 = vmatprep.subr.mxu0 %v8882_v44  ;;  %3084 = vmatprep.subr.mxu1 %v8883_v58 }
 0x83e   :  { %3014 = vmatpush1.msra.mxu0 %v8884_v63  ;;  %3085 = vmatpush1.msra.mxu1 %v8885_v20 }
 0x83f   :  { %3015 = vmatprep.subr.mxu0 %v8886_v38  ;;  %3086 = vmatprep.subr.mxu1 %v8887_v50 }
 0x840   :  { %3016 = vmatpush1.msra.mxu0 %v8888_v61  ;;  %3087 = vmatpush1.msra.mxu1 %v8889_v53 }
 0x841   :  { %3017 = vmatprep.subr.mxu0 %v8890_v49  ;;  %3088 = vmatprep.subr.mxu1 %v8891_v62  ;;  %v8899_v49 = vld [vmem:[#allocation37_spill] sm:$0xff]  ;;  %v2548_v62 = vpop.f32.mrf.mxu0 }
 0x842   :  { %3018 = vmatpush1.msra.mxu0 %v8892_v52  ;;  %3089 = vmatpush1.msra.mxu1 %v8893_v37  ;;  %v2661_v52 = vpop.f32.mrf.mxu1 }
 0x843   :  { %3019 = vmatprep.subr.mxu0 %v8894_v45  ;;  %3090 = vmatprep.subr.mxu1 %v8895_v4  ;;  %v2550_v53 = vpop.f32.mrf.mxu0 }
 0x844   :  { %3020 = vmatpush1.msra.mxu0 %v8896_v3  ;;  %3053 = vmatprep.mubr.f32.mxu0 %v8833_v26  ;;  %v2663_v37 = vpop.f32.mrf.mxu1 }
 0x845   :  { %3091 = vmatpush1.msra.mxu1 %v8897_v59  ;;  %3124 = vmatprep.mubr.f32.mxu1 %v8833_v26  ;;  %v7414_v61 = vpop.f32.mrf.mxu0 }
 0x846   :  { %3165 = vmatprep.subr.mxu0 %v8898_v46  ;;  %3236 = vmatprep.subr.mxu1 %v8899_v49  ;;  %8900 = vst [vmem:[#allocation27_spill] sm:$0xff] %v7414_v61  ;;  %v7416_v45 = vpop.f32.mrf.mxu1 }
 0x847   :  { %8901 = vst [vmem:[#allocation28_spill] sm:$0xff] %v7416_v45  ;;  %v7418_v4 = vpop.f32.mrf.mxu0 }
 0x848   :  { %8902 = vst [vmem:[#allocation24_spill] sm:$0xff] %v7418_v4  ;;  %v7420_v3 = vpop.f32.mrf.mxu1 }
 0x849   :  { %8903 = vst [vmem:[#allocation45_spill] sm:$0xff] %v7420_v3  ;;  %v7422_v50 = vpop.f32.mrf.mxu0 }
 0x84a   :  { %8904 = vst [vmem:[#allocation47_spill] sm:$0xff] %v7422_v50  ;;  %v7424_v59 = vpop.f32.mrf.mxu1 }
 0x84b   :  { %8905 = vst [vmem:[#allocation48_spill] sm:$0xff] %v7424_v59  ;;  %v7426_v26 = vpop.f32.mrf.mxu0 }
 0x84c   :  { %8906 = vst [vmem:[#allocation46_spill] sm:$0xff] %v7426_v26  ;;  %v7428_v46 = vpop.f32.mrf.mxu1 }
 0x84d   :  { %8907 = vst [vmem:[#allocation49_spill] sm:$0xff] %v7428_v46  ;;  %v7430_v49 = vpop.f32.mrf.mxu0 }
 0x84e   :  { %8908 = vst [vmem:[#allocation51_spill] sm:$0xff] %v7430_v49  ;;  %v7432_v38 = vpop.f32.mrf.mxu1 }
 0x84f   :  { %8909 = vst [vmem:[#allocation52_spill] sm:$0xff] %v7432_v38  ;;  %v7434_v20 = vpop.f32.mrf.mxu0 }
 0x850   :  { %8910 = vst [vmem:[#allocation50_spill] sm:$0xff] %v7434_v20  ;;  %v7436_v61 = vpop.f32.mrf.mxu1 }
 0x851   :  { %8911 = vst [vmem:[#allocation58_spill] sm:$0xff] %v7436_v61  ;;  %v7438_v45 = vpop.f32.mrf.mxu0 }
 0x852   :  { %8912 = vst [vmem:[#allocation8_spill] sm:$0xff] %v7438_v45  ;;  %v7440_v4 = vpop.f32.mrf.mxu1 }
 0x853   :  { %8913 = vst [vmem:[#allocation32_spill] sm:$0xff] %v7440_v4  ;;  %v7442_v3 = vpop.f32.mrf.mxu0  ;;  %v4410_v4 = vld [vmem:[%s8434_s4 + $0x4] sm:$0xf] }
 0x854   :  { %8914 = vst [vmem:[#allocation53_spill] sm:$0xff] %v7442_v3  ;;  %v7444_v50 = vpop.f32.mrf.mxu1  ;;  %v8923_v3 = vld [vmem:[#allocation29_spill] sm:$0xff] }
 0x855   :  { %8915 = vst [vmem:[#allocation55_spill] sm:$0xff] %v7444_v50  ;;  %v7446_v59 = vpop.f32.mrf.mxu0  ;;  %v8924_v50 = vsub.s32 0, %v8923_v3 }
 0x856   :  { %8916 = vst [vmem:[#allocation56_spill] sm:$0xff] %v7446_v59  ;;  %v7448_v26 = vpop.f32.mrf.mxu1 }
 0x857   :  { %8917 = vst [vmem:[#allocation54_spill] sm:$0xff] %v7448_v26  ;;  %v7450_v46 = vpop.f32.mrf.mxu0  ;;  %v7465_v61 = vrot.slane %v4410_v4, %v8924_v50 }
 0x858   :  { %8918 = vst [vmem:[#allocation59_spill] sm:$0xff] %v7450_v46  ;;  %v7452_v49 = vpop.f32.mrf.mxu1 }
 0x859   :  { %8919 = vst [vmem:[#allocation60_spill] sm:$0xff] %v7452_v49  ;;  %v7454_v38 = vpop.f32.mrf.mxu0  ;;  %8925 = vst [vmem:[#allocation29_spill] sm:$0xff] %v7465_v61  ;;  %v8928_v49 = vsub.s32 1, %v8923_v3  ;;  %v2549_v63 = vadd.f32 %v2548_v62, %v7465_v61 }
 0x85a   :  { %8920 = vst [vmem:[#allocation61_spill] sm:$0xff] %v7454_v38  ;;  %v7456_v20 = vpop.f32.mrf.mxu1 }
 0x85b   :  { %8921 = vst [vmem:[#allocation62_spill] sm:$0xff] %v7456_v20  ;;  %v7461_v45 = vpop.f32.mrf.mxu0  ;;  %v7473_v46 = vrot.slane %v4410_v4, %v8928_v49  ;;  %v8932_v49 = vsub.s32 3, %v8923_v3 }
 0x85c   :  { %8922 = vst [vmem:[#allocation63_spill] sm:$0xff] %v7461_v45  ;;  %v7467_v59 = vpop.f32.mrf.mxu1 }
 0x85d   :  { %8926 = vst [vmem:[#allocation64_spill] sm:$0xff] %v7467_v59  ;;  %v2551_v45 = vadd.f32 %v2550_v53, %v7473_v46  ;;  %v7485_v42 = vrot.slane %v4410_v4, %v8932_v49 }
 0x85f   :  { %8933 = vst [vmem:[#allocation69_spill] sm:$0xff] %v7485_v42  ;;  %v2664_v62 = vadd.f32 %v2663_v37, %v7485_v42 }
 0x8e1   :  { %v7469_v26 = vpop.f32.mrf.mxu0  ;;  %v7475_v38 = vpop.f32.mrf.mxu1 }
 0x8e2   :  { %8927 = vst [vmem:[#allocation65_spill] sm:$0xff] %v7469_v26  ;;  %8929 = vst [vmem:[#allocation66_spill] sm:$0xff] %v7475_v38 }
 0x8e3   :  { %v7477_v20 = vpop.f32.mrf.mxu0  ;;  %v7481_v44 = vpop.f32.mrf.mxu1 }
 0x8e4   :  { %8930 = vst [vmem:[#allocation67_spill] sm:$0xff] %v7477_v20  ;;  %8931 = vst [vmem:[#allocation68_spill] sm:$0xff] %v7481_v44  ;;  %v8934_v20 = vsub.s32 2, %v8923_v3 }
 0x8e5   :  { %v2879_v58 = vpop.f32.mrf.mxu0  ;;  %v2950_v26 = vpop.f32.mrf.mxu1 }
 0x8e6   :  { %v2955_v50 = vadd.f32 %v2879_v58, %v2549_v63  ;;  %v7490_v53 = vrot.slane %v4410_v4, %v8934_v20 }
 0x8e7   :  { %v2881_v43 = vpop.f32.mrf.mxu0  ;;  %v2952_v38 = vpop.f32.mrf.mxu1 }
 0x8e8   :  { %v4475_v59 = vmul.f32 -1.442695, %v2955_v50  ;;  %v2956_v48 = vadd.f32 %v2881_v43, %v2551_v45  ;;  %v2958_v44 = vadd.f32 %v2952_v38, %v2664_v62  ;;  %v2662_v58 = vadd.f32 %v2661_v52, %v7490_v53 }
 0x8e9   :  { %v8987_v62 = vmov 0.0  }
 0x8ea   :  { %4691 = vpow2.f32 %v4475_v59  ;;  %v4476_v41 = vmul.f32 -1.442695, %v2956_v48  ;;  %v4477_v63 = vmul.f32 -1.442695, %v2958_v44  ;;  %v2957_v45 = vadd.f32 %v2950_v26, %v2662_v58  ;;  %v8937_v58 = vld [vmem:[#allocation10_spill] sm:$0xff] }
 0x8ec   :  { %4693 = vpow2.f32 %v4476_v41 }
 0x8ed   :  { %4695 = vpow2.f32 %v4477_v63  ;;  %v8938_v63 = vld [vmem:[#allocation41_spill] sm:$0xff] }
 0x8f7   :  { %v4692_v43 = vpop.eup %4691 }
 0x8f8   :  { %v2962_v59 = vadd.f32 1.0, %v4692_v43  ;;  %v8939_v43 = vld [vmem:[#allocation43_spill] sm:$0xff] }
 0x8f9   :  { %v4694_v48 = vpop.eup %4693 }
 0x8fa   :  { %4697 = vrcp.f32 %v2962_v59  ;;  %v2968_v50 = vadd.f32 1.0, %v4694_v48  ;;  %v4696_v41 = vpop.eup %4695  ;;  %v8941_v59 = vld [vmem:[#allocation42_spill] sm:$0xff]  ;;  %v8942_v48 = vld [vmem:[#allocation11_spill] sm:$0xff] }
 0x8fb   :  { %4699 = vtanh.f32 %v2957_v45  ;;  %v2975_v3 = vadd.f32 1.0, %v4696_v41  ;;  %v8940_v45 = vld [vmem:[#allocation44_spill] sm:$0xff]  ;;  %v8944_v41 = vld [vmem:[#allocation13_spill] sm:$0xff] }
 0x8fc   :  { %4701 = vrcp.f32 %v2968_v50  ;;  %v8943_v50 = vld [vmem:[#allocation12_spill] sm:$0xff] }
 0x8fd   :  { %4703 = vrcp.f32 %v2975_v3  ;;  %v8947_v3 = vld [vmem:[#allocation16_spill] sm:$0xff] }
 0x907   :  { %v4698_v49 = vpop.eup %4697 }
 0x908   :  { %v4700_v37 = vpop.eup %4699 }
 0x909   :  { %v4702_v42 = vpop.eup %4701  ;;  %v2979_v4 = vmul.f32 %v4700_v37, %v4698_v49  ;;  %v8945_v49 = vld [vmem:[#allocation14_spill] sm:$0xff]  ;;  %v8946_v37 = vld [vmem:[#allocation15_spill] sm:$0xff] }
 0x90a   :  { %v2978_v20 = vmul.f32 0.0, %v4702_v42  ;;  %v4704_v26 = vpop.eup %4703  ;;  %v8936_v42 = vld [vmem:[#allocation9_spill] sm:$0xff] }
 0x90c   :  { %v7493_v38 = vadd.f32 %v2979_v4, %v2978_v20  ;;  %v8948_v20 = vld [vmem:[#allocation17_spill] sm:$0xff]  ;;  %v8949_v4 = vld [vmem:[#allocation18_spill] sm:$0xff] }
 0x90e   :  { %4705 = vtanh.f32 %v7493_v38 }
 0x91b   :  { %v4706_v44 = vpop.eup %4705 }
 0x91c   :  { %v7496_v52 = vmul.f32 %v4706_v44, %v4704_v26  ;;  %v8950_v26 = vld [vmem:[#allocation19_spill] sm:$0xff]  ;;  %v8951_v44 = vld [vmem:[#allocation20_spill] sm:$0xff] }
 0x91e   :  { %4504 = vmatmul.mubr.msk.f32.vlgmr.msra.gmra.mxu0 %vm637_vm4, %v7496_v52  ;;  %4505 = vmatmul.mubr.msk.f32.vlgmr.msra.gmra.mxu1 %vm637_vm4, %v7496_v52 }
 0x91f   :  { %3166 = vmatpush1.msra.mxu0 %v6962_v11  ;;  %3237 = vmatpush1.msra.mxu1 %v6967_v29 }
 0x920   :  { %3167 = vmatprep.subr.mxu0 %v6974_v27  ;;  %3238 = vmatprep.subr.mxu1 %v6979_v6 }
 0x921   :  { %3168 = vmatpush1.msra.mxu0 %v6986_v5  ;;  %3239 = vmatpush1.msra.mxu1 %v6991_v51 }
 0x922   :  { %3169 = vmatprep.subr.mxu0 %v6998_v0  ;;  %3240 = vmatprep.subr.mxu1 %v7003_v54 }
 0x923   :  { %3170 = vmatpush1.msra.mxu0 %v7010_v47  ;;  %3241 = vmatpush1.msra.mxu1 %v7015_v60 }
 0x924   :  { %3171 = vmatprep.subr.mxu0 %v7022_v1  ;;  %3242 = vmatprep.subr.mxu1 %v7027_v56 }
 0x925   :  { %3172 = vmatpush1.msra.mxu0 %v7034_v57  ;;  %3243 = vmatpush1.msra.mxu1 %v7039_v55 }
 0x926   :  { %3173 = vmatprep.subr.mxu0 %v7046_v2  ;;  %3244 = vmatprep.subr.mxu1 %v7051_v7 }
 0x927   :  { %3174 = vmatpush1.msra.mxu0 %v7058_v8  ;;  %3245 = vmatpush1.msra.mxu1 %v7063_v9 }
 0x928   :  { %3175 = vmatprep.subr.mxu0 %v7070_v10  ;;  %3246 = vmatprep.subr.mxu1 %v7075_v12 }
 0x929   :  { %3176 = vmatpush1.msra.mxu0 %v7082_v13  ;;  %3247 = vmatpush1.msra.mxu1 %v7087_v14 }
 0x92a   :  { %3177 = vmatprep.subr.mxu0 %v7094_v15  ;;  %3248 = vmatprep.subr.mxu1 %v7099_v16 }
 0x92b   :  { %3178 = vmatpush1.msra.mxu0 %v7106_v17  ;;  %3249 = vmatpush1.msra.mxu1 %v7111_v18 }
 0x92c   :  { %3179 = vmatprep.subr.mxu0 %v7118_v19  ;;  %3250 = vmatprep.subr.mxu1 %v7123_v21 }
 0x92d   :  { %3180 = vmatpush1.msra.mxu0 %v7130_v22  ;;  %3251 = vmatpush1.msra.mxu1 %v7135_v23 }
 0x92e   :  { %3181 = vmatprep.subr.mxu0 %v7142_v24  ;;  %3252 = vmatprep.subr.mxu1 %v7147_v25 }
 0x92f   :  { %3182 = vmatpush1.msra.mxu0 %v7154_v28  ;;  %3253 = vmatpush1.msra.mxu1 %v7159_v30 }
 0x930   :  { %3183 = vmatprep.subr.mxu0 %v7166_v31  ;;  %3254 = vmatprep.subr.mxu1 %v7171_v32 }
 0x931   :  { %3184 = vmatpush1.msra.mxu0 %v7178_v33  ;;  %3255 = vmatpush1.msra.mxu1 %v7183_v34 }
 0x932   :  { %3185 = vmatprep.subr.mxu0 %v7190_v35  ;;  %3256 = vmatprep.subr.mxu1 %v7195_v36 }
 0x933   :  { %3186 = vmatpush1.msra.mxu0 %v7202_v39  ;;  %3257 = vmatpush1.msra.mxu1 %v7207_v40  ;;  %v8963_v40 = vld [vmem:[#allocation28_spill] sm:$0xff] }
 0x934   :  { %3187 = vmatprep.subr.mxu0 %v8936_v42  ;;  %3258 = vmatprep.subr.mxu1 %v8937_v58  ;;  %v8961_v58 = vld [vmem:[#allocation69_spill] sm:$0xff] }
 0x935   :  { %3188 = vmatpush1.msra.mxu0 %v8938_v63  ;;  %3259 = vmatpush1.msra.mxu1 %v8939_v43 }
 0x936   :  { %3189 = vmatprep.subr.mxu0 %v8940_v45  ;;  %3260 = vmatprep.subr.mxu1 %v8941_v59  ;;  %v8952_v59 = vld [vmem:[#allocation21_spill] sm:$0xff] }
 0x937   :  { %3190 = vmatpush1.msra.mxu0 %v8942_v48  ;;  %3261 = vmatpush1.msra.mxu1 %v8943_v50  ;;  %v8953_v48 = vld [vmem:[#allocation22_spill] sm:$0xff]  ;;  %v8954_v50 = vld [vmem:[#allocation23_spill] sm:$0xff] }
 0x938   :  { %3191 = vmatprep.subr.mxu0 %v8944_v41  ;;  %3262 = vmatprep.subr.mxu1 %v8945_v49  ;;  %v8955_v41 = vmov 0.0   ;;  %v8956_v49 = vld [vmem:[#allocation25_spill] sm:$0xff] }
 0x939   :  { %3192 = vmatpush1.msra.mxu0 %v8946_v37  ;;  %3263 = vmatpush1.msra.mxu1 %v8947_v3  ;;  %v8957_v3 = vld [vmem:[#allocation34_spill] sm:$0xff] }
 0x93a   :  { %3193 = vmatprep.subr.mxu0 %v8948_v20  ;;  %3264 = vmatprep.subr.mxu1 %v8949_v4  ;;  %v8958_v20 = vld [vmem:[#allocation37_spill] sm:$0xff] }
 0x93b   :  { %3194 = vmatpush1.msra.mxu0 %v8950_v26  ;;  %3265 = vmatpush1.msra.mxu1 %v8951_v44  ;;  %v8959_v26 = vld [vmem:[#allocation27_spill] sm:$0xff] }
 0x93c   :  { %3195 = vmatprep.subr.mxu0 %v8952_v59  ;;  %3266 = vmatprep.subr.mxu1 %v8953_v48  ;;  %v2555_v4 = vadd.f32 %v8959_v26, %v7465_v61  ;;  %v8960_v59 = vld [vmem:[#allocation24_spill] sm:$0xff]  ;;  %v2668_v26 = vadd.f32 %v8963_v40, %v7490_v53 }
 0x93d   :  { %3196 = vmatpush1.msra.mxu0 %v8954_v50  ;;  %3229 = vmatprep.mubr.f32.mxu0 %v8955_v41  ;;  %v2557_v37 = vadd.f32 %v8960_v59, %v7473_v46 }
 0x93e   :  { %3267 = vmatpush1.msra.mxu1 %v8956_v49  ;;  %3300 = vmatprep.mubr.f32.mxu1 %v8955_v41 }
 0x93f   :  { %3341 = vmatprep.subr.mxu0 %v8957_v3  ;;  %3412 = vmatprep.subr.mxu1 %v8958_v20  ;;  %v8962_v3 = vld [vmem:[#allocation45_spill] sm:$0xff] }
 0x940   :  { %v2670_v42 = vadd.f32 %v8962_v3, %v8961_v58 }
 0x9de   :  { %v3055_v44 = vpop.f32.mrf.mxu0  ;;  %v3126_v63 = vpop.f32.mrf.mxu1 }
 0x9df   :  { %v3131_v48 = vadd.f32 %v3055_v44, %v2555_v4  ;;  %v3133_v61 = vadd.f32 %v3126_v63, %v2668_v26  ;;  %v2983_v44 = vsel %vm637_vm4, %v7496_v52, 0.0  ;;  %v8986_v52 = vld [vmem:[#allocation23_spill] sm:$0xff] }
 0x9e0   :  { %v3057_v45 = vpop.f32.mrf.mxu0  ;;  %v3128_v41 = vpop.f32.mrf.mxu1 }
 0x9e1   :  { %v4478_v50 = vmul.f32 -1.442695, %v3131_v48  ;;  %v3132_v43 = vadd.f32 %v3057_v45, %v2557_v37  ;;  %v3134_v20 = vadd.f32 %v3128_v41, %v2670_v42  ;;  %v2984_v42 = vsel %vm637_vm4, %v7493_v38, 0.0  ;;  %v8985_v38 = vld [vmem:[#allocation22_spill] sm:$0xff] }
 0x9e3   :  { %4707 = vpow2.f32 %v4478_v50  ;;  %v4479_v49 = vmul.f32 -1.442695, %v3132_v43  ;;  %v4480_v39 = vmul.f32 -1.442695, %v3134_v20 }
 0x9e5   :  { %4709 = vpow2.f32 %v4479_v49 }
 0x9e6   :  { %4711 = vtanh.f32 %v3133_v61 }
 0x9e7   :  { %4713 = vpow2.f32 %v4480_v39 }
 0x9f0   :  { %v4708_v36 = vpop.eup %4707 }
 0x9f1   :  { %v3138_v59 = vadd.f32 1.0, %v4708_v36 }
 0x9f2   :  { %v4710_v4 = vpop.eup %4709 }
 0x9f3   :  { %4715 = vrcp.f32 %v3138_v59  ;;  %v3144_v45 = vadd.f32 1.0, %v4710_v4  ;;  %v4712_v43 = vpop.eup %4711  ;;  %v8988_v59 = vld [vmem:[#allocation25_spill] sm:$0xff]  ;;  %v8989_v4 = vld [vmem:[#allocation34_spill] sm:$0xff] }
 0x9f4   :  { %v4714_v48 = vpop.eup %4713 }
 0x9f5   :  { %4717 = vrcp.f32 %v3144_v45  ;;  %v3151_v40 = vadd.f32 1.0, %v4714_v48  ;;  %v8990_v45 = vld [vmem:[#allocation37_spill] sm:$0xff]  ;;  %v8992_v48 = vld [vmem:[#allocation47_spill] sm:$0xff] }
 0x9f7   :  { %4719 = vrcp.f32 %v3151_v40 }
 0xa00   :  { %v4716_v50 = vpop.eup %4715 }
 0xa01   :  { %v3155_v49 = vmul.f32 %v4716_v50, %v4712_v43  ;;  %v8991_v43 = vld [vmem:[#allocation29_spill] sm:$0xff] }
 0xa02   :  { %v4718_v37 = vpop.eup %4717  ;;  %v2561_v50 = vadd.f32 %v8992_v48, %v8991_v43 }
 0xa03   :  { %v3154_v63 = vmul.f32 %v4718_v37, %v2984_v42  ;;  %v8993_v37 = vld [vmem:[#allocation46_spill] sm:$0xff] }
 0xa04   :  { %v4720_v61 = vpop.eup %4719 }
 0xa05   :  { %v3156_v41 = vadd.f32 %v3155_v49, %v3154_v63 }
 0xa07   :  { %4721 = vtanh.f32 %v3156_v41  ;;  %v7583_v39 = vsel %vm885_vm9, %v3156_v41, %v2984_v42  ;;  %v2563_v42 = vadd.f32 %v8993_v37, %v7473_v46 }
 0xa14   :  { %v4722_v3 = vpop.eup %4721 }
 0xa15   :  { %v3158_v20 = vmul.f32 %v4722_v3, %v4720_v61 }
 0xa17   :  { %v7590_v26 = vsel %vm885_vm9, %v3158_v20, %v2983_v44  ;;  %v8994_v44 = vld [vmem:[#allocation49_spill] sm:$0xff] }
 0xa18   :  { %3230 = vmatmul.mubr.f32.vlgmr.msra.gmra.mxu0 %v7590_v26  ;;  %3301 = vmatmul.mubr.f32.vlgmr.msra.gmra.mxu1 %v7590_v26 }
 0xa19   :  { %3342 = vmatpush1.msra.mxu0 %v6962_v11  ;;  %3413 = vmatpush1.msra.mxu1 %v6967_v29  ;;  %v8965_v11 = vld [vmem:[#allocation39_spill] sm:$0xff]  ;;  %v8966_v29 = vld [vmem:[#allocation40_spill] sm:$0xff] }
 0xa1a   :  { %3343 = vmatprep.subr.mxu0 %v6974_v27  ;;  %3414 = vmatprep.subr.mxu1 %v6979_v6  ;;  %v8967_v27 = vld [vmem:[#allocation38_spill] sm:$0xff]  ;;  %v8968_v6 = vld [vmem:[#allocation9_spill] sm:$0xff] }
 0xa1b   :  { %3344 = vmatpush1.msra.mxu0 %v6986_v5  ;;  %3415 = vmatpush1.msra.mxu1 %v6991_v51  ;;  %v8969_v5 = vld [vmem:[#allocation10_spill] sm:$0xff]  ;;  %v8970_v51 = vld [vmem:[#allocation41_spill] sm:$0xff] }
 0xa1c   :  { %3345 = vmatprep.subr.mxu0 %v6998_v0  ;;  %3416 = vmatprep.subr.mxu1 %v7003_v54  ;;  %v8971_v0 = vld [vmem:[#allocation43_spill] sm:$0xff]  ;;  %v8972_v54 = vld [vmem:[#allocation44_spill] sm:$0xff] }
 0xa1d   :  { %3346 = vmatpush1.msra.mxu0 %v7010_v47  ;;  %3417 = vmatpush1.msra.mxu1 %v7015_v60  ;;  %v8973_v47 = vld [vmem:[#allocation42_spill] sm:$0xff]  ;;  %v8974_v60 = vld [vmem:[#allocation11_spill] sm:$0xff] }
 0xa1e   :  { %3347 = vmatprep.subr.mxu0 %v7022_v1  ;;  %3418 = vmatprep.subr.mxu1 %v7027_v56  ;;  %v8975_v1 = vld [vmem:[#allocation12_spill] sm:$0xff]  ;;  %v8976_v56 = vld [vmem:[#allocation13_spill] sm:$0xff] }
 0xa1f   :  { %3348 = vmatpush1.msra.mxu0 %v7034_v57  ;;  %3419 = vmatpush1.msra.mxu1 %v7039_v55  ;;  %v8977_v57 = vld [vmem:[#allocation14_spill] sm:$0xff]  ;;  %v8978_v55 = vld [vmem:[#allocation15_spill] sm:$0xff] }
 0xa20   :  { %3349 = vmatprep.subr.mxu0 %v7046_v2  ;;  %3420 = vmatprep.subr.mxu1 %v7051_v7  ;;  %v8979_v2 = vld [vmem:[#allocation16_spill] sm:$0xff]  ;;  %v8980_v7 = vld [vmem:[#allocation17_spill] sm:$0xff] }
 0xa21   :  { %3350 = vmatpush1.msra.mxu0 %v7058_v8  ;;  %3421 = vmatpush1.msra.mxu1 %v7063_v9  ;;  %v8981_v8 = vld [vmem:[#allocation18_spill] sm:$0xff]  ;;  %v8982_v9 = vld [vmem:[#allocation19_spill] sm:$0xff] }
 0xa22   :  { %3351 = vmatprep.subr.mxu0 %v7070_v10  ;;  %3422 = vmatprep.subr.mxu1 %v7075_v12  ;;  %v8983_v10 = vld [vmem:[#allocation20_spill] sm:$0xff]  ;;  %v8984_v12 = vld [vmem:[#allocation21_spill] sm:$0xff] }
 0xa23   :  { %3352 = vmatpush1.msra.mxu0 %v7082_v13  ;;  %3423 = vmatpush1.msra.mxu1 %v7087_v14 }
 0xa24   :  { %3353 = vmatprep.subr.mxu0 %v7094_v15  ;;  %3424 = vmatprep.subr.mxu1 %v7099_v16 }
 0xa25   :  { %3354 = vmatpush1.msra.mxu0 %v7106_v17  ;;  %3425 = vmatpush1.msra.mxu1 %v7111_v18 }
 0xa26   :  { %3355 = vmatprep.subr.mxu0 %v7118_v19  ;;  %3426 = vmatprep.subr.mxu1 %v7123_v21 }
 0xa27   :  { %3356 = vmatpush1.msra.mxu0 %v7130_v22  ;;  %3427 = vmatpush1.msra.mxu1 %v7135_v23 }
 0xa28   :  { %3357 = vmatprep.subr.mxu0 %v7142_v24  ;;  %3428 = vmatprep.subr.mxu1 %v7147_v25 }
 0xa29   :  { %3358 = vmatpush1.msra.mxu0 %v7154_v28  ;;  %3429 = vmatpush1.msra.mxu1 %v7159_v30 }
 0xa2a   :  { %3359 = vmatprep.subr.mxu0 %v7166_v31  ;;  %3430 = vmatprep.subr.mxu1 %v7171_v32 }
 0xa2b   :  { %3360 = vmatpush1.msra.mxu0 %v7178_v33  ;;  %3431 = vmatpush1.msra.mxu1 %v7183_v34 }
 0xa2c   :  { %3361 = vmatprep.subr.mxu0 %v7190_v35  ;;  %3432 = vmatprep.subr.mxu1 %v8965_v11 }
 0xa2d   :  { %3362 = vmatpush1.msra.mxu0 %v8966_v29  ;;  %3433 = vmatpush1.msra.mxu1 %v8967_v27 }
 0xa2e   :  { %3363 = vmatprep.subr.mxu0 %v8968_v6  ;;  %3434 = vmatprep.subr.mxu1 %v8969_v5 }
 0xa2f   :  { %3364 = vmatpush1.msra.mxu0 %v8970_v51  ;;  %3435 = vmatpush1.msra.mxu1 %v8971_v0 }
 0xa30   :  { %3365 = vmatprep.subr.mxu0 %v8972_v54  ;;  %3436 = vmatprep.subr.mxu1 %v8973_v47 }
 0xa31   :  { %3366 = vmatpush1.msra.mxu0 %v8974_v60  ;;  %3437 = vmatpush1.msra.mxu1 %v8975_v1 }
 0xa32   :  { %3367 = vmatprep.subr.mxu0 %v8976_v56  ;;  %3438 = vmatprep.subr.mxu1 %v8977_v57 }
 0xa33   :  { %3368 = vmatpush1.msra.mxu0 %v8978_v55  ;;  %3439 = vmatpush1.msra.mxu1 %v8979_v2 }
 0xa34   :  { %3369 = vmatprep.subr.mxu0 %v8980_v7  ;;  %3440 = vmatprep.subr.mxu1 %v8981_v8 }
 0xa35   :  { %3370 = vmatpush1.msra.mxu0 %v8982_v9  ;;  %3441 = vmatpush1.msra.mxu1 %v8983_v10 }
 0xa36   :  { %3371 = vmatprep.subr.mxu0 %v8984_v12  ;;  %3442 = vmatprep.subr.mxu1 %v8985_v38 }
 0xa37   :  { %3372 = vmatpush1.msra.mxu0 %v8986_v52  ;;  %3405 = vmatprep.mubr.f32.mxu0 %v8987_v62 }
 0xa38   :  { %3443 = vmatpush1.msra.mxu1 %v8988_v59  ;;  %3476 = vmatprep.mubr.f32.mxu1 %v8987_v62  ;;  %v8995_v59 = vld [vmem:[#allocation48_spill] sm:$0xff] }
 0xa39   :  { %3517 = vmatprep.subr.mxu0 %v8989_v4  ;;  %3588 = vmatprep.subr.mxu1 %v8990_v45  ;;  %v2676_v4 = vadd.f32 %v8994_v44, %v8961_v58  ;;  %v2674_v48 = vadd.f32 %v8995_v59, %v7490_v53  ;;  %v7774_v59 = vld [vmem:[%s8432_s3 + $0x378] sm:$0xff] }
 0xa3a   :  { %8997 = vst [vmem:[#allocation57_spill] sm:$0xff] %v7774_v59 }
 0xad8   :  { %v3231_v49 = vpop.f32.mrf.mxu0  ;;  %v3302_v61 = vpop.f32.mrf.mxu1 }
 0xad9   :  { %v3307_v40 = vadd.f32 %v3231_v49, %v2561_v50  ;;  %v3309_v43 = vadd.f32 %v3302_v61, %v2674_v48  ;;  %v7702_v48 = vld [vmem:[%s8432_s3 + $0x3d8] sm:$0xff] }
 0xada   :  { %v3233_v63 = vpop.f32.mrf.mxu0  ;;  %v3304_v20 = vpop.f32.mrf.mxu1 }
 0xadb   :  { %v4481_v41 = vmul.f32 -1.442695, %v3307_v40  ;;  %v3308_v36 = vadd.f32 %v3233_v63, %v2563_v42  ;;  %v3310_v45 = vadd.f32 %v3304_v20, %v2676_v4 }
 0xadd   :  { %4723 = vpow2.f32 %v4481_v41  ;;  %v4482_v3 = vmul.f32 -1.442695, %v3308_v36  ;;  %v4483_v62 = vmul.f32 -1.442695, %v3310_v45  ;;  %v7684_v45 = vld [vmem:[%s8432_s3 + $0x3e0] sm:$0xff] }
 0xadf   :  { %4725 = vpow2.f32 %v4482_v3 }
 0xae0   :  { %4727 = vtanh.f32 %v3309_v43 }
 0xae1   :  { %4729 = vpow2.f32 %v4483_v62 }
 0xaea   :  { %v4724_v52 = vpop.eup %4723 }
 0xaeb   :  { %v3314_v37 = vadd.f32 1.0, %v4724_v52 }
 0xaec   :  { %v4726_v50 = vpop.eup %4725 }
 0xaed   :  { %4731 = vrcp.f32 %v3314_v37  ;;  %v3320_v49 = vadd.f32 1.0, %v4726_v50  ;;  %v4728_v42 = vpop.eup %4727  ;;  %v7708_v37 = vld [vmem:[%s8432_s3 + $0x3c0] sm:$0xff]  ;;  %v7714_v50 = vld [vmem:[%s8432_s3 + $0x3d0] sm:$0xff] }
 0xaee   :  { %v4730_v40 = vpop.eup %4729 }
 0xaef   :  { %4733 = vrcp.f32 %v3320_v49  ;;  %v3327_v3 = vadd.f32 1.0, %v4730_v40  ;;  %v7720_v49 = vld [vmem:[%s8432_s3 + $0x3a8] sm:$0xff]  ;;  %v7732_v40 = vld [vmem:[%s8432_s3 + $0x3a0] sm:$0xff] }
 0xaf1   :  { %4735 = vrcp.f32 %v3327_v3  ;;  %v7756_v3 = vld [vmem:[%s8432_s3 + $0x380] sm:$0xff] }
 0xafa   :  { %v4732_v63 = vpop.eup %4731 }
 0xafb   :  { %v3331_v41 = vmul.f32 %v4732_v63, %v4728_v42  ;;  %v7726_v42 = vld [vmem:[%s8432_s3 + $0x3b8] sm:$0xff]  ;;  %v7738_v63 = vld [vmem:[%s8432_s3 + $0x3b0] sm:$0xff] }
 0xafc   :  { %v4734_v36 = vpop.eup %4733 }
 0xafd   :  { %v3330_v20 = vmul.f32 %v4734_v36, %v7583_v39  ;;  %v7750_v36 = vld [vmem:[%s8432_s3 + $0x398] sm:$0xff] }
 0xafe   :  { %v4736_v62 = vpop.eup %4735 }
 0xaff   :  { %v3332_v44 = vadd.f32 %v3331_v41, %v3330_v20  ;;  %v7744_v41 = vld [vmem:[%s8432_s3 + $0x388] sm:$0xff]  ;;  %v7762_v20 = vld [vmem:[%s8432_s3 + $0x390] sm:$0xff] }
 0xb01   :  { %4737 = vtanh.f32 %v3332_v44  ;;  %v7672_v52 = vsel %vm1134_vm10, %v3332_v44, %v7583_v39  ;;  %v7690_v39 = vld [vmem:[%s8432_s3 + $0x3f0] sm:$0xff]  ;;  %v7768_v44 = vld [vmem:[%s8432_s3 + $0x368] sm:$0xff] }
 0xb0e   :  { %v4738_v43 = vpop.eup %4737 }
 0xb0f   :  { %v3334_v61 = vmul.f32 %v4738_v43, %v4736_v62  ;;  %v7780_v62 = vld [vmem:[%s8432_s3 + $0x360] sm:$0xff]  ;;  %v7786_v43 = vld [vmem:[%s8432_s3 + $0x370] sm:$0xff] }
 0xb11   :  { %v7677_v4 = vsel %vm1134_vm10, %v3334_v61, %v7590_v26  ;;  %v7696_v26 = vld [vmem:[%s8432_s3 + $0x3c8] sm:$0xff] }
 0xb12   :  { %3406 = vmatmul.mubr.f32.vlgmr.msra.gmra.mxu0 %v7677_v4  ;;  %3477 = vmatmul.mubr.f32.vlgmr.msra.gmra.mxu1 %v7677_v4  ;;  %v7792_v61 = vld [vmem:[%s8432_s3 + $0x348] sm:$0xff] }
 0xb13   :  { %3518 = vmatpush1.msra.mxu0 %v7684_v45  ;;  %3589 = vmatpush1.msra.mxu1 %v7690_v39 }
 0xb14   :  { %3519 = vmatprep.subr.mxu0 %v7696_v26  ;;  %3590 = vmatprep.subr.mxu1 %v7702_v48 }
 0xb15   :  { %3520 = vmatpush1.msra.mxu0 %v7708_v37  ;;  %3591 = vmatpush1.msra.mxu1 %v7714_v50 }
 0xb16   :  { %3521 = vmatprep.subr.mxu0 %v7720_v49  ;;  %3592 = vmatprep.subr.mxu1 %v7726_v42 }
 0xb17   :  { %3522 = vmatpush1.msra.mxu0 %v7732_v40  ;;  %3593 = vmatpush1.msra.mxu1 %v7738_v63 }
 0xb18   :  { %3523 = vmatprep.subr.mxu0 %v7744_v41  ;;  %3594 = vmatprep.subr.mxu1 %v7750_v36 }
 0xb19   :  { %3524 = vmatpush1.msra.mxu0 %v7756_v3  ;;  %3595 = vmatpush1.msra.mxu1 %v7762_v20 }
 0xb1a   :  { %3525 = vmatprep.subr.mxu0 %v7768_v44  ;;  %3596 = vmatprep.subr.mxu1 %v7774_v59  ;;  %v7798_v59 = vld [vmem:[%s8432_s3 + $0x358] sm:$0xff] }
 0xb1b   :  { %3526 = vmatpush1.msra.mxu0 %v7780_v62  ;;  %3597 = vmatpush1.msra.mxu1 %v7786_v43 }
 0xb1c   :  { %3527 = vmatprep.subr.mxu0 %v7792_v61  ;;  %3598 = vmatprep.subr.mxu1 %v7798_v59 }
 0xb1d   :  { %3528 = vmatpush1.msra.mxu0 %v7082_v13  ;;  %3599 = vmatpush1.msra.mxu1 %v7087_v14  ;;  %v8998_v13 = vld [vmem:[#allocation23_spill] sm:$0xff]  ;;  %v8999_v14 = vmov 0.0  }
 0xb1e   :  { %3529 = vmatprep.subr.mxu0 %v7094_v15  ;;  %3600 = vmatprep.subr.mxu1 %v7099_v16  ;;  %v9000_v15 = vld [vmem:[#allocation25_spill] sm:$0xff]  ;;  %v7848_v16 = vld [vmem:[%s8432_s3 + $0x3e8] sm:$0xff] }
 0xb1f   :  { %3530 = vmatpush1.msra.mxu0 %v7106_v17  ;;  %3601 = vmatpush1.msra.mxu1 %v7111_v18  ;;  %9001 = vst [vmem:[#allocation27_spill] sm:$0xff] %v7848_v16  ;;  %v7854_v17 = vld [vmem:[%s8432_s3 + $0x3f8] sm:$0xff] }
 0xb20   :  { %3531 = vmatprep.subr.mxu0 %v7118_v19  ;;  %3602 = vmatprep.subr.mxu1 %v7123_v21  ;;  %9002 = vst [vmem:[#allocation24_spill] sm:$0xff] %v7854_v17  ;;  %v9003_v18 = vld [vmem:[#allocation29_spill] sm:$0xff]  ;;  %v9004_v19 = vld [vmem:[#allocation51_spill] sm:$0xff] }
 0xb21   :  { %3532 = vmatpush1.msra.mxu0 %v7130_v22  ;;  %3603 = vmatpush1.msra.mxu1 %v7135_v23  ;;  %v2567_v21 = vadd.f32 %v9004_v19, %v9003_v18  ;;  %v9005_v23 = vld [vmem:[#allocation50_spill] sm:$0xff] }
 0xb22   :  { %3533 = vmatprep.subr.mxu0 %v7142_v24  ;;  %3604 = vmatprep.subr.mxu1 %v7147_v25  ;;  %v2569_v24 = vadd.f32 %v9005_v23, %v7473_v46  ;;  %v7919_v23 = vld [vmem:[%s8432_s3 + $0x338] sm:$0xff] }
 0xb23   :  { %3534 = vmatpush1.msra.mxu0 %v7154_v28  ;;  %3605 = vmatpush1.msra.mxu1 %v7159_v30 }
 0xb24   :  { %3535 = vmatprep.subr.mxu0 %v7166_v31  ;;  %3606 = vmatprep.subr.mxu1 %v7171_v32 }
 0xb25   :  { %3536 = vmatpush1.msra.mxu0 %v7178_v33  ;;  %3607 = vmatpush1.msra.mxu1 %v7183_v34 }
 0xb26   :  { %3537 = vmatprep.subr.mxu0 %v7190_v35  ;;  %3608 = vmatprep.subr.mxu1 %v8965_v11  ;;  %v9006_v35 = vld [vmem:[#allocation58_spill] sm:$0xff] }
 0xb27   :  { %3538 = vmatpush1.msra.mxu0 %v8966_v29  ;;  %3609 = vmatpush1.msra.mxu1 %v8967_v27  ;;  %v2682_v11 = vadd.f32 %v9006_v35, %v8961_v58  ;;  %v9007_v27 = vld [vmem:[#allocation52_spill] sm:$0xff]  ;;  %v7973_v35 = vld [vmem:[%s8432_s3 + $0x2e0] sm:$0xff] }
 0xb28   :  { %3539 = vmatprep.subr.mxu0 %v8968_v6  ;;  %3610 = vmatprep.subr.mxu1 %v8969_v5  ;;  %v2680_v6 = vadd.f32 %v9007_v27, %v7490_v53  ;;  %v7991_v27 = vld [vmem:[%s8432_s3 + $0x2d8] sm:$0xff] }
 0xb29   :  { %3540 = vmatpush1.msra.mxu0 %v8970_v51  ;;  %3611 = vmatpush1.msra.mxu1 %v8971_v0 }
 0xb2a   :  { %3541 = vmatprep.subr.mxu0 %v8972_v54  ;;  %3612 = vmatprep.subr.mxu1 %v8973_v47 }
 0xb2b   :  { %3542 = vmatpush1.msra.mxu0 %v8974_v60  ;;  %3613 = vmatpush1.msra.mxu1 %v8975_v1 }
 0xb2c   :  { %3543 = vmatprep.subr.mxu0 %v8976_v56  ;;  %3614 = vmatprep.subr.mxu1 %v8977_v57 }
 0xb2d   :  { %3544 = vmatpush1.msra.mxu0 %v8978_v55  ;;  %3615 = vmatpush1.msra.mxu1 %v8979_v2 }
 0xb2e   :  { %3545 = vmatprep.subr.mxu0 %v8980_v7  ;;  %3616 = vmatprep.subr.mxu1 %v8981_v8 }
 0xb2f   :  { %3546 = vmatpush1.msra.mxu0 %v8982_v9  ;;  %3617 = vmatpush1.msra.mxu1 %v8983_v10  ;;  %v8087_v10 = vld [vmem:[%s8432_s3 + $0x258] sm:$0xff] }
 0xb30   :  { %3547 = vmatprep.subr.mxu0 %v8984_v12  ;;  %3618 = vmatprep.subr.mxu1 %v8985_v38  ;;  %9021 = vst [vmem:[#allocation44_spill] sm:$0xff] %v8087_v10 }
 0xb31   :  { %3548 = vmatpush1.msra.mxu0 %v8998_v13  ;;  %3581 = vmatprep.mubr.f32.mxu0 %v8999_v14 }
 0xb32   :  { %3619 = vmatpush1.msra.mxu1 %v9000_v15  ;;  %3652 = vmatprep.mubr.f32.mxu1 %v8999_v14 }
 0xb33   :  { %3693 = vmatprep.subr.mxu0 %v7848_v16  ;;  %3764 = vmatprep.subr.mxu1 %v7854_v17 }
 0xbd2   :  { %v3407_v22 = vpop.f32.mrf.mxu0  ;;  %v3478_v32 = vpop.f32.mrf.mxu1 }
 0xbd3   :  { %v3483_v25 = vadd.f32 %v3407_v22, %v2567_v21  ;;  %v3485_v5 = vadd.f32 %v3478_v32, %v2680_v6  ;;  %v7907_v21 = vld [vmem:[%s8432_s3 + $0x350] sm:$0xff]  ;;  %v7913_v22 = vld [vmem:[%s8432_s3 + $0x328] sm:$0xff]  ;;  %v7997_v6 = vld [vmem:[%s8432_s3 + $0x2c0] sm:$0xff] }
 0xbd4   :  { %v3409_v28 = vpop.f32.mrf.mxu0  ;;  %v3480_v34 = vpop.f32.mrf.mxu1  ;;  %v7955_v32 = vld [vmem:[%s8432_s3 + $0x310] sm:$0xff] }
 0xbd5   :  { %v4484_v30 = vmul.f32 -1.442695, %v3483_v25  ;;  %v3484_v31 = vadd.f32 %v3409_v28, %v2569_v24  ;;  %v3486_v29 = vadd.f32 %v3480_v34, %v2682_v11  ;;  %v7925_v24 = vld [vmem:[%s8432_s3 + $0x320] sm:$0xff]  ;;  %v7931_v25 = vld [vmem:[%s8432_s3 + $0x330] sm:$0xff]  ;;  %v7937_v28 = vld [vmem:[%s8432_s3 + $0x308] sm:$0xff] }
 0xbd6   :  { %v7967_v34 = vld [vmem:[%s8432_s3 + $0x2f8] sm:$0xff]  ;;  %v7979_v11 = vld [vmem:[%s8432_s3 + $0x2f0] sm:$0xff] }
 0xbd7   :  { %4739 = vpow2.f32 %v4484_v30  ;;  %v4485_v33 = vmul.f32 -1.442695, %v3484_v31  ;;  %v4486_v51 = vmul.f32 -1.442695, %v3486_v29  ;;  %v7943_v30 = vld [vmem:[%s8432_s3 + $0x318] sm:$0xff]  ;;  %v7949_v31 = vld [vmem:[%s8432_s3 + $0x300] sm:$0xff] }
 0xbd8   :  { %v7985_v29 = vld [vmem:[%s8432_s3 + $0x2c8] sm:$0xff] }
 0xbd9   :  { %4741 = vpow2.f32 %v4485_v33  ;;  %v7961_v33 = vld [vmem:[%s8432_s3 + $0x2e8] sm:$0xff] }
 0xbda   :  { %4743 = vtanh.f32 %v3485_v5  ;;  %v8003_v5 = vld [vmem:[%s8432_s3 + $0x2d0] sm:$0xff] }
 0xbdb   :  { %4745 = vpow2.f32 %v4486_v51  ;;  %v8009_v51 = vld [vmem:[%s8432_s3 + $0x2a8] sm:$0xff] }
 0xbe4   :  { %v4740_v0 = vpop.eup %4739 }
 0xbe5   :  { %v3490_v54 = vadd.f32 1.0, %v4740_v0  ;;  %v8015_v0 = vld [vmem:[%s8432_s3 + $0x2b8] sm:$0xff] }
 0xbe6   :  { %v4742_v47 = vpop.eup %4741 }
 0xbe7   :  { %4747 = vrcp.f32 %v3490_v54  ;;  %v3496_v60 = vadd.f32 1.0, %v4742_v47  ;;  %v4744_v1 = vpop.eup %4743  ;;  %v8021_v54 = vld [vmem:[%s8432_s3 + $0x2a0] sm:$0xff]  ;;  %v8027_v47 = vld [vmem:[%s8432_s3 + $0x2b0] sm:$0xff] }
 0xbe8   :  { %v4746_v56 = vpop.eup %4745  ;;  %9010 = vst [vmem:[#allocation69_spill] sm:$0xff] %v8021_v54  ;;  %9011 = vst [vmem:[#allocation45_spill] sm:$0xff] %v8027_v47 }
 0xbe9   :  { %4749 = vrcp.f32 %v3496_v60  ;;  %v3503_v7 = vadd.f32 1.0, %v4746_v56  ;;  %v8033_v60 = vld [vmem:[%s8432_s3 + $0x288] sm:$0xff]  ;;  %v8045_v56 = vld [vmem:[%s8432_s3 + $0x280] sm:$0xff] }
 0xbea   :  { %9012 = vst [vmem:[#allocation28_spill] sm:$0xff] %v8033_v60  ;;  %9014 = vst [vmem:[#allocation39_spill] sm:$0xff] %v8045_v56 }
 0xbeb   :  { %4751 = vrcp.f32 %v3503_v7  ;;  %v8069_v7 = vld [vmem:[%s8432_s3 + $0x260] sm:$0xff] }
 0xbec   :  { %9018 = vst [vmem:[#allocation10_spill] sm:$0xff] %v8069_v7 }
 0xbf4   :  { %v4748_v57 = vpop.eup %4747 }
 0xbf5   :  { %v3507_v55 = vmul.f32 %v4748_v57, %v4744_v1  ;;  %v8039_v1 = vld [vmem:[%s8432_s3 + $0x298] sm:$0xff]  ;;  %v8051_v57 = vld [vmem:[%s8432_s3 + $0x290] sm:$0xff] }
 0xbf6   :  { %v4750_v2 = vpop.eup %4749  ;;  %9013 = vst [vmem:[#allocation7_spill] sm:$0xff] %v8039_v1  ;;  %9015 = vst [vmem:[#allocation40_spill] sm:$0xff] %v8051_v57 }
 0xbf7   :  { %v3506_v8 = vmul.f32 %v4750_v2, %v7672_v52  ;;  %v8063_v2 = vld [vmem:[%s8432_s3 + $0x278] sm:$0xff] }
 0xbf8   :  { %v4752_v38 = vpop.eup %4751  ;;  %9017 = vst [vmem:[#allocation9_spill] sm:$0xff] %v8063_v2 }
 0xbf9   :  { %v3508_v9 = vadd.f32 %v3507_v55, %v3506_v8  ;;  %v8057_v55 = vld [vmem:[%s8432_s3 + $0x268] sm:$0xff]  ;;  %v8075_v8 = vld [vmem:[%s8432_s3 + $0x270] sm:$0xff] }
 0xbfa   :  { %9016 = vst [vmem:[#allocation38_spill] sm:$0xff] %v8057_v55  ;;  %9019 = vst [vmem:[#allocation41_spill] sm:$0xff] %v8075_v8 }
 0xbfb   :  { %4753 = vtanh.f32 %v3508_v9  ;;  %v7869_v12 = vsel %vm1383_vm11, %v3508_v9, %v7672_v52  ;;  %v9009_v52 = vld [vmem:[#allocation57_spill] sm:$0xff]  ;;  %v8081_v9 = vld [vmem:[%s8432_s3 + $0x248] sm:$0xff] }
 0xbfc   :  { %9020 = vst [vmem:[#allocation43_spill] sm:$0xff] %v8081_v9 }
 0xc08   :  { %v4754_v13 = vpop.eup %4753 }
 0xc09   :  { %v3510_v15 = vmul.f32 %v4754_v13, %v4752_v38  ;;  %v8093_v38 = vld [vmem:[%s8432_s3 + $0x240] sm:$0xff]  ;;  %v8099_v13 = vld [vmem:[%s8432_s3 + $0x250] sm:$0xff] }
 0xc0a   :  { %9022 = vst [vmem:[#allocation42_spill] sm:$0xff] %v8093_v38  ;;  %9023 = vst [vmem:[#allocation11_spill] sm:$0xff] %v8099_v13 }
 0xc0b   :  { %v7874_v19 = vsel %vm1383_vm11, %v3510_v15, %v7677_v4  ;;  %v7901_v4 = vld [vmem:[%s8432_s3 + $0x340] sm:$0xff]  ;;  %v8105_v15 = vld [vmem:[%s8432_s3 + $0x228] sm:$0xff] }
 0xc0c   :  { %3582 = vmatmul.mubr.f32.vlgmr.msra.gmra.mxu0 %v7874_v19  ;;  %3653 = vmatmul.mubr.f32.vlgmr.msra.gmra.mxu1 %v7874_v19  ;;  %9024 = vst [vmem:[#allocation12_spill] sm:$0xff] %v8105_v15 }
 0xc0d   :  { %3694 = vmatpush1.msra.mxu0 %v7684_v45  ;;  %3765 = vmatpush1.msra.mxu1 %v7690_v39 }
 0xc0e   :  { %3695 = vmatprep.subr.mxu0 %v7696_v26  ;;  %3766 = vmatprep.subr.mxu1 %v7702_v48 }
 0xc0f   :  { %3696 = vmatpush1.msra.mxu0 %v7708_v37  ;;  %3767 = vmatpush1.msra.mxu1 %v7714_v50 }
 0xc10   :  { %3697 = vmatprep.subr.mxu0 %v7720_v49  ;;  %3768 = vmatprep.subr.mxu1 %v7726_v42 }
 0xc11   :  { %3698 = vmatpush1.msra.mxu0 %v7732_v40  ;;  %3769 = vmatpush1.msra.mxu1 %v7738_v63 }
 0xc12   :  { %3699 = vmatprep.subr.mxu0 %v7744_v41  ;;  %3770 = vmatprep.subr.mxu1 %v7750_v36 }
 0xc13   :  { %3700 = vmatpush1.msra.mxu0 %v7756_v3  ;;  %3771 = vmatpush1.msra.mxu1 %v7762_v20 }
 0xc14   :  { %3701 = vmatprep.subr.mxu0 %v7768_v44  ;;  %3772 = vmatprep.subr.mxu1 %v9009_v52 }
 0xc15   :  { %3702 = vmatpush1.msra.mxu0 %v7780_v62  ;;  %3773 = vmatpush1.msra.mxu1 %v7786_v43 }
 0xc16   :  { %3703 = vmatprep.subr.mxu0 %v7792_v61  ;;  %3774 = vmatprep.subr.mxu1 %v7798_v59 }
 0xc17   :  { %3704 = vmatpush1.msra.mxu0 %v7901_v4  ;;  %3775 = vmatpush1.msra.mxu1 %v7907_v21 }
 0xc18   :  { %3705 = vmatprep.subr.mxu0 %v7913_v22  ;;  %3776 = vmatprep.subr.mxu1 %v7919_v23 }
 0xc19   :  { %3706 = vmatpush1.msra.mxu0 %v7925_v24  ;;  %3777 = vmatpush1.msra.mxu1 %v7931_v25 }
 0xc1a   :  { %3707 = vmatprep.subr.mxu0 %v7937_v28  ;;  %3778 = vmatprep.subr.mxu1 %v7943_v30 }
 0xc1b   :  { %3708 = vmatpush1.msra.mxu0 %v7949_v31  ;;  %3779 = vmatpush1.msra.mxu1 %v7955_v32 }
 0xc1c   :  { %3709 = vmatprep.subr.mxu0 %v7961_v33  ;;  %3780 = vmatprep.subr.mxu1 %v7967_v34 }
 0xc1d   :  { %3710 = vmatpush1.msra.mxu0 %v7973_v35  ;;  %3781 = vmatpush1.msra.mxu1 %v7979_v11 }
 0xc1e   :  { %3711 = vmatprep.subr.mxu0 %v7985_v29  ;;  %3782 = vmatprep.subr.mxu1 %v7991_v27 }
 0xc1f   :  { %3712 = vmatpush1.msra.mxu0 %v7997_v6  ;;  %3783 = vmatpush1.msra.mxu1 %v8003_v5 }
 0xc20   :  { %3713 = vmatprep.subr.mxu0 %v8009_v51  ;;  %3784 = vmatprep.subr.mxu1 %v8015_v0 }
 0xc21   :  { %3714 = vmatpush1.msra.mxu0 %v8021_v54  ;;  %3785 = vmatpush1.msra.mxu1 %v8027_v47 }
 0xc22   :  { %3715 = vmatprep.subr.mxu0 %v8033_v60  ;;  %3786 = vmatprep.subr.mxu1 %v8039_v1  ;;  %v9035_v60 = vld [vmem:[#allocation32_spill] sm:$0xff] }
 0xc23   :  { %3716 = vmatpush1.msra.mxu0 %v8045_v56  ;;  %3787 = vmatpush1.msra.mxu1 %v8051_v57 }
 0xc24   :  { %3717 = vmatprep.subr.mxu0 %v8057_v55  ;;  %3788 = vmatprep.subr.mxu1 %v8063_v2 }
 0xc25   :  { %3718 = vmatpush1.msra.mxu0 %v8069_v7  ;;  %3789 = vmatpush1.msra.mxu1 %v8075_v8 }
 0xc26   :  { %3719 = vmatprep.subr.mxu0 %v8081_v9  ;;  %3790 = vmatprep.subr.mxu1 %v8087_v10  ;;  %v8111_v10 = vld [vmem:[%s8432_s3 + $0x238] sm:$0xff] }
 0xc27   :  { %3720 = vmatpush1.msra.mxu0 %v8093_v38  ;;  %3791 = vmatpush1.msra.mxu1 %v8099_v13  ;;  %9025 = vst [vmem:[#allocation13_spill] sm:$0xff] %v8111_v10  ;;  %v8117_v38 = vld [vmem:[%s8432_s3 + $0x220] sm:$0xff]  ;;  %v8123_v13 = vld [vmem:[%s8432_s3 + $0x230] sm:$0xff] }
 0xc28   :  { %3721 = vmatprep.subr.mxu0 %v8105_v15  ;;  %3792 = vmatprep.subr.mxu1 %v8111_v10  ;;  %9026 = vst [vmem:[#allocation14_spill] sm:$0xff] %v8117_v38  ;;  %9027 = vst [vmem:[#allocation15_spill] sm:$0xff] %v8123_v13  ;;  %v8129_v15 = vld [vmem:[%s8432_s3 + $0x208] sm:$0xff]  ;;  %v8135_v10 = vld [vmem:[%s8432_s3 + $0x218] sm:$0xff] }
 0xc29   :  { %3722 = vmatpush1.msra.mxu0 %v8117_v38  ;;  %3793 = vmatpush1.msra.mxu1 %v8123_v13  ;;  %9028 = vst [vmem:[#allocation16_spill] sm:$0xff] %v8129_v15  ;;  %9029 = vst [vmem:[#allocation17_spill] sm:$0xff] %v8135_v10  ;;  %v8141_v38 = vld [vmem:[%s8432_s3 + $0x200] sm:$0xff] }
 0xc2a   :  { %3723 = vmatprep.subr.mxu0 %v8129_v15  ;;  %3794 = vmatprep.subr.mxu1 %v8135_v10  ;;  %9030 = vst [vmem:[#allocation18_spill] sm:$0xff] %v8141_v38  ;;  %v8148_v15 = vld [vmem:[%s8432_s3 + $0x210] sm:$0xff] }
 0xc2b   :  { %3724 = vmatpush1.msra.mxu0 %v8141_v38  ;;  %3757 = vmatprep.mubr.f32.mxu0 %v8999_v14  ;;  %9031 = vst [vmem:[#allocation19_spill] sm:$0xff] %v8148_v15  ;;  %v9032_v10 = vld [vmem:[#allocation8_spill] sm:$0xff]  ;;  %v9033_v38 = vld [vmem:[#allocation53_spill] sm:$0xff] }
 0xc2c   :  { %3795 = vmatpush1.msra.mxu1 %v8148_v15  ;;  %3828 = vmatprep.mubr.f32.mxu1 %v8999_v14  ;;  %v2573_v13 = vadd.f32 %v9032_v10, %v9003_v18  ;;  %v2575_v8 = vadd.f32 %v9033_v38, %v7473_v46  ;;  %v2686_v10 = vadd.f32 %v9035_v60, %v7490_v53 }
 0xc2d   :  { %3869 = vmatprep.subr.mxu0 %v7848_v16  ;;  %3940 = vmatprep.subr.mxu1 %v7854_v17  ;;  %v9034_v16 = vld [vmem:[#allocation55_spill] sm:$0xff] }
 0xc2e   :  { %v2688_v1 = vadd.f32 %v9034_v16, %v8961_v58 }
 0xccc   :  { %v3583_v9 = vpop.f32.mrf.mxu0  ;;  %v3654_v56 = vpop.f32.mrf.mxu1 }
 0xccd   :  { %v3659_v7 = vadd.f32 %v3583_v9, %v2573_v13  ;;  %v3661_v18 = vadd.f32 %v3654_v56, %v2686_v10  ;;  %v9040_v10 = vld [vmem:[#allocation7_spill] sm:$0xff] }
 0xcce   :  { %v3585_v2 = vpop.f32.mrf.mxu0  ;;  %v3656_v14 = vpop.f32.mrf.mxu1 }
 0xccf   :  { %v4487_v55 = vmul.f32 -1.442695, %v3659_v7  ;;  %v3660_v57 = vadd.f32 %v3585_v2, %v2575_v8  ;;  %v3662_v17 = vadd.f32 %v3656_v14, %v2688_v1 }
 0xcd1   :  { %4755 = vpow2.f32 %v4487_v55  ;;  %v4488_v15 = vmul.f32 -1.442695, %v3660_v57  ;;  %v4489_v47 = vmul.f32 -1.442695, %v3662_v17  ;;  %v9052_v17 = vld [vmem:[#allocation13_spill] sm:$0xff] }
 0xcd3   :  { %4757 = vpow2.f32 %v4488_v15  ;;  %v9039_v15 = vld [vmem:[#allocation28_spill] sm:$0xff] }
 0xcd4   :  { %4759 = vtanh.f32 %v3661_v18 }
 0xcd5   :  { %4761 = vpow2.f32 %v4489_v47 }
 0xcde   :  { %v4756_v54 = vpop.eup %4755 }
 0xcdf   :  { %v3666_v38 = vadd.f32 1.0, %v4756_v54 }
 0xce0   :  { %v4758_v9 = vpop.eup %4757 }
 0xce1   :  { %4763 = vrcp.f32 %v3666_v38  ;;  %v3672_v55 = vadd.f32 1.0, %v4758_v9  ;;  %v4760_v57 = vpop.eup %4759  ;;  %v9041_v38 = vld [vmem:[#allocation39_spill] sm:$0xff]  ;;  %v9042_v9 = vld [vmem:[#allocation40_spill] sm:$0xff] }
 0xce2   :  { %v4762_v2 = vpop.eup %4761 }
 0xce3   :  { %4765 = vrcp.f32 %v3672_v55  ;;  %v3679_v16 = vadd.f32 1.0, %v4762_v2  ;;  %v9043_v55 = vld [vmem:[#allocation38_spill] sm:$0xff] }
 0xce4   :  { %v9045_v2 = vld [vmem:[#allocation10_spill] sm:$0xff] }
 0xce5   :  { %4767 = vrcp.f32 %v3679_v16  ;;  %v9049_v16 = vld [vmem:[#allocation42_spill] sm:$0xff] }
 0xcee   :  { %v4764_v7 = vpop.eup %4763 }
 0xcef   :  { %v3683_v8 = vmul.f32 %v4764_v7, %v4760_v57  ;;  %v9044_v57 = vld [vmem:[#allocation9_spill] sm:$0xff] }
 0xcf0   :  { %v4766_v13 = vpop.eup %4765  ;;  %v9046_v7 = vld [vmem:[#allocation41_spill] sm:$0xff] }
 0xcf1   :  { %v3682_v14 = vmul.f32 %v4766_v13, %v7869_v12  ;;  %v9048_v13 = vld [vmem:[#allocation44_spill] sm:$0xff] }
 0xcf2   :  { %v4768_v54 = vpop.eup %4767 }
 0xcf3   :  { %v3684_v1 = vadd.f32 %v3683_v8, %v3682_v14  ;;  %v9047_v8 = vld [vmem:[#allocation43_spill] sm:$0xff] }
 0xcf4   :  { %v9050_v14 = vld [vmem:[#allocation11_spill] sm:$0xff] }
 0xcf5   :  { %4769 = vtanh.f32 %v3684_v1  ;;  %v8166_v18 = vsel %vm1632_vm12, %v3684_v1, %v7869_v12  ;;  %v9037_v12 = vld [vmem:[#allocation69_spill] sm:$0xff]  ;;  %v9051_v1 = vld [vmem:[#allocation12_spill] sm:$0xff] }
 0xd02   :  { %v4770_v47 = vpop.eup %4769 }
 0xd03   :  { %v3686_v60 = vmul.f32 %v4770_v47, %v4768_v54  ;;  %v9053_v54 = vld [vmem:[#allocation14_spill] sm:$0xff]  ;;  %v9054_v47 = vld [vmem:[#allocation15_spill] sm:$0xff] }
 0xd05   :  { %v8171_v56 = vsel %vm1632_vm12, %v3686_v60, %v7874_v19  ;;  %v9038_v19 = vld [vmem:[#allocation45_spill] sm:$0xff]  ;;  %v9055_v60 = vld [vmem:[#allocation16_spill] sm:$0xff] }
 0xd06   :  { %3758 = vmatmul.mubr.f32.vlgmr.msra.gmra.mxu0 %v8171_v56  ;;  %3829 = vmatmul.mubr.f32.vlgmr.msra.gmra.mxu1 %v8171_v56 }
 0xd07   :  { %3870 = vmatpush1.msra.mxu0 %v7684_v45  ;;  %3941 = vmatpush1.msra.mxu1 %v7690_v39 }
 0xd08   :  { %3871 = vmatprep.subr.mxu0 %v7696_v26  ;;  %3942 = vmatprep.subr.mxu1 %v7702_v48 }
 0xd09   :  { %3872 = vmatpush1.msra.mxu0 %v7708_v37  ;;  %3943 = vmatpush1.msra.mxu1 %v7714_v50 }
 0xd0a   :  { %3873 = vmatprep.subr.mxu0 %v7720_v49  ;;  %3944 = vmatprep.subr.mxu1 %v7726_v42 }
 0xd0b   :  { %3874 = vmatpush1.msra.mxu0 %v7732_v40  ;;  %3945 = vmatpush1.msra.mxu1 %v7738_v63 }
 0xd0c   :  { %3875 = vmatprep.subr.mxu0 %v7744_v41  ;;  %3946 = vmatprep.subr.mxu1 %v7750_v36 }
 0xd0d   :  { %3876 = vmatpush1.msra.mxu0 %v7756_v3  ;;  %3947 = vmatpush1.msra.mxu1 %v7762_v20 }
 0xd0e   :  { %3877 = vmatprep.subr.mxu0 %v7768_v44  ;;  %3948 = vmatprep.subr.mxu1 %v9009_v52 }
 0xd0f   :  { %3878 = vmatpush1.msra.mxu0 %v7780_v62  ;;  %3949 = vmatpush1.msra.mxu1 %v7786_v43 }
 0xd10   :  { %3879 = vmatprep.subr.mxu0 %v7792_v61  ;;  %3950 = vmatprep.subr.mxu1 %v7798_v59 }
 0xd11   :  { %3880 = vmatpush1.msra.mxu0 %v7901_v4  ;;  %3951 = vmatpush1.msra.mxu1 %v7907_v21 }
 0xd12   :  { %3881 = vmatprep.subr.mxu0 %v7913_v22  ;;  %3952 = vmatprep.subr.mxu1 %v7919_v23 }
 0xd13   :  { %3882 = vmatpush1.msra.mxu0 %v7925_v24  ;;  %3953 = vmatpush1.msra.mxu1 %v7931_v25 }
 0xd14   :  { %3883 = vmatprep.subr.mxu0 %v7937_v28  ;;  %3954 = vmatprep.subr.mxu1 %v7943_v30 }
 0xd15   :  { %3884 = vmatpush1.msra.mxu0 %v7949_v31  ;;  %3955 = vmatpush1.msra.mxu1 %v7955_v32 }
 0xd16   :  { %3885 = vmatprep.subr.mxu0 %v7961_v33  ;;  %3956 = vmatprep.subr.mxu1 %v7967_v34 }
 0xd17   :  { %3886 = vmatpush1.msra.mxu0 %v7973_v35  ;;  %3957 = vmatpush1.msra.mxu1 %v7979_v11 }
 0xd18   :  { %3887 = vmatprep.subr.mxu0 %v7985_v29  ;;  %3958 = vmatprep.subr.mxu1 %v7991_v27 }
 0xd19   :  { %3888 = vmatpush1.msra.mxu0 %v7997_v6  ;;  %3959 = vmatpush1.msra.mxu1 %v8003_v5 }
 0xd1a   :  { %3889 = vmatprep.subr.mxu0 %v8009_v51  ;;  %3960 = vmatprep.subr.mxu1 %v8015_v0 }
 0xd1b   :  { %3890 = vmatpush1.msra.mxu0 %v9037_v12  ;;  %3961 = vmatpush1.msra.mxu1 %v9038_v19 }
 0xd1c   :  { %3891 = vmatprep.subr.mxu0 %v9039_v15  ;;  %3962 = vmatprep.subr.mxu1 %v9040_v10  ;;  %v9066_v15 = vld [vmem:[#allocation54_spill] sm:$0xff] }
 0xd1d   :  { %3892 = vmatpush1.msra.mxu0 %v9041_v38  ;;  %3963 = vmatpush1.msra.mxu1 %v9042_v9 }
 0xd1e   :  { %3893 = vmatprep.subr.mxu0 %v9043_v55  ;;  %3964 = vmatprep.subr.mxu1 %v9044_v57 }
 0xd1f   :  { %3894 = vmatpush1.msra.mxu0 %v9045_v2  ;;  %3965 = vmatpush1.msra.mxu1 %v9046_v7  ;;  %v9056_v2 = vld [vmem:[#allocation17_spill] sm:$0xff]  ;;  %v9057_v7 = vld [vmem:[#allocation18_spill] sm:$0xff] }
 0xd20   :  { %3895 = vmatprep.subr.mxu0 %v9047_v8  ;;  %3966 = vmatprep.subr.mxu1 %v9048_v13  ;;  %v9058_v8 = vmov 0.0   ;;  %v9059_v13 = vld [vmem:[#allocation19_spill] sm:$0xff] }
 0xd21   :  { %3896 = vmatpush1.msra.mxu0 %v9049_v16  ;;  %3967 = vmatpush1.msra.mxu1 %v9050_v14  ;;  %v9060_v14 = vld [vmem:[#allocation27_spill] sm:$0xff] }
 0xd22   :  { %3897 = vmatprep.subr.mxu0 %v9051_v1  ;;  %3968 = vmatprep.subr.mxu1 %v9052_v17  ;;  %v9061_v1 = vld [vmem:[#allocation24_spill] sm:$0xff]  ;;  %v9062_v17 = vld [vmem:[#allocation29_spill] sm:$0xff] }
 0xd23   :  { %3898 = vmatpush1.msra.mxu0 %v9053_v54  ;;  %3969 = vmatpush1.msra.mxu1 %v9054_v47  ;;  %v9063_v54 = vld [vmem:[#allocation56_spill] sm:$0xff] }
 0xd24   :  { %3899 = vmatprep.subr.mxu0 %v9055_v60  ;;  %3970 = vmatprep.subr.mxu1 %v9056_v2  ;;  %v2579_v16 = vadd.f32 %v9063_v54, %v9062_v17  ;;  %v9064_v60 = vld [vmem:[#allocation59_spill] sm:$0xff]  ;;  %v2692_v54 = vadd.f32 %v9066_v15, %v7490_v53 }
 0xd25   :  { %3900 = vmatpush1.msra.mxu0 %v9057_v7  ;;  %3933 = vmatprep.mubr.f32.mxu0 %v9058_v8  ;;  %v2581_v57 = vadd.f32 %v9064_v60, %v7473_v46 }
 0xd26   :  { %3971 = vmatpush1.msra.mxu1 %v9059_v13  ;;  %4004 = vmatprep.mubr.f32.mxu1 %v9058_v8 }
 0xd27   :  { %4045 = vmatprep.subr.mxu0 %v9060_v14  ;;  %4116 = vmatprep.subr.mxu1 %v9061_v1  ;;  %v9065_v14 = vld [vmem:[#allocation60_spill] sm:$0xff] }
 0xd28   :  { %v2694_v10 = vadd.f32 %v9065_v14, %v8961_v58 }
 0xdc6   :  { %v3759_v47 = vpop.f32.mrf.mxu0  ;;  %v3830_v38 = vpop.f32.mrf.mxu1 }
 0xdc7   :  { %v3835_v2 = vadd.f32 %v3759_v47, %v2579_v16  ;;  %v3837_v17 = vadd.f32 %v3830_v38, %v2692_v54 }
 0xdc8   :  { %v3761_v55 = vpop.f32.mrf.mxu0  ;;  %v3832_v8 = vpop.f32.mrf.mxu1 }
 0xdc9   :  { %v4490_v7 = vmul.f32 -1.442695, %v3835_v2  ;;  %v3836_v9 = vadd.f32 %v3761_v55, %v2581_v57  ;;  %v3838_v1 = vadd.f32 %v3832_v8, %v2694_v10 }
 0xdcb   :  { %4771 = vpow2.f32 %v4490_v7  ;;  %v4491_v13 = vmul.f32 -1.442695, %v3836_v9  ;;  %v4492_v19 = vmul.f32 -1.442695, %v3838_v1 }
 0xdcd   :  { %4773 = vpow2.f32 %v4491_v13 }
 0xdce   :  { %4775 = vtanh.f32 %v3837_v17 }
 0xdcf   :  { %4777 = vpow2.f32 %v4492_v19 }
 0xdd8   :  { %v4772_v12 = vpop.eup %4771 }
 0xdd9   :  { %v3842_v60 = vadd.f32 1.0, %v4772_v12 }
 0xdda   :  { %v4774_v16 = vpop.eup %4773 }
 0xddb   :  { %4779 = vrcp.f32 %v3842_v60  ;;  %v3848_v55 = vadd.f32 1.0, %v4774_v16  ;;  %v4776_v9 = vpop.eup %4775 }
 0xddc   :  { %v4778_v57 = vpop.eup %4777 }
 0xddd   :  { %4781 = vrcp.f32 %v3848_v55  ;;  %v3855_v47 = vadd.f32 1.0, %v4778_v57 }
 0xddf   :  { %4783 = vrcp.f32 %v3855_v47 }
 0xde8   :  { %v4780_v2 = vpop.eup %4779 }
 0xde9   :  { %v3859_v7 = vmul.f32 %v4780_v2, %v4776_v9 }
 0xdea   :  { %v4782_v13 = vpop.eup %4781 }
 0xdeb   :  { %v3858_v10 = vmul.f32 %v4782_v13, %v8166_v18 }
 0xdec   :  { %v4784_v19 = vpop.eup %4783 }
 0xded   :  { %v3860_v8 = vadd.f32 %v3859_v7, %v3858_v10 }
 0xdef   :  { %4785 = vtanh.f32 %v3860_v8  ;;  %v8253_v12 = vsel %vm1881_vm13, %v3860_v8, %v8166_v18 }
 0xdfc   :  { %v4786_v38 = vpop.eup %4785 }
 0xdfd   :  { %v3862_v17 = vmul.f32 %v4786_v38, %v4784_v19 }
 0xdff   :  { %v8258_v14 = vsel %vm1881_vm13, %v3862_v17, %v8171_v56 }
 0xe00   :  { %3934 = vmatmul.mubr.f32.vlgmr.msra.gmra.mxu0 %v8258_v14  ;;  %4005 = vmatmul.mubr.f32.vlgmr.msra.gmra.mxu1 %v8258_v14 }
 0xe01   :  { %4046 = vmatpush1.msra.mxu0 %v7684_v45  ;;  %4117 = vmatpush1.msra.mxu1 %v7690_v39  ;;  %v9068_v45 = vld [vmem:[#allocation69_spill] sm:$0xff] }
 0xe02   :  { %4047 = vmatprep.subr.mxu0 %v7696_v26  ;;  %4118 = vmatprep.subr.mxu1 %v7702_v48  ;;  %v9069_v39 = vld [vmem:[#allocation45_spill] sm:$0xff]  ;;  %v9070_v26 = vld [vmem:[#allocation28_spill] sm:$0xff]  ;;  %v9071_v48 = vld [vmem:[#allocation7_spill] sm:$0xff] }
 0xe03   :  { %4048 = vmatpush1.msra.mxu0 %v7708_v37  ;;  %4119 = vmatpush1.msra.mxu1 %v7714_v50  ;;  %v9072_v37 = vld [vmem:[#allocation39_spill] sm:$0xff]  ;;  %v9073_v50 = vld [vmem:[#allocation40_spill] sm:$0xff] }
 0xe04   :  { %4049 = vmatprep.subr.mxu0 %v7720_v49  ;;  %4120 = vmatprep.subr.mxu1 %v7726_v42  ;;  %v9074_v49 = vld [vmem:[#allocation38_spill] sm:$0xff]  ;;  %v9075_v42 = vld [vmem:[#allocation9_spill] sm:$0xff] }
 0xe05   :  { %4050 = vmatpush1.msra.mxu0 %v7732_v40  ;;  %4121 = vmatpush1.msra.mxu1 %v7738_v63  ;;  %v9076_v40 = vld [vmem:[#allocation10_spill] sm:$0xff]  ;;  %v9077_v63 = vld [vmem:[#allocation41_spill] sm:$0xff] }
 0xe06   :  { %4051 = vmatprep.subr.mxu0 %v7744_v41  ;;  %4122 = vmatprep.subr.mxu1 %v7750_v36  ;;  %v9078_v41 = vld [vmem:[#allocation43_spill] sm:$0xff]  ;;  %v9079_v36 = vld [vmem:[#allocation44_spill] sm:$0xff] }
 0xe07   :  { %4052 = vmatpush1.msra.mxu0 %v7756_v3  ;;  %4123 = vmatpush1.msra.mxu1 %v7762_v20  ;;  %v9080_v3 = vld [vmem:[#allocation42_spill] sm:$0xff]  ;;  %v9081_v20 = vld [vmem:[#allocation11_spill] sm:$0xff] }
 0xe08   :  { %4053 = vmatprep.subr.mxu0 %v7768_v44  ;;  %4124 = vmatprep.subr.mxu1 %v9009_v52  ;;  %v9082_v44 = vld [vmem:[#allocation12_spill] sm:$0xff]  ;;  %v9087_v52 = vld [vmem:[#allocation17_spill] sm:$0xff] }
 0xe09   :  { %4054 = vmatpush1.msra.mxu0 %v7780_v62  ;;  %4125 = vmatpush1.msra.mxu1 %v7786_v43  ;;  %v9084_v62 = vld [vmem:[#allocation14_spill] sm:$0xff]  ;;  %v9085_v43 = vld [vmem:[#allocation15_spill] sm:$0xff] }
 0xe0a   :  { %4055 = vmatprep.subr.mxu0 %v7792_v61  ;;  %4126 = vmatprep.subr.mxu1 %v7798_v59  ;;  %v9083_v59 = vld [vmem:[#allocation13_spill] sm:$0xff]  ;;  %v9086_v61 = vld [vmem:[#allocation16_spill] sm:$0xff] }
 0xe0b   :  { %4056 = vmatpush1.msra.mxu0 %v7901_v4  ;;  %4127 = vmatpush1.msra.mxu1 %v7907_v21  ;;  %v9088_v4 = vld [vmem:[#allocation18_spill] sm:$0xff]  ;;  %v9089_v21 = vmov 0.0  }
 0xe0c   :  { %4057 = vmatprep.subr.mxu0 %v7913_v22  ;;  %4128 = vmatprep.subr.mxu1 %v7919_v23  ;;  %v9090_v22 = vld [vmem:[#allocation19_spill] sm:$0xff]  ;;  %v9091_v23 = vld [vmem:[#allocation29_spill] sm:$0xff] }
 0xe0d   :  { %4058 = vmatpush1.msra.mxu0 %v7925_v24  ;;  %4129 = vmatpush1.msra.mxu1 %v7931_v25  ;;  %v9092_v24 = vld [vmem:[#allocation61_spill] sm:$0xff] }
 0xe0e   :  { %4059 = vmatprep.subr.mxu0 %v7937_v28  ;;  %4130 = vmatprep.subr.mxu1 %v7943_v30  ;;  %v2585_v25 = vadd.f32 %v9092_v24, %v9091_v23  ;;  %v9093_v30 = vld [vmem:[#allocation63_spill] sm:$0xff] }
 0xe0f   :  { %4060 = vmatpush1.msra.mxu0 %v7949_v31  ;;  %4131 = vmatpush1.msra.mxu1 %v7955_v32  ;;  %v2587_v31 = vadd.f32 %v9093_v30, %v7473_v46 }
 0xe10   :  { %4061 = vmatprep.subr.mxu0 %v7961_v33  ;;  %4132 = vmatprep.subr.mxu1 %v7967_v34 }
 0xe11   :  { %4062 = vmatpush1.msra.mxu0 %v7973_v35  ;;  %4133 = vmatpush1.msra.mxu1 %v7979_v11 }
 0xe12   :  { %4063 = vmatprep.subr.mxu0 %v7985_v29  ;;  %4134 = vmatprep.subr.mxu1 %v7991_v27 }
 0xe13   :  { %4064 = vmatpush1.msra.mxu0 %v7997_v6  ;;  %4135 = vmatpush1.msra.mxu1 %v8003_v5  ;;  %v9094_v6 = vld [vmem:[#allocation64_spill] sm:$0xff] }
 0xe14   :  { %4065 = vmatprep.subr.mxu0 %v8009_v51  ;;  %4136 = vmatprep.subr.mxu1 %v8015_v0  ;;  %v2700_v5 = vadd.f32 %v9094_v6, %v8961_v58  ;;  %v9095_v0 = vld [vmem:[#allocation62_spill] sm:$0xff] }
 0xe15   :  { %4066 = vmatpush1.msra.mxu0 %v9068_v45  ;;  %4137 = vmatpush1.msra.mxu1 %v9069_v39  ;;  %v2698_v18 = vadd.f32 %v9095_v0, %v7490_v53 }
 0xe16   :  { %4067 = vmatprep.subr.mxu0 %v9070_v26  ;;  %4138 = vmatprep.subr.mxu1 %v9071_v48  ;;  %v4238_v26 = vld [vmem:[%s8435_s5 + $0x78] sm:$0xff]  ;;  %v4235_v48 = vld [vmem:[%s8435_s5 + $0x60] sm:$0xff] }
 0xe17   :  { %4068 = vmatpush1.msra.mxu0 %v9072_v37  ;;  %4139 = vmatpush1.msra.mxu1 %v9073_v50  ;;  %v4234_v37 = vld [vmem:[%s8435_s5 + $0x58] sm:$0xff]  ;;  %v4233_v50 = vld [vmem:[%s8435_s5 + $0x50] sm:$0xff] }
 0xe18   :  { %4069 = vmatprep.subr.mxu0 %v9074_v49  ;;  %4140 = vmatprep.subr.mxu1 %v9075_v42  ;;  %v4232_v49 = vld [vmem:[%s8435_s5 + $0x48] sm:$0xff]  ;;  %v4231_v42 = vld [vmem:[%s8435_s5 + $0x40] sm:$0xff] }
 0xe19   :  { %4070 = vmatpush1.msra.mxu0 %v9076_v40  ;;  %4141 = vmatpush1.msra.mxu1 %v9077_v63  ;;  %v4230_v40 = vld [vmem:[%s8435_s5 + $0x38] sm:$0xff]  ;;  %v4229_v63 = vld [vmem:[%s8435_s5 + $0x30] sm:$0xff] }
 0xe1a   :  { %4071 = vmatprep.subr.mxu0 %v9078_v41  ;;  %4142 = vmatprep.subr.mxu1 %v9079_v36  ;;  %v4228_v41 = vld [vmem:[%s8435_s5 + $0x28] sm:$0xff]  ;;  %v4227_v36 = vld [vmem:[%s8435_s5 + $0x20] sm:$0xff] }
 0xe1b   :  { %4072 = vmatpush1.msra.mxu0 %v9080_v3  ;;  %4143 = vmatpush1.msra.mxu1 %v9081_v20  ;;  %v4226_v3 = vld [vmem:[%s8435_s5 + $0x18] sm:$0xff]  ;;  %v4225_v20 = vld [vmem:[%s8435_s5 + $0x10] sm:$0xff] }
 0xe1c   :  { %4073 = vmatprep.subr.mxu0 %v9082_v44  ;;  %4144 = vmatprep.subr.mxu1 %v9083_v59  ;;  %v4224_v44 = vld [vmem:[%s8435_s5 + $0x8] sm:$0xff]  ;;  %v4223_v59 = vld [vmem:[%s8435_s5] sm:$0xff] }
 0xe1d   :  { %4074 = vmatpush1.msra.mxu0 %v9084_v62  ;;  %4145 = vmatpush1.msra.mxu1 %v9085_v43  ;;  %v12_v62 = vstv %s8436_s6  ;;  %v9097_v43 = vld [vmem:[#allocation65_spill] sm:$0xff] }
 0xe1e   :  { %4075 = vmatprep.subr.mxu0 %v9086_v61  ;;  %4146 = vmatprep.subr.mxu1 %v9087_v52  ;;  %13 = vst [vmem:[#allocation6] sm:$0x1] %v12_v62  ;;  %v2591_v61 = vadd.f32 %v9097_v43, %v9091_v23 }
 0xe1f   :  { %4076 = vmatpush1.msra.mxu0 %v9088_v4  ;;  %4109 = vmatprep.mubr.f32.mxu0 %v9089_v21  ;;  %v9098_v4 = vld [vmem:[#allocation67_spill] sm:$0xff] }
 0xe20   :  { %4147 = vmatpush1.msra.mxu1 %v9090_v22  ;;  %4180 = vmatprep.mubr.f32.mxu1 %v9089_v21  ;;  %v2593_v22 = vadd.f32 %v9098_v4, %v7473_v46 }
 0xe21   :  { %4523 = vmatprep.subr.mxu0 %v9089_v21 }
 0xec0   :  { %v3935_v28 = vpop.f32.mrf.mxu0  ;;  %v4006_v11 = vpop.f32.mrf.mxu1 }
 0xec1   :  { %v4011_v32 = vadd.f32 %v3935_v28, %v2585_v25  ;;  %v4013_v56 = vadd.f32 %v4006_v11, %v2698_v18  ;;  %v9100_v11 = vld [vmem:[#allocation66_spill] sm:$0xff] }
 0xec2   :  { %v3937_v33 = vpop.f32.mrf.mxu0  ;;  %v4008_v27 = vpop.f32.mrf.mxu1  ;;  %v2704_v23 = vadd.f32 %v9100_v11, %v7490_v53 }
 0xec3   :  { %v4493_v34 = vmul.f32 -1.442695, %v4011_v32  ;;  %v4012_v35 = vadd.f32 %v3937_v33, %v2587_v31  ;;  %v4014_v51 = vadd.f32 %v4008_v27, %v2700_v5  ;;  %v9099_v33 = vld [vmem:[#allocation68_spill] sm:$0xff] }
 0xec5   :  { %4787 = vpow2.f32 %v4493_v34  ;;  %v4494_v29 = vmul.f32 -1.442695, %v4012_v35  ;;  %v4495_v1 = vmul.f32 -1.442695, %v4014_v51  ;;  %v2706_v34 = vadd.f32 %v9099_v33, %v8961_v58 }
 0xec7   :  { %4789 = vpow2.f32 %v4494_v29 }
 0xec8   :  { %4791 = vtanh.f32 %v4013_v56 }
 0xec9   :  { %4793 = vpow2.f32 %v4495_v1 }
 0xed2   :  { %v4788_v54 = vpop.eup %4787 }
 0xed3   :  { %v4018_v60 = vadd.f32 1.0, %v4788_v54 }
 0xed4   :  { %v4790_v16 = vpop.eup %4789 }
 0xed5   :  { %4795 = vrcp.f32 %v4018_v60  ;;  %v4024_v55 = vadd.f32 1.0, %v4790_v16  ;;  %v4792_v9 = vpop.eup %4791 }
 0xed6   :  { %v4794_v57 = vpop.eup %4793 }
 0xed7   :  { %4797 = vrcp.f32 %v4024_v55  ;;  %v4031_v47 = vadd.f32 1.0, %v4794_v57 }
 0xed9   :  { %4799 = vrcp.f32 %v4031_v47 }
 0xee2   :  { %v4796_v2 = vpop.eup %4795 }
 0xee3   :  { %v4035_v7 = vmul.f32 %v4796_v2, %v4792_v9 }
 0xee4   :  { %v4798_v13 = vpop.eup %4797 }
 0xee5   :  { %v4034_v10 = vmul.f32 %v4798_v13, %v8253_v12 }
 0xee6   :  { %v4800_v38 = vpop.eup %4799 }
 0xee7   :  { %v4036_v8 = vadd.f32 %v4035_v7, %v4034_v10  ;;  %v4499_v7 = vld [vmem:[#allocation6] ss:$0 sm:$0xff] }
 0xee9   :  { %4801 = vtanh.f32 %v4036_v8  ;;  %v8339_v19 = vsel %vm2130_vm14, %v4036_v8, %v8253_v12  ;;  %v4237_v12 = vld [vmem:[%s8435_s5 + $0x70] sm:$0xff] }
 0xef6   :  { %v4802_v17 = vpop.eup %4801 }
 0xef7   :  { %v4038_v45 = vmul.f32 %v4802_v17, %v4800_v38 }
 0xef9   :  { %v8344_v39 = vsel %vm2130_vm14, %v4038_v45, %v8258_v14  ;;  %v4236_v14 = vld [vmem:[%s8435_s5 + $0x68] sm:$0xff] }
 0xefa   :  { %4110 = vmatmul.mubr.f32.vlgmr.msra.gmra.mxu0 %v8344_v39  ;;  %4181 = vmatmul.mubr.f32.vlgmr.msra.gmra.mxu1 %v8344_v39 }
 0xefb   :  { %4524 = vmatpush3.msra.mxu0 %v4238_v26  ;;  %4555 = vmatprep.mubr.msk.f32.mxu0 %vm4885_vm0, %v9089_v21 }
 0xefc   :  { %4525 = vmatprep.subr.mxu0 %v9089_v21 }
 0xefd   :  { %4526 = vmatpush3.msra.mxu0 %v4237_v12 }
 0xefe   :  { %4527 = vmatprep.subr.mxu0 %v9089_v21 }
 0xeff   :  { %4528 = vmatpush3.msra.mxu0 %v4236_v14 }
 0xf00   :  { %4529 = vmatprep.subr.mxu0 %v9089_v21 }
 0xf01   :  { %4530 = vmatpush3.msra.mxu0 %v4235_v48 }
 0xf02   :  { %4531 = vmatprep.subr.mxu0 %v9089_v21 }
 0xf03   :  { %4532 = vmatpush3.msra.mxu0 %v4234_v37 }
 0xf04   :  { %4533 = vmatprep.subr.mxu0 %v9089_v21 }
 0xf05   :  { %4534 = vmatpush3.msra.mxu0 %v4233_v50 }
 0xf06   :  { %4535 = vmatprep.subr.mxu0 %v9089_v21 }
 0xf07   :  { %4536 = vmatpush3.msra.mxu0 %v4232_v49 }
 0xf08   :  { %4537 = vmatprep.subr.mxu0 %v9089_v21 }
 0xf09   :  { %4538 = vmatpush3.msra.mxu0 %v4231_v42 }
 0xf0a   :  { %4539 = vmatprep.subr.mxu0 %v9089_v21 }
 0xf0b   :  { %4540 = vmatpush3.msra.mxu0 %v4230_v40 }
 0xf0c   :  { %4541 = vmatprep.subr.mxu0 %v9089_v21 }
 0xf0d   :  { %4542 = vmatpush3.msra.mxu0 %v4229_v63 }
 0xf0e   :  { %4543 = vmatprep.subr.mxu0 %v9089_v21 }
 0xf0f   :  { %4544 = vmatpush3.msra.mxu0 %v4228_v41 }
 0xf10   :  { %4545 = vmatprep.subr.mxu0 %v9089_v21 }
 0xf11   :  { %4546 = vmatpush3.msra.mxu0 %v4227_v36 }
 0xf12   :  { %4547 = vmatprep.subr.mxu0 %v9089_v21 }
 0xf13   :  { %4548 = vmatpush3.msra.mxu0 %v4226_v3 }
 0xf14   :  { %4549 = vmatprep.subr.mxu0 %v9089_v21 }
 0xf15   :  { %4550 = vmatpush3.msra.mxu0 %v4225_v20 }
 0xf16   :  { %4551 = vmatprep.subr.mxu0 %v9089_v21 }
 0xf17   :  { %4552 = vmatpush3.msra.mxu0 %v4224_v44 }
 0xf18   :  { %4553 = vmatprep.subr.mxu0 %v9089_v21 }
 0xf19   :  { %4554 = vmatpush3.msra.mxu0 %v4223_v59 }
 0xfba   :  { %v4111_v52 = vpop.f32.mrf.mxu0  ;;  %v4182_v31 = vpop.f32.mrf.mxu1 }
 0xfbb   :  { %v4187_v24 = vadd.f32 %v4111_v52, %v2591_v61  ;;  %v4189_v29 = vadd.f32 %v4182_v31, %v2704_v23 }
 0xfbc   :  { %v4113_v25 = vpop.f32.mrf.mxu0  ;;  %v4184_v32 = vpop.f32.mrf.mxu1 }
 0xfbd   :  { %v4496_v28 = vmul.f32 -1.442695, %v4187_v24  ;;  %v4188_v30 = vadd.f32 %v4113_v25, %v2593_v22  ;;  %v4190_v35 = vadd.f32 %v4184_v32, %v2706_v34 }
 0xfbf   :  { %4803 = vpow2.f32 %v4496_v28  ;;  %v4497_v21 = vmul.f32 -1.442695, %v4188_v30  ;;  %v4498_v27 = vmul.f32 -1.442695, %v4190_v35 }
 0xfc1   :  { %4805 = vpow2.f32 %v4497_v21 }
 0xfc2   :  { %4807 = vtanh.f32 %v4189_v29 }
 0xfc3   :  { %4809 = vpow2.f32 %v4498_v27 }
 0xfcc   :  { %v4804_v6 = vpop.eup %4803 }
 0xfcd   :  { %v4194_v46 = vadd.f32 1.0, %v4804_v6 }
 0xfce   :  { %v4806_v5 = vpop.eup %4805 }
 0xfcf   :  { %4811 = vrcp.f32 %v4194_v46  ;;  %v4200_v51 = vadd.f32 1.0, %v4806_v5  ;;  %v4808_v0 = vpop.eup %4807 }
 0xfd0   :  { %v4810_v18 = vpop.eup %4809 }
 0xfd1   :  { %4813 = vrcp.f32 %v4200_v51  ;;  %v4207_v58 = vadd.f32 1.0, %v4810_v18 }
 0xfd3   :  { %4815 = vrcp.f32 %v4207_v58 }
 0xfdc   :  { %v4812_v56 = vpop.eup %4811 }
 0xfdd   :  { %v4211_v1 = vmul.f32 %v4812_v56, %v4808_v0 }
 0xfde   :  { %v4814_v54 = vpop.eup %4813 }
 0xfdf   :  { %v4210_v60 = vmul.f32 %v4814_v54, %v8339_v19 }
 0xfe0   :  { %v4816_v53 = vpop.eup %4815 }
 0xfe1   :  { %v4212_v16 = vadd.f32 %v4211_v1, %v4210_v60 }
 0xfe3   :  { %4817 = vtanh.f32 %v4212_v16 }
 0xff0   :  { %v4818_v55 = vpop.eup %4817 }
 0xff1   :  { %v4214_v9 = vmul.f32 %v4818_v55, %v4816_v53 }
 0xff3   :  { %v4215_v2 = vsel %vm2379_vm15, %v4214_v9, %v8344_v39 }
 0xff4   :  { %4556 = vmatmul.mubr.f32.vlgmr.msra.gmra.mxu0 %v4215_v2 }
0x10b4   :  { %v4312_v13 = vpop.f32.mrf.mxu0 }
0x10b5   :  { %v4313_v47 = vadd.f32 %v4499_v7, %v4312_v13 }
0x10b6   :  { %v4557_v10 = vpop.f32.mrf.mxu0 }
0x10b7   :  { %4317 = vst.msk [vmem:[%s8437_s7] sm:$0xff] %vm4316_vm1, %v4313_v47 }

</bundles_post_ra>
